<compile_context>
chip_gen: v7x
topology: tpu7x:2x2x1
jax: 0.10.0
libtpu: 0.0.40
codegen_flags: <defaults>
</compile_context>

<pallas_src>
import math

import jax
import jax.numpy as jnp
from jax.experimental import pallas as pl
from jax.experimental.pallas import tpu as pltpu

# ----- model dimensions (match the PyTorch spec) -----
N_NODES = 14
NP = 16                      # nodes padded to 16 (sublane friendly)
SEQ_LEN = 8                  # small demo sequence length
GNN_FEATS = 3 * N_NODES      # 42  (input_rnn_size)
FP = 48                      # GNN feature lanes padded to 48
HIDDEN = N_NODES + 4         # 18  (hidden_size)
NLAYERS = 4                  # rnn1 (2 layers) + rnn2 (2 layers)
HL = NLAYERS * HIDDEN        # 72  stacked per-layer h lanes
GW = NLAYERS * 4 * HIDDEN    # 288 stacked gate lanes, grouped by gate type [i|f|o|g]
ROWS = NP * SEQ_LEN          # 128 time-major stacked node rows

# ----- bf16 MXU parameter block: row offsets are multiples of 16 (bf16 sublane tile) --
ROW_GW2 = 0                  # (FP, FP)  gconv2 weight (real 42x42)
ROW_WIH1 = 48                # (FP, GW)  LSTM layer-0 input weights, scattered to layer-0 gate cols
ROW_WCOMB = 96               # (HL, GW)  combined recurrent weights (wavefront layout)
M_ROWS = 168

# ----- f32 VPU parameter block rows -----
ROW_GW1 = 0                  # gconv1 weight (in_feats=1) in first 42 lanes
ROW_GB1 = 1                  # gconv1 bias
ROW_GB2 = 2                  # gconv2 bias
ROW_BC = 3                   # combined LSTM bias, all 4 layers (GW lanes)
ROW_FW = 4                   # fused fc weight (fc1w @ fc2w) in first HIDDEN lanes
ROW_FB = 5                   # fused fc bias at lane 0
V_ROWS = 8


# ------------------------------- Pallas kernel ------------------------------- #

def traj_kernel(bd_ref, x_ref, pm_ref, pv_ref, out_ref, gx_ref):
    H, T = HIDDEN, SEQ_LEN

    bd = bd_ref[...]                                     # (128,128) bf16 block-diag Ahat
    xs = x_ref[...].astype(jnp.bfloat16)                 # (128,1)

    gw1 = pv_ref[ROW_GW1:ROW_GW1 + 1, :FP]               # (1,48) f32 (zeros past lane 42)
    gb1 = pv_ref[ROW_GB1:ROW_GB1 + 1, :FP]
    gb2 = pv_ref[ROW_GB2:ROW_GB2 + 1, :FP]

    # GraphConv 1 (batched over all T timesteps):
    # relu(Ahat@(x*w1)+b1) == relu((Ahat@x)*w1 + b1)   (rank-1 identity -> matvec)
    ax = jnp.dot(bd, xs, preferred_element_type=jnp.float32)            # (128,1)
    h1 = jnp.maximum(ax * gw1 + gb1, 0.0)                               # (128,48)

    # GraphConv 2: relu((Ahat@h1)@W2 + b2)
    a2 = jnp.dot(bd, h1.astype(jnp.bfloat16), preferred_element_type=jnp.float32)
    gw2 = pm_ref[ROW_GW2:ROW_GW2 + FP, :FP]                             # (48,48) bf16
    h2 = jnp.maximum(
        jnp.dot(a2.astype(jnp.bfloat16), gw2,
                preferred_element_type=jnp.float32) + gb2, 0.0)         # (128,48)

    # Hoisted LSTM layer-0 input projection for ALL timesteps (one matmul), streamed to
    # VMEM scratch so only the per-step (16,288) slice is live in the recurrence.
    wih1 = pm_ref[ROW_WIH1:ROW_WIH1 + FP, :]                            # (48,288) bf16
    gx_ref[...] = jnp.dot(h2.astype(jnp.bfloat16), wih1,
                          preferred_element_type=jnp.float32)           # (128,288)

    # Wavefront recurrence over the 4 stacked LSTM layers.
    wcomb = pm_ref[ROW_WCOMB:ROW_WCOMB + HL, :]                         # (72,288) bf16
    bcomb = pv_ref[ROW_BC:ROW_BC + 1, :]                                # (1,288) f32
    fw = pv_ref[ROW_FW:ROW_FW + 1, :H]                                  # (1,18)  fused fc weight
    fb = pv_ref[ROW_FB:ROW_FB + 1, 0:1]                                 # (1,1)   fused fc bias

    h_all = jnp.zeros((NP, HL), jnp.float32)                            # [h0|h1|h2|h3]
    c_all = jnp.zeros((NP, HL), jnp.float32)
    lane = jax.lax.broadcasted_iota(jnp.int32, (NP, HL), 1)

    for s in range(T + NLAYERS - 1):                     # 11 static wavefront steps
        gates = jnp.dot(h_all.astype(jnp.bfloat16), wcomb,
                        preferred_element_type=jnp.float32) + bcomb     # (16,288)
        if s < T:                                        # layer 0 consumes gx[t = s]
            gates = gates + gx_ref[s * NP:(s + 1) * NP, :]
        # One EUP sigmoid over the whole slab; tanh recovered as 2*sigmoid(2x)-1
        # (the 2x is folded into the packed g-gate weights/biases).
        sg = jax.nn.sigmoid(gates)
        i_all = sg[:, 0 * HL:1 * HL]
        f_all = sg[:, 1 * HL:2 * HL]
        o_all = sg[:, 2 * HL:3 * HL]
        g_all = 2.0 * sg[:, 3 * HL:4 * HL] - 1.0
        c_new = f_all * c_all + i_all * g_all
        h_new = o_all * jnp.tanh(c_new)
        if s < NLAYERS - 1:
            # layers that have not started yet keep h = c = 0 (static lane mask)
            started = lane < (s + 1) * H
            c_all = jnp.where(started, c_new, c_all)
            h_all = jnp.where(started, h_new, h_all)
        else:
            c_all = c_new
            h_all = h_new
        # fused fc head on the top layer's fresh output, stored straight into out_ref
        t = s - (NLAYERS - 1)
        if t >= 0:
            h_top = h_all[:, (NLAYERS - 1) * H:NLAYERS * H]             # (16,18)
            out_ref[t * NP:(t + 1) * NP, :] = (
                jnp.sum(h_top * fw, axis=1, keepdims=True) + fb)


# ------------------------------ wrapper / packing ----------------------------- #

def _split_gates(w):
    """(rows, 4H) in PyTorch gate order (i,f,g,o) -> (i, f, o, 2*g) gate-type blocks."""
    H = HIDDEN
    return (w[:, 0:H], w[:, H:2 * H], w[:, 3 * H:4 * H], 2.0 * w[:, 2 * H:3 * H])


def pack_params(ahat, params):
    (gw1, gb1, gw2, gb2,
     wih1, whh1, b1, wih2, whh2, b2, wih3, whh3, b3, wih4, whh4, b4,
     fc1w, fc1b, fc2w, fc2b) = params
    H = HIDDEN
    wihs = (wih1, wih2, wih3, wih4)
    whhs = (whh1, whh2, whh3, whh4)
    bs = (b1, b2, b3, b4)

    # Combined recurrent weight for the wavefront: rows = stacked [h0|h1|h2|h3] lanes;
    # columns grouped by gate type [i|f|o|g], each HL wide with per-layer blocks of H.
    # Whh_l on the block diagonal, Wih_l (l>=1) on the sub-diagonal (input = h_{l-1}).
    wcomb = jnp.zeros((HL, GW), jnp.float32)
    bcomb = jnp.zeros((1, GW), jnp.float32)
    for l in range(NLAYERS):
        for g_idx, part in enumerate(_split_gates(whhs[l])):
            wcomb = wcomb.at[l * H:(l + 1) * H,
                             g_idx * HL + l * H:g_idx * HL + (l + 1) * H].set(part)
        if l >= 1:
            for g_idx, part in enumerate(_split_gates(wihs[l])):
                wcomb = wcomb.at[(l - 1) * H:l * H,
                                 g_idx * HL + l * H:g_idx * HL + (l + 1) * H].set(part)
        for g_idx, part in enumerate(_split_gates(bs[l])):
            bcomb = bcomb.at[:, g_idx * HL + l * H:g_idx * HL + (l + 1) * H].set(part)

    # Layer-0 input weights scattered into layer-0 gate columns (hoisted projection).
    wih1_full = jnp.zeros((FP, GW), jnp.float32)
    for g_idx, part in enumerate(_split_gates(wih1)):
        wih1_full = wih1_full.at[:GNN_FEATS, g_idx * HL:g_idx * HL + H].set(part)

    # bf16 MXU parameter block
    pm = jnp.zeros((M_ROWS, GW), jnp.float32)
    pm = pm.at[ROW_GW2:ROW_GW2 + GNN_FEATS, :GNN_FEATS].set(gw2)
    pm = pm.at[ROW_WIH1:ROW_WIH1 + FP, :].set(wih1_full)
    pm = pm.at[ROW_WCOMB:ROW_WCOMB + HL, :].set(wcomb)
    pm = pm.astype(jnp.bfloat16)

    # f32 VPU parameter block (conv scale/biases, combined LSTM bias, fused fc head)
    fwv = fc1w @ fc2w                        # fc2(fc1(h)) == h @ (fc1w@fc2w) + (fc1b@fc2w + fc2b)
    fbv = fc1b @ fc2w + fc2b
    pv = jnp.zeros((V_ROWS, GW), jnp.float32)
    pv = pv.at[ROW_GW1, :GNN_FEATS].set(gw1[0])
    pv = pv.at[ROW_GB1, :GNN_FEATS].set(gb1[0])
    pv = pv.at[ROW_GB2, :GNN_FEATS].set(gb2[0])
    pv = pv.at[ROW_BC, :].set(bcomb[0])
    pv = pv.at[ROW_FW, :H].set(fwv[:, 0])
    pv = pv.at[ROW_FB, 0].set(fbv[0, 0])

    # Block-diagonal normalized adjacency (one padded Ahat block per timestep), as a
    # bf16 MXU operand.  Padded rows/cols are zero -> pad nodes never couple into real ones.
    ahat_p = jnp.zeros((NP, NP), jnp.float32).at[:N_NODES, :N_NODES].set(ahat)
    bd = jnp.kron(jnp.eye(SEQ_LEN, dtype=jnp.float32), ahat_p).astype(jnp.bfloat16)
    return bd, pm, pv


def trajectory_forward(ahat, x3, params):
    """ahat: (14,14) normalized adjacency; x3: (14, SEQ_LEN, 1) node features."""
    bd, pm, pv = pack_params(ahat, params)

    x2d = x3[..., 0]                                                    # (14, T)
    xp = jnp.zeros((NP, SEQ_LEN), jnp.float32).at[:N_NODES, :].set(x2d)
    x_stack = xp.T.reshape(ROWS, 1)                                     # row = t*NP + node

    y = pl.pallas_call(
        traj_kernel,
        out_shape=jax.ShapeDtypeStruct((ROWS, 1), jnp.float32),
        in_specs=[pl.BlockSpec(memory_space=pltpu.MemorySpace.VMEM)] * 4,
        out_specs=pl.BlockSpec(memory_space=pltpu.MemorySpace.VMEM),
        scratch_shapes=[pltpu.VMEM((ROWS, GW), jnp.float32)],
    )(bd, x_stack, pm, pv)

    out2d = y.reshape(SEQ_LEN, NP)[:, :N_NODES].T                       # (14, T)
    return out2d.reshape(N_NODES, SEQ_LEN, 1)


# ----------------------------- pure-JAX reference ----------------------------- #
# Un-padded, un-fused, f32, PyTorch gate order (i,f,g,o), sequential layers — validates
# every kernel-side transformation (time batching, wavefront scheduling, gate-type
# regrouping, 2x-folded tanh trick, fc1·fc2 fusion, node/lane padding).

def reference_forward(ahat, x2d, params):
    (gw1, gb1, gw2, gb2,
     wih1, whh1, b1, wih2, whh2, b2, wih3, whh3, b3, wih4, whh4, b4,
     fc1w, fc1b, fc2w, fc2b) = params
    N, T = x2d.shape
    H = whh1.shape[0]

    seq = []
    for t in range(T):
        x_t = x2d[:, t:t + 1]
        a1 = ahat @ x_t
        h1 = jnp.maximum(a1 * gw1 + gb1, 0.0)
        a2 = ahat @ h1
        h2 = jnp.maximum(a2 @ gw2 + gb2, 0.0)
        seq.append(h2)

    def lstm(seq, wih, whh, b):
        h = jnp.zeros((N, H), jnp.float32)
        c = jnp.zeros((N, H), jnp.float32)
        outs = []
        for x_t in seq:
            gates = x_t @ wih + h @ whh + b
            i = jax.nn.sigmoid(gates[:, :H])
            f = jax.nn.sigmoid(gates[:, H:2 * H])
            g = jnp.tanh(gates[:, 2 * H:3 * H])
            o = jax.nn.sigmoid(gates[:, 3 * H:])
            c = f * c + i * g
            h = o * jnp.tanh(c)
            outs.append(h)
        return outs

    for wih, whh, b in ((wih1, whh1, b1), (wih2, whh2, b2),
                        (wih3, whh3, b3), (wih4, whh4, b4)):
        seq = lstm(seq, wih, whh, b)

    cols = [(h @ fc1w + fc1b) @ fc2w + fc2b for h in seq]
    return jnp.concatenate(cols, axis=1)


# ------------------------------------ main ------------------------------------ #

if __name__ == "__main__":
    key = jax.random.PRNGKey(0)
    ks = jax.random.split(key, 24)

    def uinit(k, shape, scale):
        return jax.random.uniform(k, shape, jnp.float32, minval=-scale, maxval=scale)

    F, H = GNN_FEATS, HIDDEN
    s = 1.0 / math.sqrt(H)

    # GraphConv params
    gw1 = uinit(ks[1], (1, F), 0.3)
    gb1 = uinit(ks[2], (1, F), 0.1)
    gw2 = uinit(ks[3], (F, F), 0.2)
    gb2 = uinit(ks[4], (1, F), 0.1)
    # 4 stacked LSTM layers (rnn1 layers 0/1, rnn2 layers 0/1).  Weights stored
    # transposed (in_dim, 4H); combined bias = b_ih + b_hh; PyTorch gate order (i,f,g,o).
    wih1 = uinit(ks[5], (F, 4 * H), s); whh1 = uinit(ks[6], (H, 4 * H), s); b1 = uinit(ks[7], (1, 4 * H), s)
    wih2 = uinit(ks[8], (H, 4 * H), s); whh2 = uinit(ks[9], (H, 4 * H), s); b2 = uinit(ks[10], (1, 4 * H), s)
    wih3 = uinit(ks[11], (H, 4 * H), s); whh3 = uinit(ks[12], (H, 4 * H), s); b3 = uinit(ks[13], (1, 4 * H), s)
    wih4 = uinit(ks[14], (H, 4 * H), s); whh4 = uinit(ks[15], (H, 4 * H), s); b4 = uinit(ks[16], (1, 4 * H), s)
    # Linear heads (stored transposed: (in, out))
    fc1w = uinit(ks[17], (H, H), s); fc1b = uinit(ks[18], (1, H), s)
    fc2w = uinit(ks[19], (H, 1), s); fc2b = uinit(ks[20], (1, 1), s)

    params = (gw1, gb1, gw2, gb2,
              wih1, whh1, b1, wih2, whh2, b2, wih3, whh3, b3, wih4, whh4, b4,
              fc1w, fc1b, fc2w, fc2b)

    # Deterministic graph: bidirectional ring over 14 nodes -> normalized adjacency
    # Ahat = D_in^{-1/2} A D_out^{-1/2} (DGL GraphConv, norm='both').
    src = jnp.arange(N_NODES)
    dst = (src + 1) % N_NODES
    A = jnp.zeros((N_NODES, N_NODES), jnp.float32)
    A = A.at[dst, src].set(1.0)
    A = A.at[src, dst].set(1.0)
    in_deg = jnp.maximum(A.sum(axis=1), 1.0)
    out_deg = jnp.maximum(A.sum(axis=0), 1.0)
    ahat = (1.0 / jnp.sqrt(in_deg))[:, None] * A * (1.0 / jnp.sqrt(out_deg))[None, :]

    # Input: test_obs[19, :, :].unsqueeze(2)  ->  (num_nodes, T, 1)
    x3 = jax.random.normal(ks[0], (N_NODES, SEQ_LEN, 1), jnp.float32)

    out = trajectory_forward(ahat, x3, params)
    out = jax.block_until_ready(out)

    ref = reference_forward(ahat, x3[..., 0], params).reshape(N_NODES, SEQ_LEN, 1)

    assert out.shape == (N_NODES, SEQ_LEN, 1), out.shape
    # bf16 MXU operands (f32 accumulation / elementwise) => slightly relaxed tolerance.
    assert jnp.allclose(out, ref, atol=2e-2, rtol=2e-2), "mismatch vs JAX reference"
    print("KERNEL_OK")
</pallas_src>

<mosaic_0001>
module attributes {stable_mosaic.version = 11 : i64} {
  func.func @traj_kernel(%arg0: memref<128x128xbf16, #tpu.memory_space<vmem>>, %arg1: memref<128x1xf32, #tpu.memory_space<vmem>>, %arg2: memref<168x288xbf16, #tpu.memory_space<vmem>>, %arg3: memref<8x288xf32, #tpu.memory_space<vmem>>, %arg4: memref<128x1xf32, #tpu.memory_space<vmem>>, %arg5: memref<128x288xf32, #tpu.memory_space<vmem>>) attributes {dimension_semantics = [], scalar_prefetch = 0 : i64, scratch_operands = 1 : i64, tpu.core_type = #tpu.core_type<tc>} {
    %c0 = arith.constant 0 : index
    %c0_0 = arith.constant 0 : index
    %0 = vector.load %arg0[%c0, %c0_0] : memref<128x128xbf16, #tpu.memory_space<vmem>>, vector<128x128xbf16>
    %c0_1 = arith.constant 0 : index
    %c0_2 = arith.constant 0 : index
    %1 = vector.load %arg1[%c0_1, %c0_2] : memref<128x1xf32, #tpu.memory_space<vmem>>, vector<128x1xf32>
    %2 = arith.truncf %1 : vector<128x1xf32> to vector<128x1xbf16>
    %c0_3 = arith.constant 0 : index
    %c0_4 = arith.constant 0 : index
    %3 = vector.load %arg3[%c0_3, %c0_4] : memref<8x288xf32, #tpu.memory_space<vmem>>, vector<1x48xf32>
    %c1 = arith.constant 1 : index
    %c0_5 = arith.constant 0 : index
    %4 = vector.load %arg3[%c1, %c0_5] : memref<8x288xf32, #tpu.memory_space<vmem>>, vector<1x48xf32>
    %c2 = arith.constant 2 : index
    %c0_6 = arith.constant 0 : index
    %5 = vector.load %arg3[%c2, %c0_6] : memref<8x288xf32, #tpu.memory_space<vmem>>, vector<1x48xf32>
    %cst = arith.constant dense<0.000000e+00> : vector<128x1xf32>
    %6 = tpu.matmul %0, %2, %cst {dimension_numbers = #tpu.dot_dimension_numbers<[1], [0], [0], [1], [0, 0, 1, 1], [], []>} : vector<128x128xbf16>, vector<128x1xbf16>, vector<128x1xf32> -> vector<128x1xf32>
    %7 = vector.broadcast %6 : vector<128x1xf32> to vector<128x48xf32>
    %8 = vector.broadcast %3 : vector<1x48xf32> to vector<128x48xf32>
    %9 = arith.mulf %7, %8 : vector<128x48xf32>
    %10 = vector.broadcast %4 : vector<1x48xf32> to vector<128x48xf32>
    %11 = arith.addf %9, %10 : vector<128x48xf32>
    %cst_7 = arith.constant 0.000000e+00 : f32
    %12 = vector.broadcast %cst_7 : f32 to vector<128x48xf32>
    %13 = arith.maximumf %11, %12 : vector<128x48xf32>
    %14 = arith.truncf %13 : vector<128x48xf32> to vector<128x48xbf16>
    %cst_8 = arith.constant dense<0.000000e+00> : vector<128x48xf32>
    %15 = tpu.matmul %0, %14, %cst_8 {dimension_numbers = #tpu.dot_dimension_numbers<[1], [0], [0], [1], [0, 0, 1, 1], [], []>} : vector<128x128xbf16>, vector<128x48xbf16>, vector<128x48xf32> -> vector<128x48xf32>
    %c0_9 = arith.constant 0 : index
    %c0_10 = arith.constant 0 : index
    %16 = vector.load %arg2[%c0_9, %c0_10] : memref<168x288xbf16, #tpu.memory_space<vmem>>, vector<48x48xbf16>
    %17 = arith.truncf %15 : vector<128x48xf32> to vector<128x48xbf16>
    %cst_11 = arith.constant dense<0.000000e+00> : vector<128x48xf32>
    %18 = tpu.matmul %17, %16, %cst_11 {dimension_numbers = #tpu.dot_dimension_numbers<[1], [0], [0], [1], [0, 0, 1, 1], [], []>} : vector<128x48xbf16>, vector<48x48xbf16>, vector<128x48xf32> -> vector<128x48xf32>
    %19 = vector.broadcast %5 : vector<1x48xf32> to vector<128x48xf32>
    %20 = arith.addf %18, %19 : vector<128x48xf32>
    %cst_12 = arith.constant 0.000000e+00 : f32
    %21 = vector.broadcast %cst_12 : f32 to vector<128x48xf32>
    %22 = arith.maximumf %20, %21 : vector<128x48xf32>
    %c48 = arith.constant 48 : index
    %c0_13 = arith.constant 0 : index
    %23 = vector.load %arg2[%c48, %c0_13] : memref<168x288xbf16, #tpu.memory_space<vmem>>, vector<48x288xbf16>
    %24 = arith.truncf %22 : vector<128x48xf32> to vector<128x48xbf16>
    %cst_14 = arith.constant dense<0.000000e+00> : vector<128x288xf32>
    %25 = tpu.matmul %24, %23, %cst_14 {dimension_numbers = #tpu.dot_dimension_numbers<[1], [0], [0], [1], [0, 0, 1, 1], [], []>} : vector<128x48xbf16>, vector<48x288xbf16>, vector<128x288xf32> -> vector<128x288xf32>
    %c0_15 = arith.constant 0 : index
    %c0_16 = arith.constant 0 : index
    %26 = vector.load %arg5[%c0_15, %c0_16] : memref<128x288xf32, #tpu.memory_space<vmem>>, vector<128x288xf32>
    tpu.vector_store %arg5[%c0_15, %c0_16], %25 {strides = array<i32>} : memref<128x288xf32, #tpu.memory_space<vmem>>, vector<128x288xf32>,
    %c96 = arith.constant 96 : index
    %c0_17 = arith.constant 0 : index
    %27 = vector.load %arg2[%c96, %c0_17] : memref<168x288xbf16, #tpu.memory_space<vmem>>, vector<72x288xbf16>
    %c3 = arith.constant 3 : index
    %c0_18 = arith.constant 0 : index
    %28 = vector.load %arg3[%c3, %c0_18] : memref<8x288xf32, #tpu.memory_space<vmem>>, vector<1x288xf32>
    %c4 = arith.constant 4 : index
    %c0_19 = arith.constant 0 : index
    %29 = vector.load %arg3[%c4, %c0_19] : memref<8x288xf32, #tpu.memory_space<vmem>>, vector<1x18xf32>
    %c5 = arith.constant 5 : index
    %c0_20 = arith.constant 0 : index
    %30 = vector.load %arg3[%c5, %c0_20] : memref<8x288xf32, #tpu.memory_space<vmem>>, vector<1x1xf32>
    %cst_21 = arith.constant 0.000000e+00 : f32
    %31 = vector.broadcast %cst_21 : f32 to vector<16x72xf32>
    %cst_22 = arith.constant 0.000000e+00 : f32
    %32 = vector.broadcast %cst_22 : f32 to vector<16x72xf32>
    %33 = tpu.iota {dimensions = array<i32: 1>} : vector<16x72xi32>
    %34 = arith.truncf %31 : vector<16x72xf32> to vector<16x72xbf16>
    %cst_23 = arith.constant dense<0.000000e+00> : vector<16x288xf32>
    %35 = tpu.matmul %34, %27, %cst_23 {dimension_numbers = #tpu.dot_dimension_numbers<[1], [0], [0], [1], [0, 0, 1, 1], [], []>} : vector<16x72xbf16>, vector<72x288xbf16>, vector<16x288xf32> -> vector<16x288xf32>
    %36 = vector.broadcast %28 : vector<1x288xf32> to vector<16x288xf32>
    %37 = arith.addf %35, %36 : vector<16x288xf32>
    %c0_24 = arith.constant 0 : index
    %c0_25 = arith.constant 0 : index
    %38 = vector.load %arg5[%c0_24, %c0_25] : memref<128x288xf32, #tpu.memory_space<vmem>>, vector<16x288xf32>
    %39 = arith.addf %37, %38 : vector<16x288xf32>
    %40 = arith.negf %39 : vector<16x288xf32>
    %41 = math.exp %40 : vector<16x288xf32>
    %cst_26 = arith.constant 1.000000e+00 : f32
    %42 = vector.broadcast %cst_26 : f32 to vector<16x288xf32>
    %43 = arith.addf %42, %41 : vector<16x288xf32>
    %44 = arith.divf %42, %43 : vector<16x288xf32>
    %45 = vector.extract_strided_slice %44 {offsets = [0, 0], sizes = [16, 72], strides = [1, 1]} : vector<16x288xf32> to vector<16x72xf32>
    %46 = vector.extract_strided_slice %44 {offsets = [0, 72], sizes = [16, 72], strides = [1, 1]} : vector<16x288xf32> to vector<16x72xf32>
    %47 = vector.extract_strided_slice %44 {offsets = [0, 144], sizes = [16, 72], strides = [1, 1]} : vector<16x288xf32> to vector<16x72xf32>
    %48 = vector.extract_strided_slice %44 {offsets = [0, 216], sizes = [16, 72], strides = [1, 1]} : vector<16x288xf32> to vector<16x72xf32>
    %cst_27 = arith.constant 2.000000e+00 : f32
    %49 = vector.broadcast %cst_27 : f32 to vector<16x72xf32>
    %50 = arith.mulf %49, %48 : vector<16x72xf32>
    %cst_28 = arith.constant 1.000000e+00 : f32
    %51 = vector.broadcast %cst_28 : f32 to vector<16x72xf32>
    %52 = arith.subf %50, %51 : vector<16x72xf32>
    %53 = arith.mulf %46, %32 : vector<16x72xf32>
    %54 = arith.mulf %45, %52 : vector<16x72xf32>
    %55 = arith.addf %53, %54 : vector<16x72xf32>
    %56 = math.tanh %55 : vector<16x72xf32>
    %57 = arith.mulf %47, %56 : vector<16x72xf32>
    %c18_i32 = arith.constant 18 : i32
    %58 = vector.broadcast %c18_i32 : i32 to vector<16x72xi32>
    %59 = arith.cmpi slt, %33, %58 : vector<16x72xi32>
    %60 = arith.select %59, %55, %32 : vector<16x72xi1>, vector<16x72xf32>
    %61 = arith.select %59, %57, %31 : vector<16x72xi1>, vector<16x72xf32>
    %62 = arith.truncf %61 : vector<16x72xf32> to vector<16x72xbf16>
    %cst_29 = arith.constant dense<0.000000e+00> : vector<16x288xf32>
    %63 = tpu.matmul %62, %27, %cst_29 {dimension_numbers = #tpu.dot_dimension_numbers<[1], [0], [0], [1], [0, 0, 1, 1], [], []>} : vector<16x72xbf16>, vector<72x288xbf16>, vector<16x288xf32> -> vector<16x288xf32>
    %64 = vector.broadcast %28 : vector<1x288xf32> to vector<16x288xf32>
    %65 = arith.addf %63, %64 : vector<16x288xf32>
    %c16 = arith.constant 16 : index
    %c0_30 = arith.constant 0 : index
    %66 = vector.load %arg5[%c16, %c0_30] : memref<128x288xf32, #tpu.memory_space<vmem>>, vector<16x288xf32>
    %67 = arith.addf %65, %66 : vector<16x288xf32>
    %68 = arith.negf %67 : vector<16x288xf32>
    %69 = math.exp %68 : vector<16x288xf32>
    %cst_31 = arith.constant 1.000000e+00 : f32
    %70 = vector.broadcast %cst_31 : f32 to vector<16x288xf32>
    %71 = arith.addf %70, %69 : vector<16x288xf32>
    %72 = arith.divf %70, %71 : vector<16x288xf32>
    %73 = vector.extract_strided_slice %72 {offsets = [0, 0], sizes = [16, 72], strides = [1, 1]} : vector<16x288xf32> to vector<16x72xf32>
    %74 = vector.extract_strided_slice %72 {offsets = [0, 72], sizes = [16, 72], strides = [1, 1]} : vector<16x288xf32> to vector<16x72xf32>
    %75 = vector.extract_strided_slice %72 {offsets = [0, 144], sizes = [16, 72], strides = [1, 1]} : vector<16x288xf32> to vector<16x72xf32>
    %76 = vector.extract_strided_slice %72 {offsets = [0, 216], sizes = [16, 72], strides = [1, 1]} : vector<16x288xf32> to vector<16x72xf32>
    %cst_32 = arith.constant 2.000000e+00 : f32
    %77 = vector.broadcast %cst_32 : f32 to vector<16x72xf32>
    %78 = arith.mulf %77, %76 : vector<16x72xf32>
    %cst_33 = arith.constant 1.000000e+00 : f32
    %79 = vector.broadcast %cst_33 : f32 to vector<16x72xf32>
    %80 = arith.subf %78, %79 : vector<16x72xf32>
    %81 = arith.mulf %74, %60 : vector<16x72xf32>
    %82 = arith.mulf %73, %80 : vector<16x72xf32>
    %83 = arith.addf %81, %82 : vector<16x72xf32>
    %84 = math.tanh %83 : vector<16x72xf32>
    %85 = arith.mulf %75, %84 : vector<16x72xf32>
    %c36_i32 = arith.constant 36 : i32
    %86 = vector.broadcast %c36_i32 : i32 to vector<16x72xi32>
    %87 = arith.cmpi slt, %33, %86 : vector<16x72xi32>
    %88 = arith.select %87, %83, %60 : vector<16x72xi1>, vector<16x72xf32>
    %89 = arith.select %87, %85, %61 : vector<16x72xi1>, vector<16x72xf32>
    %90 = arith.truncf %89 : vector<16x72xf32> to vector<16x72xbf16>
    %cst_34 = arith.constant dense<0.000000e+00> : vector<16x288xf32>
    %91 = tpu.matmul %90, %27, %cst_34 {dimension_numbers = #tpu.dot_dimension_numbers<[1], [0], [0], [1], [0, 0, 1, 1], [], []>} : vector<16x72xbf16>, vector<72x288xbf16>, vector<16x288xf32> -> vector<16x288xf32>
    %92 = vector.broadcast %28 : vector<1x288xf32> to vector<16x288xf32>
    %93 = arith.addf %91, %92 : vector<16x288xf32>
    %c32 = arith.constant 32 : index
    %c0_35 = arith.constant 0 : index
    %94 = vector.load %arg5[%c32, %c0_35] : memref<128x288xf32, #tpu.memory_space<vmem>>, vector<16x288xf32>
    %95 = arith.addf %93, %94 : vector<16x288xf32>
    %96 = arith.negf %95 : vector<16x288xf32>
    %97 = math.exp %96 : vector<16x288xf32>
    %cst_36 = arith.constant 1.000000e+00 : f32
    %98 = vector.broadcast %cst_36 : f32 to vector<16x288xf32>
    %99 = arith.addf %98, %97 : vector<16x288xf32>
    %100 = arith.divf %98, %99 : vector<16x288xf32>
    %101 = vector.extract_strided_slice %100 {offsets = [0, 0], sizes = [16, 72], strides = [1, 1]} : vector<16x288xf32> to vector<16x72xf32>
    %102 = vector.extract_strided_slice %100 {offsets = [0, 72], sizes = [16, 72], strides = [1, 1]} : vector<16x288xf32> to vector<16x72xf32>
    %103 = vector.extract_strided_slice %100 {offsets = [0, 144], sizes = [16, 72], strides = [1, 1]} : vector<16x288xf32> to vector<16x72xf32>
    %104 = vector.extract_strided_slice %100 {offsets = [0, 216], sizes = [16, 72], strides = [1, 1]} : vector<16x288xf32> to vector<16x72xf32>
    %cst_37 = arith.constant 2.000000e+00 : f32
    %105 = vector.broadcast %cst_37 : f32 to vector<16x72xf32>
    %106 = arith.mulf %105, %104 : vector<16x72xf32>
    %cst_38 = arith.constant 1.000000e+00 : f32
    %107 = vector.broadcast %cst_38 : f32 to vector<16x72xf32>
    %108 = arith.subf %106, %107 : vector<16x72xf32>
    %109 = arith.mulf %102, %88 : vector<16x72xf32>
    %110 = arith.mulf %101, %108 : vector<16x72xf32>
    %111 = arith.addf %109, %110 : vector<16x72xf32>
    %112 = math.tanh %111 : vector<16x72xf32>
    %113 = arith.mulf %103, %112 : vector<16x72xf32>
    %c54_i32 = arith.constant 54 : i32
    %114 = vector.broadcast %c54_i32 : i32 to vector<16x72xi32>
    %115 = arith.cmpi slt, %33, %114 : vector<16x72xi32>
    %116 = arith.select %115, %111, %88 : vector<16x72xi1>, vector<16x72xf32>
    %117 = arith.select %115, %113, %89 : vector<16x72xi1>, vector<16x72xf32>
    %118 = arith.truncf %117 : vector<16x72xf32> to vector<16x72xbf16>
    %cst_39 = arith.constant dense<0.000000e+00> : vector<16x288xf32>
    %119 = tpu.matmul %118, %27, %cst_39 {dimension_numbers = #tpu.dot_dimension_numbers<[1], [0], [0], [1], [0, 0, 1, 1], [], []>} : vector<16x72xbf16>, vector<72x288xbf16>, vector<16x288xf32> -> vector<16x288xf32>
    %120 = vector.broadcast %28 : vector<1x288xf32> to vector<16x288xf32>
    %121 = arith.addf %119, %120 : vector<16x288xf32>
    %c48_40 = arith.constant 48 : index
    %c0_41 = arith.constant 0 : index
    %122 = vector.load %arg5[%c48_40, %c0_41] : memref<128x288xf32, #tpu.memory_space<vmem>>, vector<16x288xf32>
    %123 = arith.addf %121, %122 : vector<16x288xf32>
    %124 = arith.negf %123 : vector<16x288xf32>
    %125 = math.exp %124 : vector<16x288xf32>
    %cst_42 = arith.constant 1.000000e+00 : f32
    %126 = vector.broadcast %cst_42 : f32 to vector<16x288xf32>
    %127 = arith.addf %126, %125 : vector<16x288xf32>
    %128 = arith.divf %126, %127 : vector<16x288xf32>
    %129 = vector.extract_strided_slice %128 {offsets = [0, 0], sizes = [16, 72], strides = [1, 1]} : vector<16x288xf32> to vector<16x72xf32>
    %130 = vector.extract_strided_slice %128 {offsets = [0, 72], sizes = [16, 72], strides = [1, 1]} : vector<16x288xf32> to vector<16x72xf32>
    %131 = vector.extract_strided_slice %128 {offsets = [0, 144], sizes = [16, 72], strides = [1, 1]} : vector<16x288xf32> to vector<16x72xf32>
    %132 = vector.extract_strided_slice %128 {offsets = [0, 216], sizes = [16, 72], strides = [1, 1]} : vector<16x288xf32> to vector<16x72xf32>
    %cst_43 = arith.constant 2.000000e+00 : f32
    %133 = vector.broadcast %cst_43 : f32 to vector<16x72xf32>
    %134 = arith.mulf %133, %132 : vector<16x72xf32>
    %cst_44 = arith.constant 1.000000e+00 : f32
    %135 = vector.broadcast %cst_44 : f32 to vector<16x72xf32>
    %136 = arith.subf %134, %135 : vector<16x72xf32>
    %137 = arith.mulf %130, %116 : vector<16x72xf32>
    %138 = arith.mulf %129, %136 : vector<16x72xf32>
    %139 = arith.addf %137, %138 : vector<16x72xf32>
    %140 = math.tanh %139 : vector<16x72xf32>
    %141 = arith.mulf %131, %140 : vector<16x72xf32>
    %142 = vector.extract_strided_slice %141 {offsets = [0, 54], sizes = [16, 18], strides = [1, 1]} : vector<16x72xf32> to vector<16x18xf32>
    %143 = vector.broadcast %29 : vector<1x18xf32> to vector<16x18xf32>
    %144 = arith.mulf %142, %143 : vector<16x18xf32>
    %cst_45 = arith.constant dense<0.000000e+00> : vector<16xf32>
    %145 = vector.multi_reduction <add>, %144, %cst_45 [1] : vector<16x18xf32> to vector<16xf32>
    %146 = vector.shape_cast %145 : vector<16xf32> to vector<16x1xf32>
    %147 = vector.broadcast %30 : vector<1x1xf32> to vector<16x1xf32>
    %148 = arith.addf %146, %147 : vector<16x1xf32>
    %c0_46 = arith.constant 0 : index
    %c0_47 = arith.constant 0 : index
    %149 = vector.load %arg4[%c0_46, %c0_47] : memref<128x1xf32, #tpu.memory_space<vmem>>, vector<16x1xf32>
    tpu.vector_store %arg4[%c0_46, %c0_47], %148 {strides = array<i32>} : memref<128x1xf32, #tpu.memory_space<vmem>>, vector<16x1xf32>,
    %150 = arith.truncf %141 : vector<16x72xf32> to vector<16x72xbf16>
    %cst_48 = arith.constant dense<0.000000e+00> : vector<16x288xf32>
    %151 = tpu.matmul %150, %27, %cst_48 {dimension_numbers = #tpu.dot_dimension_numbers<[1], [0], [0], [1], [0, 0, 1, 1], [], []>} : vector<16x72xbf16>, vector<72x288xbf16>, vector<16x288xf32> -> vector<16x288xf32>
    %152 = vector.broadcast %28 : vector<1x288xf32> to vector<16x288xf32>
    %153 = arith.addf %151, %152 : vector<16x288xf32>
    %c64 = arith.constant 64 : index
    %c0_49 = arith.constant 0 : index
    %154 = vector.load %arg5[%c64, %c0_49] : memref<128x288xf32, #tpu.memory_space<vmem>>, vector<16x288xf32>
    %155 = arith.addf %153, %154 : vector<16x288xf32>
    %156 = arith.negf %155 : vector<16x288xf32>
    %157 = math.exp %156 : vector<16x288xf32>
    %cst_50 = arith.constant 1.000000e+00 : f32
    %158 = vector.broadcast %cst_50 : f32 to vector<16x288xf32>
    %159 = arith.addf %158, %157 : vector<16x288xf32>
    %160 = arith.divf %158, %159 : vector<16x288xf32>
    %161 = vector.extract_strided_slice %160 {offsets = [0, 0], sizes = [16, 72], strides = [1, 1]} : vector<16x288xf32> to vector<16x72xf32>
    %162 = vector.extract_strided_slice %160 {offsets = [0, 72], sizes = [16, 72], strides = [1, 1]} : vector<16x288xf32> to vector<16x72xf32>
    %163 = vector.extract_strided_slice %160 {offsets = [0, 144], sizes = [16, 72], strides = [1, 1]} : vector<16x288xf32> to vector<16x72xf32>
    %164 = vector.extract_strided_slice %160 {offsets = [0, 216], sizes = [16, 72], strides = [1, 1]} : vector<16x288xf32> to vector<16x72xf32>
    %cst_51 = arith.constant 2.000000e+00 : f32
    %165 = vector.broadcast %cst_51 : f32 to vector<16x72xf32>
    %166 = arith.mulf %165, %164 : vector<16x72xf32>
    %cst_52 = arith.constant 1.000000e+00 : f32
    %167 = vector.broadcast %cst_52 : f32 to vector<16x72xf32>
    %168 = arith.subf %166, %167 : vector<16x72xf32>
    %169 = arith.mulf %162, %139 : vector<16x72xf32>
    %170 = arith.mulf %161, %168 : vector<16x72xf32>
    %171 = arith.addf %169, %170 : vector<16x72xf32>
    %172 = math.tanh %171 : vector<16x72xf32>
    %173 = arith.mulf %163, %172 : vector<16x72xf32>
    %174 = vector.extract_strided_slice %173 {offsets = [0, 54], sizes = [16, 18], strides = [1, 1]} : vector<16x72xf32> to vector<16x18xf32>
    %175 = vector.broadcast %29 : vector<1x18xf32> to vector<16x18xf32>
    %176 = arith.mulf %174, %175 : vector<16x18xf32>
    %cst_53 = arith.constant dense<0.000000e+00> : vector<16xf32>
    %177 = vector.multi_reduction <add>, %176, %cst_53 [1] : vector<16x18xf32> to vector<16xf32>
    %178 = vector.shape_cast %177 : vector<16xf32> to vector<16x1xf32>
    %179 = vector.broadcast %30 : vector<1x1xf32> to vector<16x1xf32>
    %180 = arith.addf %178, %179 : vector<16x1xf32>
    %c16_54 = arith.constant 16 : index
    %c0_55 = arith.constant 0 : index
    %181 = vector.load %arg4[%c16_54, %c0_55] : memref<128x1xf32, #tpu.memory_space<vmem>>, vector<16x1xf32>
    tpu.vector_store %arg4[%c16_54, %c0_55], %180 {strides = array<i32>} : memref<128x1xf32, #tpu.memory_space<vmem>>, vector<16x1xf32>,
    %182 = arith.truncf %173 : vector<16x72xf32> to vector<16x72xbf16>
    %cst_56 = arith.constant dense<0.000000e+00> : vector<16x288xf32>
    %183 = tpu.matmul %182, %27, %cst_56 {dimension_numbers = #tpu.dot_dimension_numbers<[1], [0], [0], [1], [0, 0, 1, 1], [], []>} : vector<16x72xbf16>, vector<72x288xbf16>, vector<16x288xf32> -> vector<16x288xf32>
    %184 = vector.broadcast %28 : vector<1x288xf32> to vector<16x288xf32>
    %185 = arith.addf %183, %184 : vector<16x288xf32>
    %c80 = arith.constant 80 : index
    %c0_57 = arith.constant 0 : index
    %186 = vector.load %arg5[%c80, %c0_57] : memref<128x288xf32, #tpu.memory_space<vmem>>, vector<16x288xf32>
    %187 = arith.addf %185, %186 : vector<16x288xf32>
    %188 = arith.negf %187 : vector<16x288xf32>
    %189 = math.exp %188 : vector<16x288xf32>
    %cst_58 = arith.constant 1.000000e+00 : f32
    %190 = vector.broadcast %cst_58 : f32 to vector<16x288xf32>
    %191 = arith.addf %190, %189 : vector<16x288xf32>
    %192 = arith.divf %190, %191 : vector<16x288xf32>
    %193 = vector.extract_strided_slice %192 {offsets = [0, 0], sizes = [16, 72], strides = [1, 1]} : vector<16x288xf32> to vector<16x72xf32>
    %194 = vector.extract_strided_slice %192 {offsets = [0, 72], sizes = [16, 72], strides = [1, 1]} : vector<16x288xf32> to vector<16x72xf32>
    %195 = vector.extract_strided_slice %192 {offsets = [0, 144], sizes = [16, 72], strides = [1, 1]} : vector<16x288xf32> to vector<16x72xf32>
    %196 = vector.extract_strided_slice %192 {offsets = [0, 216], sizes = [16, 72], strides = [1, 1]} : vector<16x288xf32> to vector<16x72xf32>
    %cst_59 = arith.constant 2.000000e+00 : f32
    %197 = vector.broadcast %cst_59 : f32 to vector<16x72xf32>
    %198 = arith.mulf %197, %196 : vector<16x72xf32>
    %cst_60 = arith.constant 1.000000e+00 : f32
    %199 = vector.broadcast %cst_60 : f32 to vector<16x72xf32>
    %200 = arith.subf %198, %199 : vector<16x72xf32>
    %201 = arith.mulf %194, %171 : vector<16x72xf32>
    %202 = arith.mulf %193, %200 : vector<16x72xf32>
    %203 = arith.addf %201, %202 : vector<16x72xf32>
    %204 = math.tanh %203 : vector<16x72xf32>
    %205 = arith.mulf %195, %204 : vector<16x72xf32>
    %206 = vector.extract_strided_slice %205 {offsets = [0, 54], sizes = [16, 18], strides = [1, 1]} : vector<16x72xf32> to vector<16x18xf32>
    %207 = vector.broadcast %29 : vector<1x18xf32> to vector<16x18xf32>
    %208 = arith.mulf %206, %207 : vector<16x18xf32>
    %cst_61 = arith.constant dense<0.000000e+00> : vector<16xf32>
    %209 = vector.multi_reduction <add>, %208, %cst_61 [1] : vector<16x18xf32> to vector<16xf32>
    %210 = vector.shape_cast %209 : vector<16xf32> to vector<16x1xf32>
    %211 = vector.broadcast %30 : vector<1x1xf32> to vector<16x1xf32>
    %212 = arith.addf %210, %211 : vector<16x1xf32>
    %c32_62 = arith.constant 32 : index
    %c0_63 = arith.constant 0 : index
    %213 = vector.load %arg4[%c32_62, %c0_63] : memref<128x1xf32, #tpu.memory_space<vmem>>, vector<16x1xf32>
    tpu.vector_store %arg4[%c32_62, %c0_63], %212 {strides = array<i32>} : memref<128x1xf32, #tpu.memory_space<vmem>>, vector<16x1xf32>,
    %214 = arith.truncf %205 : vector<16x72xf32> to vector<16x72xbf16>
    %cst_64 = arith.constant dense<0.000000e+00> : vector<16x288xf32>
    %215 = tpu.matmul %214, %27, %cst_64 {dimension_numbers = #tpu.dot_dimension_numbers<[1], [0], [0], [1], [0, 0, 1, 1], [], []>} : vector<16x72xbf16>, vector<72x288xbf16>, vector<16x288xf32> -> vector<16x288xf32>
    %216 = vector.broadcast %28 : vector<1x288xf32> to vector<16x288xf32>
    %217 = arith.addf %215, %216 : vector<16x288xf32>
    %c96_65 = arith.constant 96 : index
    %c0_66 = arith.constant 0 : index
    %218 = vector.load %arg5[%c96_65, %c0_66] : memref<128x288xf32, #tpu.memory_space<vmem>>, vector<16x288xf32>
    %219 = arith.addf %217, %218 : vector<16x288xf32>
    %220 = arith.negf %219 : vector<16x288xf32>
    %221 = math.exp %220 : vector<16x288xf32>
    %cst_67 = arith.constant 1.000000e+00 : f32
    %222 = vector.broadcast %cst_67 : f32 to vector<16x288xf32>
    %223 = arith.addf %222, %221 : vector<16x288xf32>
    %224 = arith.divf %222, %223 : vector<16x288xf32>
    %225 = vector.extract_strided_slice %224 {offsets = [0, 0], sizes = [16, 72], strides = [1, 1]} : vector<16x288xf32> to vector<16x72xf32>
    %226 = vector.extract_strided_slice %224 {offsets = [0, 72], sizes = [16, 72], strides = [1, 1]} : vector<16x288xf32> to vector<16x72xf32>
    %227 = vector.extract_strided_slice %224 {offsets = [0, 144], sizes = [16, 72], strides = [1, 1]} : vector<16x288xf32> to vector<16x72xf32>
    %228 = vector.extract_strided_slice %224 {offsets = [0, 216], sizes = [16, 72], strides = [1, 1]} : vector<16x288xf32> to vector<16x72xf32>
    %cst_68 = arith.constant 2.000000e+00 : f32
    %229 = vector.broadcast %cst_68 : f32 to vector<16x72xf32>
    %230 = arith.mulf %229, %228 : vector<16x72xf32>
    %cst_69 = arith.constant 1.000000e+00 : f32
    %231 = vector.broadcast %cst_69 : f32 to vector<16x72xf32>
    %232 = arith.subf %230, %231 : vector<16x72xf32>
    %233 = arith.mulf %226, %203 : vector<16x72xf32>
    %234 = arith.mulf %225, %232 : vector<16x72xf32>
    %235 = arith.addf %233, %234 : vector<16x72xf32>
    %236 = math.tanh %235 : vector<16x72xf32>
    %237 = arith.mulf %227, %236 : vector<16x72xf32>
    %238 = vector.extract_strided_slice %237 {offsets = [0, 54], sizes = [16, 18], strides = [1, 1]} : vector<16x72xf32> to vector<16x18xf32>
    %239 = vector.broadcast %29 : vector<1x18xf32> to vector<16x18xf32>
    %240 = arith.mulf %238, %239 : vector<16x18xf32>
    %cst_70 = arith.constant dense<0.000000e+00> : vector<16xf32>
    %241 = vector.multi_reduction <add>, %240, %cst_70 [1] : vector<16x18xf32> to vector<16xf32>
    %242 = vector.shape_cast %241 : vector<16xf32> to vector<16x1xf32>
    %243 = vector.broadcast %30 : vector<1x1xf32> to vector<16x1xf32>
    %244 = arith.addf %242, %243 : vector<16x1xf32>
    %c48_71 = arith.constant 48 : index
    %c0_72 = arith.constant 0 : index
    %245 = vector.load %arg4[%c48_71, %c0_72] : memref<128x1xf32, #tpu.memory_space<vmem>>, vector<16x1xf32>
    tpu.vector_store %arg4[%c48_71, %c0_72], %244 {strides = array<i32>} : memref<128x1xf32, #tpu.memory_space<vmem>>, vector<16x1xf32>,
    %246 = arith.truncf %237 : vector<16x72xf32> to vector<16x72xbf16>
    %cst_73 = arith.constant dense<0.000000e+00> : vector<16x288xf32>
    %247 = tpu.matmul %246, %27, %cst_73 {dimension_numbers = #tpu.dot_dimension_numbers<[1], [0], [0], [1], [0, 0, 1, 1], [], []>} : vector<16x72xbf16>, vector<72x288xbf16>, vector<16x288xf32> -> vector<16x288xf32>
    %248 = vector.broadcast %28 : vector<1x288xf32> to vector<16x288xf32>
    %249 = arith.addf %247, %248 : vector<16x288xf32>
    %c112 = arith.constant 112 : index
    %c0_74 = arith.constant 0 : index
    %250 = vector.load %arg5[%c112, %c0_74] : memref<128x288xf32, #tpu.memory_space<vmem>>, vector<16x288xf32>
    %251 = arith.addf %249, %250 : vector<16x288xf32>
    %252 = arith.negf %251 : vector<16x288xf32>
    %253 = math.exp %252 : vector<16x288xf32>
    %cst_75 = arith.constant 1.000000e+00 : f32
    %254 = vector.broadcast %cst_75 : f32 to vector<16x288xf32>
    %255 = arith.addf %254, %253 : vector<16x288xf32>
    %256 = arith.divf %254, %255 : vector<16x288xf32>
    %257 = vector.extract_strided_slice %256 {offsets = [0, 0], sizes = [16, 72], strides = [1, 1]} : vector<16x288xf32> to vector<16x72xf32>
    %258 = vector.extract_strided_slice %256 {offsets = [0, 72], sizes = [16, 72], strides = [1, 1]} : vector<16x288xf32> to vector<16x72xf32>
    %259 = vector.extract_strided_slice %256 {offsets = [0, 144], sizes = [16, 72], strides = [1, 1]} : vector<16x288xf32> to vector<16x72xf32>
    %260 = vector.extract_strided_slice %256 {offsets = [0, 216], sizes = [16, 72], strides = [1, 1]} : vector<16x288xf32> to vector<16x72xf32>
    %cst_76 = arith.constant 2.000000e+00 : f32
    %261 = vector.broadcast %cst_76 : f32 to vector<16x72xf32>
    %262 = arith.mulf %261, %260 : vector<16x72xf32>
    %cst_77 = arith.constant 1.000000e+00 : f32
    %263 = vector.broadcast %cst_77 : f32 to vector<16x72xf32>
    %264 = arith.subf %262, %263 : vector<16x72xf32>
    %265 = arith.mulf %258, %235 : vector<16x72xf32>
    %266 = arith.mulf %257, %264 : vector<16x72xf32>
    %267 = arith.addf %265, %266 : vector<16x72xf32>
    %268 = math.tanh %267 : vector<16x72xf32>
    %269 = arith.mulf %259, %268 : vector<16x72xf32>
    %270 = vector.extract_strided_slice %269 {offsets = [0, 54], sizes = [16, 18], strides = [1, 1]} : vector<16x72xf32> to vector<16x18xf32>
    %271 = vector.broadcast %29 : vector<1x18xf32> to vector<16x18xf32>
    %272 = arith.mulf %270, %271 : vector<16x18xf32>
    %cst_78 = arith.constant dense<0.000000e+00> : vector<16xf32>
    %273 = vector.multi_reduction <add>, %272, %cst_78 [1] : vector<16x18xf32> to vector<16xf32>
    %274 = vector.shape_cast %273 : vector<16xf32> to vector<16x1xf32>
    %275 = vector.broadcast %30 : vector<1x1xf32> to vector<16x1xf32>
    %276 = arith.addf %274, %275 : vector<16x1xf32>
    %c64_79 = arith.constant 64 : index
    %c0_80 = arith.constant 0 : index
    %277 = vector.load %arg4[%c64_79, %c0_80] : memref<128x1xf32, #tpu.memory_space<vmem>>, vector<16x1xf32>
    tpu.vector_store %arg4[%c64_79, %c0_80], %276 {strides = array<i32>} : memref<128x1xf32, #tpu.memory_space<vmem>>, vector<16x1xf32>,
    %278 = arith.truncf %269 : vector<16x72xf32> to vector<16x72xbf16>
    %cst_81 = arith.constant dense<0.000000e+00> : vector<16x288xf32>
    %279 = tpu.matmul %278, %27, %cst_81 {dimension_numbers = #tpu.dot_dimension_numbers<[1], [0], [0], [1], [0, 0, 1, 1], [], []>} : vector<16x72xbf16>, vector<72x288xbf16>, vector<16x288xf32> -> vector<16x288xf32>
    %280 = vector.broadcast %28 : vector<1x288xf32> to vector<16x288xf32>
    %281 = arith.addf %279, %280 : vector<16x288xf32>
    %282 = arith.negf %281 : vector<16x288xf32>
    %283 = math.exp %282 : vector<16x288xf32>
    %cst_82 = arith.constant 1.000000e+00 : f32
    %284 = vector.broadcast %cst_82 : f32 to vector<16x288xf32>
    %285 = arith.addf %284, %283 : vector<16x288xf32>
    %286 = arith.divf %284, %285 : vector<16x288xf32>
    %287 = vector.extract_strided_slice %286 {offsets = [0, 0], sizes = [16, 72], strides = [1, 1]} : vector<16x288xf32> to vector<16x72xf32>
    %288 = vector.extract_strided_slice %286 {offsets = [0, 72], sizes = [16, 72], strides = [1, 1]} : vector<16x288xf32> to vector<16x72xf32>
    %289 = vector.extract_strided_slice %286 {offsets = [0, 144], sizes = [16, 72], strides = [1, 1]} : vector<16x288xf32> to vector<16x72xf32>
    %290 = vector.extract_strided_slice %286 {offsets = [0, 216], sizes = [16, 72], strides = [1, 1]} : vector<16x288xf32> to vector<16x72xf32>
    %cst_83 = arith.constant 2.000000e+00 : f32
    %291 = vector.broadcast %cst_83 : f32 to vector<16x72xf32>
    %292 = arith.mulf %291, %290 : vector<16x72xf32>
    %cst_84 = arith.constant 1.000000e+00 : f32
    %293 = vector.broadcast %cst_84 : f32 to vector<16x72xf32>
    %294 = arith.subf %292, %293 : vector<16x72xf32>
    %295 = arith.mulf %288, %267 : vector<16x72xf32>
    %296 = arith.mulf %287, %294 : vector<16x72xf32>
    %297 = arith.addf %295, %296 : vector<16x72xf32>
    %298 = math.tanh %297 : vector<16x72xf32>
    %299 = arith.mulf %289, %298 : vector<16x72xf32>
    %300 = vector.extract_strided_slice %299 {offsets = [0, 54], sizes = [16, 18], strides = [1, 1]} : vector<16x72xf32> to vector<16x18xf32>
    %301 = vector.broadcast %29 : vector<1x18xf32> to vector<16x18xf32>
    %302 = arith.mulf %300, %301 : vector<16x18xf32>
    %cst_85 = arith.constant dense<0.000000e+00> : vector<16xf32>
    %303 = vector.multi_reduction <add>, %302, %cst_85 [1] : vector<16x18xf32> to vector<16xf32>
    %304 = vector.shape_cast %303 : vector<16xf32> to vector<16x1xf32>
    %305 = vector.broadcast %30 : vector<1x1xf32> to vector<16x1xf32>
    %306 = arith.addf %304, %305 : vector<16x1xf32>
    %c80_86 = arith.constant 80 : index
    %c0_87 = arith.constant 0 : index
    %307 = vector.load %arg4[%c80_86, %c0_87] : memref<128x1xf32, #tpu.memory_space<vmem>>, vector<16x1xf32>
    tpu.vector_store %arg4[%c80_86, %c0_87], %306 {strides = array<i32>} : memref<128x1xf32, #tpu.memory_space<vmem>>, vector<16x1xf32>,
    %308 = arith.truncf %299 : vector<16x72xf32> to vector<16x72xbf16>
    %cst_88 = arith.constant dense<0.000000e+00> : vector<16x288xf32>
    %309 = tpu.matmul %308, %27, %cst_88 {dimension_numbers = #tpu.dot_dimension_numbers<[1], [0], [0], [1], [0, 0, 1, 1], [], []>} : vector<16x72xbf16>, vector<72x288xbf16>, vector<16x288xf32> -> vector<16x288xf32>
    %310 = vector.broadcast %28 : vector<1x288xf32> to vector<16x288xf32>
    %311 = arith.addf %309, %310 : vector<16x288xf32>
    %312 = arith.negf %311 : vector<16x288xf32>
    %313 = math.exp %312 : vector<16x288xf32>
    %cst_89 = arith.constant 1.000000e+00 : f32
    %314 = vector.broadcast %cst_89 : f32 to vector<16x288xf32>
    %315 = arith.addf %314, %313 : vector<16x288xf32>
    %316 = arith.divf %314, %315 : vector<16x288xf32>
    %317 = vector.extract_strided_slice %316 {offsets = [0, 0], sizes = [16, 72], strides = [1, 1]} : vector<16x288xf32> to vector<16x72xf32>
    %318 = vector.extract_strided_slice %316 {offsets = [0, 72], sizes = [16, 72], strides = [1, 1]} : vector<16x288xf32> to vector<16x72xf32>
    %319 = vector.extract_strided_slice %316 {offsets = [0, 144], sizes = [16, 72], strides = [1, 1]} : vector<16x288xf32> to vector<16x72xf32>
    %320 = vector.extract_strided_slice %316 {offsets = [0, 216], sizes = [16, 72], strides = [1, 1]} : vector<16x288xf32> to vector<16x72xf32>
    %cst_90 = arith.constant 2.000000e+00 : f32
    %321 = vector.broadcast %cst_90 : f32 to vector<16x72xf32>
    %322 = arith.mulf %321, %320 : vector<16x72xf32>
    %cst_91 = arith.constant 1.000000e+00 : f32
    %323 = vector.broadcast %cst_91 : f32 to vector<16x72xf32>
    %324 = arith.subf %322, %323 : vector<16x72xf32>
    %325 = arith.mulf %318, %297 : vector<16x72xf32>
    %326 = arith.mulf %317, %324 : vector<16x72xf32>
    %327 = arith.addf %325, %326 : vector<16x72xf32>
    %328 = math.tanh %327 : vector<16x72xf32>
    %329 = arith.mulf %319, %328 : vector<16x72xf32>
    %330 = vector.extract_strided_slice %329 {offsets = [0, 54], sizes = [16, 18], strides = [1, 1]} : vector<16x72xf32> to vector<16x18xf32>
    %331 = vector.broadcast %29 : vector<1x18xf32> to vector<16x18xf32>
    %332 = arith.mulf %330, %331 : vector<16x18xf32>
    %cst_92 = arith.constant dense<0.000000e+00> : vector<16xf32>
    %333 = vector.multi_reduction <add>, %332, %cst_92 [1] : vector<16x18xf32> to vector<16xf32>
    %334 = vector.shape_cast %333 : vector<16xf32> to vector<16x1xf32>
    %335 = vector.broadcast %30 : vector<1x1xf32> to vector<16x1xf32>
    %336 = arith.addf %334, %335 : vector<16x1xf32>
    %c96_93 = arith.constant 96 : index
    %c0_94 = arith.constant 0 : index
    %337 = vector.load %arg4[%c96_93, %c0_94] : memref<128x1xf32, #tpu.memory_space<vmem>>, vector<16x1xf32>
    tpu.vector_store %arg4[%c96_93, %c0_94], %336 {strides = array<i32>} : memref<128x1xf32, #tpu.memory_space<vmem>>, vector<16x1xf32>,
    %338 = arith.truncf %329 : vector<16x72xf32> to vector<16x72xbf16>
    %cst_95 = arith.constant dense<0.000000e+00> : vector<16x288xf32>
    %339 = tpu.matmul %338, %27, %cst_95 {dimension_numbers = #tpu.dot_dimension_numbers<[1], [0], [0], [1], [0, 0, 1, 1], [], []>} : vector<16x72xbf16>, vector<72x288xbf16>, vector<16x288xf32> -> vector<16x288xf32>
    %340 = vector.broadcast %28 : vector<1x288xf32> to vector<16x288xf32>
    %341 = arith.addf %339, %340 : vector<16x288xf32>
    %342 = arith.negf %341 : vector<16x288xf32>
    %343 = math.exp %342 : vector<16x288xf32>
    %cst_96 = arith.constant 1.000000e+00 : f32
    %344 = vector.broadcast %cst_96 : f32 to vector<16x288xf32>
    %345 = arith.addf %344, %343 : vector<16x288xf32>
    %346 = arith.divf %344, %345 : vector<16x288xf32>
    %347 = vector.extract_strided_slice %346 {offsets = [0, 0], sizes = [16, 72], strides = [1, 1]} : vector<16x288xf32> to vector<16x72xf32>
    %348 = vector.extract_strided_slice %346 {offsets = [0, 72], sizes = [16, 72], strides = [1, 1]} : vector<16x288xf32> to vector<16x72xf32>
    %349 = vector.extract_strided_slice %346 {offsets = [0, 144], sizes = [16, 72], strides = [1, 1]} : vector<16x288xf32> to vector<16x72xf32>
    %350 = vector.extract_strided_slice %346 {offsets = [0, 216], sizes = [16, 72], strides = [1, 1]} : vector<16x288xf32> to vector<16x72xf32>
    %cst_97 = arith.constant 2.000000e+00 : f32
    %351 = vector.broadcast %cst_97 : f32 to vector<16x72xf32>
    %352 = arith.mulf %351, %350 : vector<16x72xf32>
    %cst_98 = arith.constant 1.000000e+00 : f32
    %353 = vector.broadcast %cst_98 : f32 to vector<16x72xf32>
    %354 = arith.subf %352, %353 : vector<16x72xf32>
    %355 = arith.mulf %348, %327 : vector<16x72xf32>
    %356 = arith.mulf %347, %354 : vector<16x72xf32>
    %357 = arith.addf %355, %356 : vector<16x72xf32>
    %358 = math.tanh %357 : vector<16x72xf32>
    %359 = arith.mulf %349, %358 : vector<16x72xf32>
    %360 = vector.extract_strided_slice %359 {offsets = [0, 54], sizes = [16, 18], strides = [1, 1]} : vector<16x72xf32> to vector<16x18xf32>
    %361 = vector.broadcast %29 : vector<1x18xf32> to vector<16x18xf32>
    %362 = arith.mulf %360, %361 : vector<16x18xf32>
    %cst_99 = arith.constant dense<0.000000e+00> : vector<16xf32>
    %363 = vector.multi_reduction <add>, %362, %cst_99 [1] : vector<16x18xf32> to vector<16xf32>
    %364 = vector.shape_cast %363 : vector<16xf32> to vector<16x1xf32>
    %365 = vector.broadcast %30 : vector<1x1xf32> to vector<16x1xf32>
    %366 = arith.addf %364, %365 : vector<16x1xf32>
    %c112_100 = arith.constant 112 : index
    %c0_101 = arith.constant 0 : index
    %367 = vector.load %arg4[%c112_100, %c0_101] : memref<128x1xf32, #tpu.memory_space<vmem>>, vector<16x1xf32>
    tpu.vector_store %arg4[%c112_100, %c0_101], %366 {strides = array<i32>} : memref<128x1xf32, #tpu.memory_space<vmem>>, vector<16x1xf32>,
    return
  }
}

</mosaic_0001>

<bundles_post_ra>
// kernel: tpu_custom_call.1
= control target key start
LH: loop header
LB: loop body
LE: loop exit
PB: predicated region body
PF: predicated region fallthrough
CT: control target
= control target key end

     0   :  { %9 = vsyncpa [#allocation4], 0  ;;  %s4620_s15 = smov [#allocation3]   ;;  %s6046_s0 = inlined_call_operand.vmem [shape: bf16[128,128], index: 0, kind: input, shape index: {}]   ;;  %s6047_s1 = inlined_call_operand.vmem [shape: f32[128,1], index: 1, kind: input, shape index: {}]   ;;  %s6048_s2 = inlined_call_operand.hbm [shape: bf16[168,288], index: 2, kind: input, shape index: {}]   ;;  %s6049_s3 = inlined_call_operand.vmem [shape: f32[8,288], index: 3, kind: input, shape index: {}]   ;;  %s6050_s4 = inlined_call_operand.vmem [shape: f32[128,1], index: 4, kind: output, shape index: {}]  }
   0x1   :  { %s19_s16 = sshll.u32 %s4620_s15, 4  ;;  %s4596_s19 = scalar_lea.hbm %s6048_s2, 4032  ;;  %s20_s16 = int_to_ptr.vmem [resolvable:$true] %s19_s16 }
   0x2   :  { %p4597_p0 = scmp.ne.s32.totalorder %s6048_s2, %s4596_s19  ;;  %p4600_p1 = scmp.lt.u32.totalorder %s4596_s19, %s6048_s2 }
   0x4   :  { %p4602_p2 = pnand %p4600_p1, %p4597_p0 }
   0x6   :  { %4605 = shalt.err (!%p4602_p2)
}
   0x7   :  { %s4606_s24 = scalar_lea.vmem %s20_s16, 4032  ;;  %p4611_p4 = scmp.lt.s32.totalorder %s20_s16, %s20_s16 }
   0x8   :  { %p4607_p3 = scmp.ne.s32.totalorder %s20_s16, %s4606_s24  ;;  %p4612_p5 = scmp.lt.s32.totalorder %s4606_s24, %s4606_s24 }
   0xa   :  { %p4613_p6 = por %p4612_p5, %p4611_p4 }
   0xc   :  { %p4614_p7 = pnand %p4613_p6, %p4607_p3 }
   0xe   :  { %4617 = shalt.err (!%p4614_p7)
}
   0xf   :  { %s4621_s25 = smov 192   ;;  %s4622_s26 = smov 12  }
  0x10   :  { %25 = dma.hbm_to_vmem [thread:$0]  %s6048_s2, 4032, %s20_s16, [#allocation4], %s4621_s25, %s4621_s25, %s4622_s26  }
  0x11   :  { %4618 = dma.done.wait [#allocation4], 4032  }
  0x12   :  { %4619 = vsyncadd [#allocation4], 4294963264  ;;  %v4623_v0 = vmov 0   ;;  %v48_v1 = vld [vmem:[%s6047_s1] sm:$0xff]  ;;  %v49_v2 = vld [vmem:[%s6047_s1 + $0x8] sm:$0xff]  ;;  %vm485_vm0 = vcmask 392192  }
  0x13   :  { %4161 = vset.pattern.permute.xlu1 %v4623_v0  ;;  %4160 = vset.pattern.permute.xlu0 %v4623_v0  ;;  %v50_v3 = vld [vmem:[%s6047_s1 + $0x10] sm:$0xff]  ;;  %v64_v4 = vpack.c.bf16 %v49_v2, %v48_v1  ;;  %v51_v5 = vld [vmem:[%s6047_s1 + $0x18] sm:$0xff]  ;;  %v52_v7 = vld [vmem:[%s6047_s1 + $0x20] sm:$0xff]  ;;  %vm1090_vm1 = vcmask 1043456   ;;  %vm4625_vm2 = vmmov 0   ;;  %vm927_vm3 = vcmask 261120  }
  0x14   :  { %v65_v6 = vpack.c.bf16 %v51_v5, %v50_v3  ;;  %v53_v8 = vld [vmem:[%s6047_s1 + $0x28] sm:$0xff]  ;;  %v54_v9 = vld [vmem:[%s6047_s1 + $0x30] sm:$0xff]  ;;  %v55_v11 = vld [vmem:[%s6047_s1 + $0x38] sm:$0xff]  ;;  %s4626_s29 = smov 40   ;;  %vm1256_vm4 = vcmask 326656   ;;  %s4627_s30 = smov 72  }
  0x15   :  { %3886 = vmatprep.subr.bf16.mxu0 %v64_v4  ;;  %v66_v10 = vpack.c.bf16 %v53_v8, %v52_v7  ;;  %v4177_v12 = vld [vmem:[%s6046_s0] sm:$0xff]   ;;  %v67_v13 = vpack.c.bf16 %v55_v11, %v54_v9  ;;  %v57_v15 = vld [vmem:[%s6047_s1 + $0x48] sm:$0xff]  ;;  %v58_v16 = vld [vmem:[%s6047_s1 + $0x50] sm:$0xff]  ;;  %s4628_s5 = smov 56   ;;  %vm1086_vm5 = vcmask 588800   ;;  %s4629_s6 = smov 112  }
  0x16   :  { %3887 = vmatpush3.bf16.msra.mxu0 %v64_v4  ;;  %3902 = vmatprep.mubr.bf16.mxu0 %v4177_v12  ;;  %v56_v14 = vld [vmem:[%s6047_s1 + $0x40] sm:$0xff]  ;;  %v59_v18 = vld [vmem:[%s6047_s1 + $0x58] sm:$0xff]  ;;  %v61_v20 = vld [vmem:[%s6047_s1 + $0x68] sm:$0xff]  ;;  %vm1310_vm7 = vcmask 457728   ;;  %s4630_s2 = smov 70   ;;  %s4631_s9 = smov 58  }
  0x17   :  { %3888 = vmatprep.subr.bf16.mxu0 %v65_v6  ;;  %3934 = vmatprep.mubr.bf16.mxu1 %v4177_v12  ;;  %v68_v17 = vpack.c.bf16 %v57_v15, %v56_v14  ;;  %v60_v19 = vld [vmem:[%s6047_s1 + $0x60] sm:$0xff]  ;;  %v69_v21 = vpack.c.bf16 %v59_v18, %v58_v16  ;;  %v62_v22 = vld [vmem:[%s6047_s1 + $0x70] sm:$0xff]  ;;  %v63_v23 = vld [vmem:[%s6047_s1 + $0x78] sm:$0xff]  ;;  %vm2023_vm10 = vcmask 146432   ;;  %vm2032_vm11 = vcmask 7168  }
  0x18   :  { %v70_v24 = vpack.c.bf16 %v61_v20, %v60_v19  ;;  %v71_v25 = vpack.c.bf16 %v63_v23, %v62_v22  ;;  %v4725_v26 = vld [vmem:[%s6046_s0 + $0x8] sm:$0xff]   ;;  %v4730_v27 = vld [vmem:[%s6046_s0 + $0x10] sm:$0xff]   ;;  %v4737_v28 = vld [vmem:[%s6046_s0 + $0x18] sm:$0xff]  }
  0x19   :  { %v4742_v29 = vld [vmem:[%s6046_s0 + $0x20] sm:$0xff]   ;;  %v4749_v30 = vld [vmem:[%s6046_s0 + $0x28] sm:$0xff]   ;;  %v4754_v31 = vld [vmem:[%s6046_s0 + $0x30] sm:$0xff]  }
  0x1a   :  { %3889 = vmatpush3.bf16.msra.mxu0 %v65_v6  ;;  %v4761_v32 = vld [vmem:[%s6046_s0 + $0x38] sm:$0xff]   ;;  %v4185_v49 = vld [vmem:[#allocation3] ss:$12 sps:$4 sm:$0xff]  }
  0x1b   :  { %3890 = vmatprep.subr.bf16.mxu0 %v66_v10  ;;  %v4186_v50 = vld [vmem:[#allocation3 + $0x18] ss:$12 sps:$4 sm:$0xff]   ;;  %v4187_v51 = vld [vmem:[#allocation3 + $0x30] ss:$12 sps:$4 sm:$0xff]   ;;  %v4767_v52 = vld [vmem:[%s6049_s3] ss:$0 sm:$0xff] }
  0x1c   :  { %v4773_v56 = vld [vmem:[%s6049_s3 + $0x1] ss:$0 sm:$0xff] }
  0x1e   :  { %3891 = vmatpush3.bf16.msra.mxu0 %v66_v10 }
  0x1f   :  { %3892 = vmatprep.subr.bf16.mxu0 %v67_v13 }
  0x22   :  { %3893 = vmatpush3.bf16.msra.mxu0 %v67_v13 }
  0x23   :  { %3894 = vmatprep.subr.bf16.mxu0 %v68_v17 }
  0x26   :  { %3895 = vmatpush3.bf16.msra.mxu0 %v68_v17 }
  0x27   :  { %3896 = vmatprep.subr.bf16.mxu0 %v69_v21 }
  0x2a   :  { %3897 = vmatpush3.bf16.msra.mxu0 %v69_v21 }
  0x2b   :  { %3898 = vmatprep.subr.bf16.mxu0 %v70_v24 }
  0x2e   :  { %3899 = vmatpush3.bf16.msra.mxu0 %v70_v24 }
  0x2f   :  { %3900 = vmatprep.subr.bf16.mxu0 %v71_v25 }
  0x32   :  { %3901 = vmatpush3.bf16.msra.mxu0 %v71_v25 }
  0x33   :  { %3950 = vmatprep.subr.bf16.mxu0 %v4185_v49 }
  0x35   :  { %3903 = vmatmul.mubr.bf16.vlgmr.msra.gmra.mrb[0].mxu0 %v4725_v26 }
  0x36   :  { %3906 = vmatprep.mubr.bf16.mxu0 %v4730_v27  ;;  %3951 = vmatpush3.bf16.msra.mxu0 %v4185_v49 }
  0x37   :  { %3952 = vmatprep.subr.bf16.mxu0 %v4186_v50 }
  0x3a   :  { %3953 = vmatpush3.bf16.msra.mxu0 %v4186_v50 }
  0x3b   :  { %3954 = vmatprep.subr.bf16.mxu0 %v4187_v51 }
  0x3d   :  { %3907 = vmatmul.mubr.bf16.gmra.mrb[4].mxu0 %v4737_v28 }
  0x3e   :  { %3910 = vmatprep.mubr.bf16.mxu0 %v4742_v29  ;;  %3955 = vmatpush3.bf16.msra.mxu0 %v4187_v51 }
  0x45   :  { %3911 = vmatmul.mubr.bf16.gmra.mrb[8].mxu0 %v4749_v30 }
  0x46   :  { %3914 = vmatprep.mubr.bf16.mxu0 %v4754_v31 }
  0x4d   :  { %3915 = vmatmul.mubr.bf16.gmra.mrb[12].mxu0 %v4761_v32 }
 0x108   :  { %v3904_v33 = vpop.f32.mrb[0].mxu0 }
 0x109   :  { %232 = vperm.xlu1 %4161, %v3904_v33   ;;  %v157_v34 = vpop.f32.mrb[1].mxu0 }
 0x10a   :  { %222 = vperm.xlu0 %4160, %v157_v34   ;;  %v3905_v35 = vpop.f32.mrb[2].mxu0 }
 0x10b   :  { %v160_v36 = vpop.f32.mrb[3].mxu0 }
 0x10d   :  { %237 = vperm.xlu1 %4161, %v3905_v35  }
 0x10e   :  { %227 = vperm.xlu0 %4160, %v160_v36  }
 0x110   :  { %v3908_v37 = vpop.f32.mrb[4].mxu0 }
 0x111   :  { %v173_v38 = vpop.f32.mrb[5].mxu0 }
 0x112   :  { %242 = vperm.xlu0 %4160, %v173_v38   ;;  %v3909_v39 = vpop.f32.mrb[6].mxu0 }
 0x113   :  { %v176_v40 = vpop.f32.mrb[7].mxu0 }
 0x114   :  { %247 = vperm.xlu1 %4161, %v176_v40  }
 0x116   :  { %252 = vperm.xlu0 %4160, %v3908_v37  }
 0x118   :  { %257 = vperm.xlu1 %4161, %v3909_v39   ;;  %v3912_v41 = vpop.f32.mrb[8].mxu0 }
 0x119   :  { %v189_v42 = vpop.f32.mrb[9].mxu0 }
 0x11a   :  { %262 = vperm.xlu0 %4160, %v189_v42   ;;  %v3913_v43 = vpop.f32.mrb[10].mxu0 }
 0x11b   :  { %v192_v44 = vpop.f32.mrb[11].mxu0 }
 0x11c   :  { %267 = vperm.xlu1 %4161, %v192_v44  }
 0x11e   :  { %272 = vperm.xlu0 %4160, %v3912_v41  }
 0x120   :  { %277 = vperm.xlu1 %4161, %v3913_v43   ;;  %v3916_v45 = vpop.f32.mrb[12].mxu0 }
 0x121   :  { %v205_v46 = vpop.f32.mrb[13].mxu0 }
 0x122   :  { %282 = vperm.xlu0 %4160, %v205_v46   ;;  %v3917_v47 = vpop.f32.mrb[14].mxu0 }
 0x123   :  { %v208_v48 = vpop.f32.mrb[15].mxu0 }
 0x124   :  { %287 = vperm.xlu1 %4161, %v208_v48  }
 0x126   :  { %292 = vperm.xlu0 %4160, %v3916_v45  }
 0x128   :  { %297 = vperm.xlu1 %4161, %v3917_v47  }
 0x188   :  { %v233_v53 = vpop.permute.xlu1 %232 }
 0x189   :  { %v223_v54 = vpop.permute.xlu0 %222  ;;  %v302_v57 = vmul.f32 %v233_v53, %v4767_v52 }
 0x18a   :  { %v300_v55 = vmul.f32 %v223_v54, %v4767_v52 }
 0x18b   :  { %v318_v1 = vadd.f32 %v302_v57, %v4773_v56 }
 0x18c   :  { %v238_v58 = vpop.permute.xlu1 %237  ;;  %v316_v61 = vadd.f32 %v300_v55, %v4773_v56 }
 0x18d   :  { %v303_v59 = vmul.f32 %v238_v58, %v4767_v52  ;;  %v228_v60 = vpop.permute.xlu0 %227  ;;  %v334_v9 = vmax.f32 %v318_v1, 0.0 }
 0x18e   :  { %v301_v62 = vmul.f32 %v228_v60, %v4767_v52  ;;  %v332_v6 = vmax.f32 %v316_v61, 0.0 }
 0x18f   :  { %v319_v63 = vadd.f32 %v303_v59, %v4773_v56 }
 0x190   :  { %v317_v2 = vadd.f32 %v301_v62, %v4773_v56 }
 0x191   :  { %v243_v3 = vpop.permute.xlu0 %242  ;;  %v335_v4 = vmax.f32 %v319_v63, 0.0 }
 0x192   :  { %v304_v5 = vmul.f32 %v243_v3, %v4767_v52  ;;  %v333_v7 = vmax.f32 %v317_v2, 0.0 }
 0x193   :  { %v248_v8 = vpop.permute.xlu1 %247  ;;  %v349_v16 = vpack.c.bf16 %v335_v4, %v334_v9  ;;  %v4193_v9 = vld [vmem:[#allocation3 + $0x64] ss:$12 sps:$4 sm:$0xff]  }
 0x194   :  { %v320_v10 = vadd.f32 %v304_v5, %v4773_v56  ;;  %v305_v11 = vmul.f32 %v248_v8, %v4767_v52  ;;  %v348_v12 = vpack.c.bf16 %v333_v7, %v332_v6 }
 0x195   :  { %v253_v13 = vpop.permute.xlu0 %252 }
 0x196   :  { %v321_v14 = vadd.f32 %v305_v11, %v4773_v56  ;;  %v306_v15 = vmul.f32 %v253_v13, %v4767_v52  ;;  %3918 = vmatprep.subr.bf16.mxu1 %v348_v12  ;;  %v336_v18 = vmax.f32 %v320_v10, 0.0  ;;  %v4197_v10 = vld [vmem:[#allocation3 + $0x50] ss:$12 sps:$4 sm:$0xff]  }
 0x197   :  { %3919 = vmatpush3.bf16.msra.mxu1 %v348_v12  ;;  %v258_v17 = vpop.permute.xlu1 %257  ;;  %3972 = vmatprep.subr.bf16.mxu0 %v4197_v10 }
 0x198   :  { %v337_v19 = vmax.f32 %v321_v14, 0.0  ;;  %v322_v20 = vadd.f32 %v306_v15, %v4773_v56  ;;  %v307_v21 = vmul.f32 %v258_v17, %v4767_v52  ;;  %3920 = vmatprep.subr.bf16.mxu1 %v349_v16 }
 0x199   :  { %v263_v22 = vpop.permute.xlu0 %262 }
 0x19a   :  { %v323_v23 = vadd.f32 %v307_v21, %v4773_v56  ;;  %v308_v24 = vmul.f32 %v263_v22, %v4767_v52  ;;  %v350_v25 = vpack.c.bf16 %v337_v19, %v336_v18  ;;  %v338_v34 = vmax.f32 %v322_v20, 0.0 }
 0x19b   :  { %3921 = vmatpush3.bf16.msra.mxu1 %v349_v16  ;;  %v268_v33 = vpop.permute.xlu1 %267 }
 0x19c   :  { %v339_v35 = vmax.f32 %v323_v23, 0.0  ;;  %v324_v36 = vadd.f32 %v308_v24, %v4773_v56  ;;  %v309_v37 = vmul.f32 %v268_v33, %v4767_v52  ;;  %3922 = vmatprep.subr.bf16.mxu1 %v350_v25 }
 0x19d   :  { %v273_v38 = vpop.permute.xlu0 %272 }
 0x19e   :  { %v325_v39 = vadd.f32 %v309_v37, %v4773_v56  ;;  %v310_v40 = vmul.f32 %v273_v38, %v4767_v52  ;;  %v351_v41 = vpack.c.bf16 %v339_v35, %v338_v34  ;;  %v340_v43 = vmax.f32 %v324_v36, 0.0  ;;  %v4198_v38 = vld [vmem:[#allocation3 + $0x68] ss:$12 sps:$4 sm:$0xff]  }
 0x19f   :  { %3923 = vmatpush3.bf16.msra.mxu1 %v350_v25  ;;  %v278_v42 = vpop.permute.xlu1 %277 }
 0x1a0   :  { %v341_v44 = vmax.f32 %v325_v39, 0.0  ;;  %v326_v45 = vadd.f32 %v310_v40, %v4773_v56  ;;  %v311_v46 = vmul.f32 %v278_v42, %v4767_v52  ;;  %3924 = vmatprep.subr.bf16.mxu1 %v351_v41  ;;  %v4199_v39 = vld [vmem:[#allocation3 + $0x80] ss:$12 sps:$4 sm:$0xff]   ;;  %v4624_v40 = vmov 0.0  }
 0x1a1   :  { %v283_v47 = vpop.permute.xlu0 %282  ;;  %v4829_v42 = vld [vmem:[%s6049_s3 + $0x2] ss:$0 sm:$0xff] }
 0x1a2   :  { %v327_v48 = vadd.f32 %v311_v46, %v4773_v56  ;;  %v312_v49 = vmul.f32 %v283_v47, %v4767_v52  ;;  %v352_v50 = vpack.c.bf16 %v341_v44, %v340_v43  ;;  %v342_v53 = vmax.f32 %v326_v45, 0.0 }
 0x1a3   :  { %3925 = vmatpush3.bf16.msra.mxu1 %v351_v41  ;;  %v288_v51 = vpop.permute.xlu1 %287  ;;  %v4823_v41 = vld [vmem:[#allocation3 + $0x94] ss:$12 sps:$4 sm:$0xff]  }
 0x1a4   :  { %v343_v54 = vmax.f32 %v327_v48, 0.0  ;;  %v328_v55 = vadd.f32 %v312_v49, %v4773_v56  ;;  %v313_v57 = vmul.f32 %v288_v51, %v4767_v52  ;;  %3926 = vmatprep.subr.bf16.mxu1 %v352_v50 }
 0x1a5   :  { %v293_v58 = vpop.permute.xlu0 %292 }
 0x1a6   :  { %v329_v59 = vadd.f32 %v313_v57, %v4773_v56  ;;  %v314_v60 = vmul.f32 %v293_v58, %v4767_v52  ;;  %v353_v61 = vpack.c.bf16 %v343_v54, %v342_v53  ;;  %v344_v63 = vmax.f32 %v328_v55, 0.0  ;;  %v4835_v58 = vld [vmem:[#allocation3 + $0x98] ss:$12 sps:$4 sm:$0xff]  }
 0x1a7   :  { %3927 = vmatpush3.bf16.msra.mxu1 %v352_v50  ;;  %v298_v62 = vpop.permute.xlu1 %297 }
 0x1a8   :  { %v345_v1 = vmax.f32 %v329_v59, 0.0  ;;  %v330_v2 = vadd.f32 %v314_v60, %v4773_v56  ;;  %v315_v3 = vmul.f32 %v298_v62, %v4767_v52  ;;  %3928 = vmatprep.subr.bf16.mxu1 %v353_v61  ;;  %v4188_v52 = vld [vmem:[#allocation3 + $0x48] ss:$12 sps:$4 sm:$0xff]  }
 0x1aa   :  { %v331_v4 = vadd.f32 %v315_v3, %v4773_v56  ;;  %v354_v5 = vpack.c.bf16 %v345_v1, %v344_v63  ;;  %v346_v6 = vmax.f32 %v330_v2, 0.0  ;;  %v4190_v56 = vld [vmem:[#allocation3 + $0x4c] ss:$12 sps:$4 sm:$0xff]   ;;  %v4838_v63 = vld [vmem:[#allocation3 + $0x90] ss:$12 sps:$4 sm:$0xff]  }
 0x1ab   :  { %3929 = vmatpush3.bf16.msra.mxu1 %v353_v61  ;;  %v4843_v3 = vld [vmem:[#allocation3 + $0xac] ss:$12 sps:$4 sm:$0xff]  }
 0x1ac   :  { %v347_v7 = vmax.f32 %v331_v4, 0.0  ;;  %3930 = vmatprep.subr.bf16.mxu1 %v354_v5 }
 0x1ae   :  { %v355_v8 = vpack.c.bf16 %v347_v7, %v346_v6  ;;  %v4848_v7 = vld [vmem:[#allocation3 + $0xb0] ss:$12 sps:$4 sm:$0xff]  }
 0x1af   :  { %3931 = vmatpush3.bf16.msra.mxu1 %v354_v5 }
 0x1b0   :  { %3932 = vmatprep.subr.bf16.mxu1 %v355_v8 }
 0x1b3   :  { %3933 = vmatpush3.bf16.msra.mxu1 %v355_v8 }
 0x1b4   :  { %715 = vmatprep.subr.bf16.mxu1 %v4190_v56 }
 0x1b6   :  { %3935 = vmatmul.mubr.bf16.vlgmr.msra.gmra.mrb[0].mxu1 %v4725_v26  ;;  %v4191_v26 = vld [vmem:[#allocation3 + $0x60] ss:$12 sps:$4 sm:$0xff]  }
 0x1b7   :  { %3938 = vmatprep.mubr.bf16.mxu1 %v4730_v27  ;;  %716 = vmatpush1.bf16.msra.mxu1 %v4188_v52  ;;  %v4196_v27 = vld [vmem:[#allocation3 + $0x7c] ss:$12 sps:$4 sm:$0xff]  }
 0x1b8   :  { %717 = vmatprep.subr.bf16.mxu1 %v4193_v9  ;;  %v4854_v9 = vld [vmem:[#allocation3 + $0xa8] ss:$12 sps:$4 sm:$0xff]  }
 0x1bb   :  { %718 = vmatpush1.bf16.msra.mxu1 %v4191_v26 }
 0x1bc   :  { %719 = vmatprep.subr.bf16.mxu1 %v4196_v27 }
 0x1be   :  { %3939 = vmatmul.mubr.bf16.gmra.mrb[4].mxu1 %v4737_v28  ;;  %v4194_v28 = vld [vmem:[#allocation3 + $0x78] ss:$12 sps:$4 sm:$0xff]  }
 0x1bf   :  { %3942 = vmatprep.mubr.bf16.mxu1 %v4742_v29  ;;  %720 = vmatpush1.bf16.msra.mxu1 %v4194_v28 }
 0x1c0   :  { %3994 = vmatprep.subr.bf16.mxu1 %v4624_v40 }
 0x1c6   :  { %3943 = vmatmul.mubr.bf16.gmra.mrb[8].mxu1 %v4749_v30 }
 0x1c7   :  { %3946 = vmatprep.mubr.bf16.mxu1 %v4754_v31 }
 0x1ce   :  { %3947 = vmatmul.mubr.bf16.gmra.mrb[12].mxu1 %v4761_v32 }
 0x1cf   :  { %747 = vmatprep.mubr.bf16.mxu1 %v4623_v0 }
 0x289   :  { %v3936_v29 = vpop.f32.mrb[0].mxu1 }
 0x28a   :  { %v390_v30 = vpop.f32.mrb[1].mxu1 }
 0x28b   :  { %v3937_v31 = vpop.f32.mrb[2].mxu1 }
 0x28c   :  { %v460_v32 = vpack.c.bf16 %v3937_v31, %v3936_v29  ;;  %v393_v11 = vpop.f32.mrb[3].mxu1  ;;  %v4860_v29 = vld [vmem:[#allocation3 + $0xc4] ss:$12 sps:$4 sm:$0xff]  }
 0x28d   :  { %v459_v12 = vpack.c.bf16 %v393_v11, %v390_v30  ;;  %v4863_v30 = vld [vmem:[#allocation3 + $0xc8] ss:$12 sps:$4 sm:$0xff]   ;;  %v4867_v11 = vld [vmem:[#allocation3 + $0xc0] ss:$12 sps:$4 sm:$0xff]  }
 0x28f   :  { %3956 = vmatprep.mubr.msk.bf16.mxu0 %vm485_vm0, %v459_v12 }
 0x290   :  { %3957 = vmatmul.mubr.msk.bf16.vlgmr.msra.gmra.mrb[16].mxu0 %vm485_vm0, %v460_v32 }
 0x291   :  { %v3940_v13 = vpop.f32.mrb[4].mxu1  ;;  %3973 = vmatpush3.bf16.msra.mxu0 %v4197_v10 }
 0x292   :  { %v406_v14 = vpop.f32.mrb[5].mxu1  ;;  %3974 = vmatprep.subr.bf16.mxu0 %v4198_v38 }
 0x293   :  { %v3941_v15 = vpop.f32.mrb[6].mxu1 }
 0x294   :  { %v462_v16 = vpack.c.bf16 %v3941_v15, %v3940_v13  ;;  %v409_v17 = vpop.f32.mrb[7].mxu1 }
 0x295   :  { %v461_v18 = vpack.c.bf16 %v409_v17, %v406_v14  ;;  %3975 = vmatpush3.bf16.msra.mxu0 %v4198_v38  ;;  %v4872_v14 = vld [vmem:[#allocation3 + $0xdc] ss:$12 sps:$4 sm:$0xff]  }
 0x296   :  { %3976 = vmatprep.subr.bf16.mxu0 %v4199_v39 }
 0x297   :  { %3960 = vmatprep.mubr.msk.bf16.mxu0 %vm485_vm0, %v461_v18  ;;  %v990_v18 = vld [vmem:[#allocation3 + $0xf0] sm:$0xff] }
 0x298   :  { %3961 = vmatmul.mubr.msk.bf16.gmra.mrb[20].mxu0 %vm485_vm0, %v462_v16 }
 0x299   :  { %v3944_v19 = vpop.f32.mrb[8].mxu1  ;;  %3977 = vmatpush3.bf16.msra.mxu0 %v4199_v39 }
 0x29a   :  { %v422_v20 = vpop.f32.mrb[9].mxu1  ;;  %1100 = vmatprep.subr.bf16.mxu0 %v4823_v41 }
 0x29b   :  { %v3945_v21 = vpop.f32.mrb[10].mxu1 }
 0x29c   :  { %v464_v22 = vpack.c.bf16 %v3945_v21, %v3944_v19  ;;  %v425_v23 = vpop.f32.mrb[11].mxu1  ;;  %v4881_v21 = vld [vmem:[#allocation3 + $0xe0] ss:$12 sps:$4 sm:$0xff]  }
 0x29d   :  { %v463_v24 = vpack.c.bf16 %v425_v23, %v422_v20  ;;  %v4884_v23 = vld [vmem:[#allocation3 + $0xd8] ss:$12 sps:$4 sm:$0xff]  }
 0x29f   :  { %3964 = vmatprep.mubr.msk.bf16.mxu0 %vm485_vm0, %v463_v24  ;;  %v4218_v24 = vld [vmem:[#allocation3 + $0xf8] ss:$0 sps:$4 sm:$0xff]  }
 0x2a0   :  { %3965 = vmatmul.mubr.msk.bf16.gmra.mrb[24].mxu0 %vm485_vm0, %v464_v22 }
 0x2a1   :  { %v3948_v25 = vpop.f32.mrb[12].mxu1 }
 0x2a2   :  { %v438_v33 = vpop.f32.mrb[13].mxu1 }
 0x2a3   :  { %v3949_v34 = vpop.f32.mrb[14].mxu1 }
 0x2a4   :  { %v466_v35 = vpack.c.bf16 %v3949_v34, %v3948_v25  ;;  %v441_v36 = vpop.f32.mrb[15].mxu1 }
 0x2a5   :  { %v465_v37 = vpack.c.bf16 %v441_v36, %v438_v33  ;;  %v3622_v33 = vcombine.low %v990_v18, %v990_v18 }
 0x2a7   :  { %3968 = vmatprep.mubr.msk.bf16.mxu0 %vm485_vm0, %v465_v37  ;;  %v4888_v37 = vcombine.high %v990_v18, %v990_v18 }
 0x2a8   :  { %3969 = vmatmul.mubr.msk.bf16.gmra.mrb[28].mxu0 %vm485_vm0, %v466_v35 }
 0x363   :  { %v3958_v43 = vpop.f32.mrb[16].mxu0 }
 0x364   :  { %v553_v44 = vadd.f32 %v3958_v43, %v4829_v42  ;;  %v544_v45 = vpop.f32.mrb[17].mxu0  ;;  %v4895_v43 = vsel %vm1090_vm1, %v4218_v24, 0 }
 0x365   :  { %v545_v46 = vadd.f32 %v544_v45, %v4829_v42  ;;  %v3959_v47 = vpop.f32.mrb[18].mxu0 }
 0x366   :  { %v556_v48 = vadd.f32 %v3959_v47, %v4829_v42  ;;  %v547_v49 = vpop.f32.mrb[19].mxu0  ;;  %v609_v51 = vmax.f32 %v553_v44, 0.0 }
 0x367   :  { %v548_v50 = vadd.f32 %v547_v49, %v4829_v42  ;;  %v607_v54 = vmax.f32 %v545_v46, 0.0  ;;  %v4901_v46 = vsel %vm1090_vm1, %v3622_v33, 0 }
 0x368   :  { %v610_v53 = vmax.f32 %v556_v48, 0.0 }
 0x369   :  { %v608_v55 = vmax.f32 %v548_v50, 0.0 }
 0x36a   :  { %v636_v57 = vpack.c.bf16 %v610_v53, %v609_v51 }
 0x36b   :  { %v635_v59 = vpack.c.bf16 %v608_v55, %v607_v54  ;;  %v3962_v60 = vpop.f32.mrb[20].mxu0 }
 0x36c   :  { %v569_v61 = vadd.f32 %v3962_v60, %v4829_v42  ;;  %v560_v62 = vpop.f32.mrb[21].mxu0 }
 0x36d   :  { %v561_v1 = vadd.f32 %v560_v62, %v4829_v42  ;;  %v3963_v2 = vpop.f32.mrb[22].mxu0  ;;  %3593 = vmatmul.mubr.msk.bf16.vlgmr.msra.gmra.mrb[16].mxu1 %vm485_vm0, %v635_v59  ;;  %3978 = vmatprep.mubr.msk.bf16.mxu0 %vm485_vm0, %v635_v59 }
 0x36e   :  { %v613_v4 = vmax.f32 %v569_v61, 0.0  ;;  %v572_v5 = vadd.f32 %v3963_v2, %v4829_v42  ;;  %3995 = vmatpush3.bf16.msra.mxu1 %v4835_v58  ;;  %v563_v6 = vpop.f32.mrb[23].mxu0  ;;  %3979 = vmatmul.mubr.msk.bf16.vlgmr.msra.gmra.mrb[32].mxu0 %vm485_vm0, %v636_v57  ;;  %v4961_v61 = vld [vmem:[%s6049_s3 + $0x3] ss:$8 sm:$0x7] }
 0x36f   :  { %v611_v8 = vmax.f32 %v561_v1, 0.0  ;;  %v564_v52 = vadd.f32 %v563_v6, %v4829_v42  ;;  %757 = vmatprep.mubr.bf16.mxu1 %v4623_v0  ;;  %3996 = vmatprep.subr.bf16.mxu1 %v4624_v40 }
 0x370   :  { %v614_v56 = vmax.f32 %v572_v5, 0.0  ;;  %1101 = vmatpush1.bf16.msra.mxu0 %v4838_v63 }
 0x371   :  { %v612_v10 = vmax.f32 %v564_v52, 0.0  ;;  %1102 = vmatprep.subr.bf16.mxu0 %v4843_v3 }
 0x372   :  { %v4857_v26 = vpack.c.bf16 %v614_v56, %v613_v4  ;;  %3997 = vmatpush3.bf16.msra.mxu1 %v4848_v7 }
 0x373   :  { %v637_v27 = vpack.c.bf16 %v612_v10, %v611_v8  ;;  %v3966_v28 = vpop.f32.mrb[24].mxu0  ;;  %3998 = vmatprep.subr.bf16.mxu1 %v4624_v40 }
 0x374   :  { %v585_v31 = vadd.f32 %v3966_v28, %v4829_v42  ;;  %v576_v32 = vpop.f32.mrb[25].mxu0  ;;  %1103 = vmatpush1.bf16.msra.mxu0 %v4854_v9 }
 0x375   :  { %v577_v12 = vadd.f32 %v576_v32, %v4829_v42  ;;  %v3967_v13 = vpop.f32.mrb[26].mxu0  ;;  %3594 = vmatmul.mubr.msk.bf16.gmra.mrb[20].mxu1 %vm485_vm0, %v636_v57  ;;  %3982 = vmatprep.mubr.msk.bf16.mxu0 %vm485_vm0, %v637_v27 }
 0x376   :  { %v617_v15 = vmax.f32 %v585_v31, 0.0  ;;  %v588_v16 = vadd.f32 %v3967_v13, %v4829_v42  ;;  %v579_v17 = vpop.f32.mrb[27].mxu0  ;;  %3983 = vmatmul.mubr.msk.bf16.gmra.mrb[36].mxu0 %vm485_vm0, %v4857_v26  ;;  %767 = vmatprep.mubr.bf16.mxu1 %v4623_v0 }
 0x377   :  { %v615_v19 = vmax.f32 %v577_v12, 0.0  ;;  %v580_v20 = vadd.f32 %v579_v17, %v4829_v42  ;;  %1104 = vmatprep.subr.bf16.mxu0 %v4860_v29  ;;  %3999 = vmatpush3.bf16.msra.mxu1 %v4863_v30 }
 0x378   :  { %v618_v22 = vmax.f32 %v588_v16, 0.0  ;;  %1105 = vmatpush1.bf16.msra.mxu0 %v4867_v11  ;;  %4000 = vmatprep.subr.bf16.mxu1 %v4624_v40 }
 0x379   :  { %v616_v25 = vmax.f32 %v580_v20, 0.0  ;;  %1106 = vmatprep.subr.bf16.mxu0 %v4872_v14 }
 0x37a   :  { %v640_v34 = vpack.c.bf16 %v618_v22, %v617_v15 }
 0x37b   :  { %v639_v35 = vpack.c.bf16 %v616_v25, %v615_v19  ;;  %v3970_v36 = vpop.f32.mrb[28].mxu0  ;;  %4001 = vmatpush3.bf16.msra.mxu1 %v4881_v21 }
 0x37c   :  { %v601_v38 = vadd.f32 %v3970_v36, %v4829_v42  ;;  %v592_v39 = vpop.f32.mrb[29].mxu0  ;;  %1107 = vmatpush1.bf16.msra.mxu0 %v4884_v23  ;;  %4002 = vmatprep.subr.bf16.mxu1 %v4624_v40 }
 0x37d   :  { %v593_v44 = vadd.f32 %v592_v39, %v4829_v42  ;;  %v3971_v45 = vpop.f32.mrb[30].mxu0  ;;  %3595 = vmatmul.mubr.msk.bf16.gmra.mrb[24].mxu1 %vm485_vm0, %v637_v27  ;;  %3986 = vmatprep.mubr.msk.bf16.mxu0 %vm485_vm0, %v639_v35 }
 0x37e   :  { %v621_v47 = vmax.f32 %v601_v38, 0.0  ;;  %v604_v48 = vadd.f32 %v3971_v45, %v4829_v42  ;;  %v595_v49 = vpop.f32.mrb[31].mxu0  ;;  %3987 = vmatmul.mubr.msk.bf16.gmra.mrb[40].mxu0 %vm485_vm0, %v640_v34  ;;  %777 = vmatprep.mubr.bf16.mxu1 %v4623_v0 }
 0x37f   :  { %v619_v50 = vmax.f32 %v593_v44, 0.0  ;;  %v596_v51 = vadd.f32 %v595_v49, %v4829_v42  ;;  %3625 = vmatprep.subr.msk.bf16.mxu0 %vm1090_vm1, %v4888_v37  ;;  %4003 = vmatpush3.bf16.msra.mxu1 %v4895_v43  ;;  %v996_v42 = vlaneseq }
 0x380   :  { %v622_v53 = vmax.f32 %v604_v48, 0.0  ;;  %1109 = vmatpush1.bf16.msra.mxu0 %v4901_v46  ;;  %4008 = vmatprep.subr.bf16.mxu1 %v4624_v40 }
 0x381   :  { %v620_v54 = vmax.f32 %v596_v51, 0.0  ;;  %1331 = vmatprep.subr.bf16.mxu0 %v4823_v41  ;;  %v4955_v59 = vshrl.u32 %v996_v42, 7 }
 0x382   :  { %v642_v55 = vpack.c.bf16 %v622_v53, %v621_v47 }
 0x383   :  { %v641_v57 = vpack.c.bf16 %v620_v54, %v619_v50  ;;  %v1001_v60 = vsub.s32 0, %v4955_v59  ;;  %v1005_v44 = vsub.s32 1, %v4955_v59 }
 0x385   :  { %3596 = vmatmul.mubr.msk.bf16.gmra.mrb[28].mxu1 %vm485_vm0, %v4857_v26  ;;  %3990 = vmatprep.mubr.msk.bf16.mxu0 %vm485_vm0, %v641_v57  ;;  %v4964_v62 = vrot.slane %v4961_v61, %v1001_v60  ;;  %v5008_v47 = vrot.slane %v4961_v61, %v1005_v44  ;;  %v1009_v44 = vsub.s32 2, %v4955_v59 }
 0x386   :  { %3991 = vmatmul.mubr.msk.bf16.gmra.mrb[44].mxu0 %vm485_vm0, %v642_v55  ;;  %787 = vmatprep.mubr.bf16.mxu1 %v4623_v0 }
 0x387   :  { %1132 = vmatprep.mubr.bf16.mxu0 %v4623_v0 }
 0x38d   :  { %3597 = vmatmul.mubr.msk.bf16.gmra.mrb[32].mxu1 %vm485_vm0, %v639_v35 }
 0x38e   :  { %1133 = vmatmul.mubr.bf16.vlgmr.msra.gmra.mrb[48].mxu0 %v4623_v0  ;;  %797 = vmatprep.mubr.bf16.mxu1 %v4623_v0 }
 0x38f   :  { %1332 = vmatpush1.bf16.msra.mxu0 %v4838_v63  ;;  %1363 = vmatprep.mubr.bf16.mxu0 %v4623_v0 }
 0x390   :  { %1333 = vmatprep.subr.bf16.mxu0 %v4843_v3 }
 0x393   :  { %1334 = vmatpush1.bf16.msra.mxu0 %v4854_v9 }
 0x394   :  { %1335 = vmatprep.subr.bf16.mxu0 %v4860_v29 }
 0x395   :  { %3598 = vmatmul.mubr.msk.bf16.gmra.mrb[36].mxu1 %vm485_vm0, %v640_v34 }
 0x396   :  { %807 = vmatprep.mubr.bf16.mxu1 %v4623_v0 }
 0x397   :  { %1336 = vmatpush1.bf16.msra.mxu0 %v4867_v11 }
 0x398   :  { %1337 = vmatprep.subr.bf16.mxu0 %v4872_v14 }
 0x39b   :  { %1338 = vmatpush1.bf16.msra.mxu0 %v4884_v23 }
 0x39c   :  { %3636 = vmatprep.subr.msk.bf16.mxu0 %vm1090_vm1, %v4888_v37 }
 0x39d   :  { %3599 = vmatmul.mubr.msk.bf16.gmra.mrb[40].mxu1 %vm485_vm0, %v641_v57 }
 0x39e   :  { %817 = vmatprep.mubr.bf16.mxu1 %v4623_v0 }
 0x39f   :  { %1340 = vmatpush1.bf16.msra.mxu0 %v4901_v46 }
 0x3a0   :  { %1568 = vmatprep.subr.bf16.mxu0 %v4823_v41 }
 0x3a5   :  { %3600 = vmatmul.mubr.msk.bf16.gmra.mrb[44].mxu1 %vm485_vm0, %v642_v55 }
 0x3a6   :  { %4004 = vmatprep.mubr.msk.bf16.mxu1 %vm4625_vm2, %v4624_v40 }
 0x3ad   :  { %4005 = vmatmul.mubr.bf16.vlgmr.msra.gmra.mrb[48].mxu1 %v4623_v0 }
 0x3ae   :  { %4009 = vmatpush3.bf16.msra.mxu1 %v4835_v58  ;;  %4018 = vmatprep.mubr.msk.bf16.mxu1 %vm4625_vm2, %v4624_v40 }
 0x3af   :  { %4010 = vmatprep.subr.bf16.mxu1 %v4624_v40 }
 0x3b2   :  { %4011 = vmatpush3.bf16.msra.mxu1 %v4848_v7 }
 0x3b3   :  { %4012 = vmatprep.subr.bf16.mxu1 %v4624_v40 }
 0x3b6   :  { %4013 = vmatpush3.bf16.msra.mxu1 %v4863_v30 }
 0x3b7   :  { %4014 = vmatprep.subr.bf16.mxu1 %v4624_v40 }
 0x3ba   :  { %4015 = vmatpush3.bf16.msra.mxu1 %v4881_v21 }
 0x3bb   :  { %4016 = vmatprep.subr.bf16.mxu1 %v4624_v40 }
 0x3be   :  { %4017 = vmatpush3.bf16.msra.mxu1 %v4895_v43 }
 0x3bf   :  { %4022 = vmatprep.subr.bf16.mxu1 %v4624_v40 }
 0x440   :  { %v4966_v1 = vpop.f32.mrb[16].mxu1 }
 0x441   :  { %v4968_v2 = vpop.f32.mrb[17].mxu1  ;;  %v3980_v4 = vpop.f32.mrb[32].mxu0 }
 0x442   :  { %934 = vst.msk [vmem:[#allocation2 + $0x40] sm:$0xff] %vm927_vm3, %v3980_v4  ;;  %v4971_v5 = vpop.f32.mrb[18].mxu1  ;;  %v862_v6 = vpop.f32.mrb[33].mxu0 }
 0x443   :  { %928 = vst.msk [vmem:[#allocation2 + $0x10] sm:$0xff] %vm927_vm3, %v862_v6  ;;  %v4974_v8 = vpop.f32.mrb[19].mxu1  ;;  %v3981_v52 = vpop.f32.mrb[34].mxu0 }
 0x444   :  { %937 = vst.msk [vmem:[#allocation2 + $0x58] sm:$0xff] %vm927_vm3, %v3981_v52  ;;  %v865_v56 = vpop.f32.mrb[35].mxu0 }
 0x445   :  { %931 = vst.msk [vmem:[#allocation2 + $0x28] sm:$0xff] %vm927_vm3, %v865_v56 }
 0x448   :  { %v4978_v10 = vpop.f32.mrb[20].mxu1 }
 0x449   :  { %v4980_v26 = vpop.f32.mrb[21].mxu1  ;;  %v3984_v27 = vpop.f32.mrb[36].mxu0 }
 0x44a   :  { %946 = vst.msk [vmem:[#allocation2 + $0xa0] sm:$0xff] %vm927_vm3, %v3984_v27  ;;  %v4983_v28 = vpop.f32.mrb[22].mxu1  ;;  %v878_v31 = vpop.f32.mrb[37].mxu0 }
 0x44b   :  { %940 = vst.msk [vmem:[#allocation2 + $0x70] sm:$0xff] %vm927_vm3, %v878_v31  ;;  %v4986_v32 = vpop.f32.mrb[23].mxu1  ;;  %v3985_v12 = vpop.f32.mrb[38].mxu0 }
 0x44c   :  { %949 = vst.msk [vmem:[#allocation2 + $0xb8] sm:$0xff] %vm927_vm3, %v3985_v12  ;;  %v881_v13 = vpop.f32.mrb[39].mxu0 }
 0x44d   :  { %943 = vst.msk [vmem:[#allocation2 + $0x88] sm:$0xff] %vm927_vm3, %v881_v13 }
 0x450   :  { %v4990_v15 = vpop.f32.mrb[24].mxu1 }
 0x451   :  { %v4992_v16 = vpop.f32.mrb[25].mxu1  ;;  %v3988_v17 = vpop.f32.mrb[40].mxu0 }
 0x452   :  { %v4994_v18 = vpop.f32.mrb[26].mxu1  ;;  %958 = vst.msk [vmem:[#allocation2 + $0x100] sm:$0xff] %vm927_vm3, %v3988_v17  ;;  %v894_v19 = vpop.f32.mrb[41].mxu0 }
 0x453   :  { %v4997_v20 = vpop.f32.mrb[27].mxu1  ;;  %952 = vst.msk [vmem:[#allocation2 + $0xd0] sm:$0xff] %vm927_vm3, %v894_v19  ;;  %v3989_v22 = vpop.f32.mrb[42].mxu0 }
 0x454   :  { %961 = vst.msk [vmem:[#allocation2 + $0x118] sm:$0xff] %vm927_vm3, %v3989_v22  ;;  %v897_v24 = vpop.f32.mrb[43].mxu0 }
 0x455   :  { %955 = vst.msk [vmem:[#allocation2 + $0xe8] sm:$0xff] %vm927_vm3, %v897_v24 }
 0x458   :  { %v779_v25 = vpop.f32.mrb[28].mxu1 }
 0x459   :  { %944 = vst [vmem:[#allocation2 + $0x90] sm:$0xff] %v779_v25  ;;  %v781_v33 = vpop.f32.mrb[29].mxu1  ;;  %v3992_v34 = vpop.f32.mrb[44].mxu0 }
 0x45a   :  { %945 = vst [vmem:[#allocation2 + $0x98] sm:$0xff] %v781_v33  ;;  %v783_v35 = vpop.f32.mrb[30].mxu1  ;;  %970 = vst.msk [vmem:[#allocation2 + $0x160] sm:$0xff] %vm927_vm3, %v3992_v34  ;;  %v910_v36 = vpop.f32.mrb[45].mxu0 }
 0x45b   :  { %947 = vst [vmem:[#allocation2 + $0xa8] sm:$0xff] %v783_v35  ;;  %v785_v38 = vpop.f32.mrb[31].mxu1  ;;  %964 = vst.msk [vmem:[#allocation2 + $0x130] sm:$0xff] %vm927_vm3, %v910_v36  ;;  %v3993_v39 = vpop.f32.mrb[46].mxu0 }
 0x45c   :  { %948 = vst [vmem:[#allocation2 + $0xb0] sm:$0xff] %v785_v38  ;;  %973 = vst.msk [vmem:[#allocation2 + $0x178] sm:$0xff] %vm927_vm3, %v3993_v39  ;;  %v913_v45 = vpop.f32.mrb[47].mxu0 }
 0x45d   :  { %967 = vst.msk [vmem:[#allocation2 + $0x148] sm:$0xff] %vm927_vm3, %v913_v45 }
 0x460   :  { %v789_v48 = vpop.f32.mrb[32].mxu1 }
 0x461   :  { %950 = vst [vmem:[#allocation2 + $0xc0] sm:$0xff] %v789_v48  ;;  %v791_v49 = vpop.f32.mrb[33].mxu1  ;;  %v1134_v50 = vpop.f32.mrb[48].mxu0 }
 0x462   :  { %951 = vst [vmem:[#allocation2 + $0xc8] sm:$0xff] %v791_v49  ;;  %v1135_v51 = vadd.f32 %v1134_v50, %v4964_v62  ;;  %v793_v53 = vpop.f32.mrb[34].mxu1  ;;  %v1136_v54 = vpop.f32.mrb[49].mxu0  ;;  %v5024_v49 = vrot.slane %v4961_v61, %v1009_v44 }
 0x463   :  { %953 = vst [vmem:[#allocation2 + $0xd8] sm:$0xff] %v793_v53  ;;  %v1137_v55 = vadd.f32 %v1136_v54, %v5008_v47  ;;  %v795_v57 = vpop.f32.mrb[35].mxu1  ;;  %v1138_v60 = vpop.f32.mrb[50].mxu0 }
 0x464   :  { %v5013_v4 = vadd.f32 %v1135_v51, %v4966_v1  ;;  %954 = vst [vmem:[#allocation2 + $0xe0] sm:$0xff] %v795_v57  ;;  %v1139_v6 = vadd.f32 %v1138_v60, %v4964_v62  ;;  %v1140_v52 = vpop.f32.mrb[51].mxu0  ;;  %v1186_v60 = vld [vmem:[#allocation2 + $0x10] sm:$0xff] }
 0x465   :  { %v1191_v56 = vadd.f32 %v1137_v55, %v4968_v2  ;;  %v1141_v27 = vadd.f32 %v1140_v52, %v5008_v47 }
 0x466   :  { %v5019_v31 = vadd.f32 %v1139_v6, %v4971_v5 }
 0x467   :  { %v3627_v12 = vmul.f32 -1.442695, %v1191_v56  ;;  %v1194_v13 = vadd.f32 %v1141_v27, %v4974_v8 }
 0x468   :  { %v799_v17 = vpop.f32.mrb[36].mxu1 }
 0x469   :  { %4219 = vpow2.f32 %v3627_v12  ;;  %v3630_v19 = vmul.f32 -1.442695, %v1194_v13  ;;  %956 = vst [vmem:[#allocation2 + $0xf0] sm:$0xff] %v799_v17  ;;  %v801_v1 = vpop.f32.mrb[37].mxu1  ;;  %v1189_v12 = vld [vmem:[#allocation2 + $0x28] sm:$0xff] }
 0x46a   :  { %957 = vst [vmem:[#allocation2 + $0xf8] sm:$0xff] %v801_v1  ;;  %v803_v22 = vpop.f32.mrb[38].mxu1 }
 0x46b   :  { %4221 = vpow2.f32 %v3630_v19  ;;  %959 = vst [vmem:[#allocation2 + $0x108] sm:$0xff] %v803_v22  ;;  %v805_v24 = vpop.f32.mrb[39].mxu1 }
 0x46c   :  { %960 = vst [vmem:[#allocation2 + $0x110] sm:$0xff] %v805_v24 }
 0x470   :  { %v809_v2 = vpop.f32.mrb[40].mxu1 }
 0x471   :  { %962 = vst [vmem:[#allocation2 + $0x120] sm:$0xff] %v809_v2  ;;  %v811_v25 = vpop.f32.mrb[41].mxu1 }
 0x472   :  { %963 = vst [vmem:[#allocation2 + $0x128] sm:$0xff] %v811_v25  ;;  %v813_v5 = vpop.f32.mrb[42].mxu1 }
 0x473   :  { %v4220_v33 = vpop.eup %4219  ;;  %965 = vst [vmem:[#allocation2 + $0x138] sm:$0xff] %v813_v5  ;;  %v815_v34 = vpop.f32.mrb[43].mxu1 }
 0x474   :  { %v1215_v8 = vadd.f32 1.0, %v4220_v33  ;;  %966 = vst [vmem:[#allocation2 + $0x140] sm:$0xff] %v815_v34 }
 0x475   :  { %v4222_v35 = vpop.eup %4221 }
 0x476   :  { %4223 = vrcp.f32 %v1215_v8  ;;  %v1218_v36 = vadd.f32 1.0, %v4222_v35 }
 0x478   :  { %4225 = vrcp.f32 %v1218_v36  ;;  %v819_v38 = vpop.f32.mrb[44].mxu1 }
 0x479   :  { %968 = vst [vmem:[#allocation2 + $0x150] sm:$0xff] %v819_v38  ;;  %v821_v39 = vpop.f32.mrb[45].mxu1  ;;  %v3626_v38 = vmul.f32 -1.442695, %v5013_v4 }
 0x47a   :  { %969 = vst [vmem:[#allocation2 + $0x158] sm:$0xff] %v821_v39  ;;  %v823_v45 = vpop.f32.mrb[46].mxu1  ;;  %v3629_v39 = vmul.f32 -1.442695, %v5019_v31 }
 0x47b   :  { %971 = vst [vmem:[#allocation2 + $0x168] sm:$0xff] %v823_v45  ;;  %v825_v48 = vpop.f32.mrb[47].mxu1 }
 0x47c   :  { %972 = vst [vmem:[#allocation2 + $0x170] sm:$0xff] %v825_v48 }
 0x480   :  { %v5026_v50 = vpop.eup %4223  ;;  %v1177_v51 = vpop.f32.mrb[48].mxu1 }
 0x481   :  { %v1178_v53 = vadd.f32 %v1177_v51, %v5024_v49  ;;  %v4006_v54 = vpop.f32.mrb[49].mxu1  ;;  %v1232_v55 = vmul.f32 2.0, %v5026_v50 }
 0x482   :  { %v5030_v57 = vpop.eup %4225  ;;  %v1180_v59 = vpop.f32.mrb[50].mxu1 }
 0x483   :  { %v1192_v6 = vadd.f32 %v1186_v60, %v1178_v53  ;;  %v1181_v52 = vadd.f32 %v1180_v59, %v5024_v49  ;;  %v4007_v56 = vpop.f32.mrb[51].mxu1  ;;  %v3632_v27 = vadd.f32 -1.0, %v1232_v55  ;;  %v1234_v61 = vmul.f32 2.0, %v5030_v57 }
 0x485   :  { %v3628_v13 = vmul.f32 -1.442695, %v1192_v6  ;;  %v1195_v17 = vadd.f32 %v1189_v12, %v1181_v52  ;;  %1248 = vrot.lane.b32.xlu0 %v3632_v27, %s4626_s29  ;;  %v3634_v1 = vadd.f32 -1.0, %v1234_v61  ;;  %v1241_v61 = vmul.f32 0.0, %v5026_v50 }
 0x487   :  { %4227 = vpow2.f32 %v3628_v13  ;;  %v3631_v19 = vmul.f32 -1.442695, %v1195_v17 }
 0x489   :  { %4229 = vpow2.f32 %v3631_v19  ;;  %1252 = vrot.lane.b32.xlu0 %v3634_v1, %s4626_s29  ;;  %v1243_v1 = vmul.f32 0.0, %v5030_v57 }
 0x491   :  { %v4228_v22 = vpop.eup %4227 }
 0x492   :  { %v1216_v24 = vadd.f32 1.0, %v4228_v22 }
 0x493   :  { %v4230_v2 = vpop.eup %4229 }
 0x494   :  { %4231 = vrcp.f32 %v1216_v24  ;;  %v1219_v25 = vadd.f32 1.0, %v4230_v2 }
 0x496   :  { %4233 = vrcp.f32 %v1219_v25 }
 0x497   :  { %4235 = vpow2.f32 %v3626_v38 }
 0x498   :  { %4237 = vpow2.f32 %v3629_v39 }
 0x49e   :  { %v4232_v5 = vpop.eup %4231 }
 0x49f   :  { %v1233_v33 = vmul.f32 2.0, %v4232_v5 }
 0x4a0   :  { %v4234_v34 = vpop.eup %4233 }
 0x4a1   :  { %v3633_v8 = vadd.f32 -1.0, %v1233_v33  ;;  %v1235_v35 = vmul.f32 2.0, %v4234_v34  ;;  %v4236_v44 = vpop.eup %4235 }
 0x4a2   :  { %v1214_v45 = vadd.f32 1.0, %v4236_v44  ;;  %v4238_v48 = vpop.eup %4237 }
 0x4a3   :  { %1250 = vrot.lane.b32.xlu1 %v3633_v8, %s4626_s29  ;;  %v3635_v36 = vadd.f32 -1.0, %v1235_v35  ;;  %v1217_v51 = vadd.f32 1.0, %v4238_v48 }
 0x4a4   :  { %4239 = vrcp.f32 %v1214_v45 }
 0x4a5   :  { %4241 = vrcp.f32 %v1217_v51 }
 0x4a7   :  { %1254 = vrot.lane.b32.xlu1 %v3635_v36, %s4626_s29 }
 0x4ae   :  { %v4240_v55 = vpop.eup %4239 }
 0x4af   :  { %v4242_v31 = vpop.eup %4241  ;;  %v1240_v27 = vmul.f32 0.0, %v4240_v55 }
 0x4b0   :  { %v1242_v19 = vmul.f32 0.0, %v4242_v31 }
 0x4f7   :  { %v1249_v53 = vpop.permute.xlu0 %1248 }
 0x4fb   :  { %v1253_v6 = vpop.permute.xlu0 %1252 }
 0x515   :  { %v1251_v54 = vpop.permute.xlu1 %1250 }
 0x516   :  { %v1257_v60 = vsel %vm1256_vm4, %v1249_v53, %v1251_v54  ;;  %v5060_v53 = vand.u32 127, %v996_v42 }
 0x517   :  { %v1261_v59 = vmul.f32 %v4240_v55, %v1257_v60 }
 0x518   :  { %vm1297_vm6 = vcmp.lt.s32.totalorder %v5060_v53, 18  ;;  %vm1535_vm8 = vcmp.lt.s32.totalorder %v5060_v53, 36  ;;  %vm1772_vm9 = vcmp.lt.s32.totalorder %v5060_v53, 54 }
 0x519   :  { %1265 = vrot.lane.b32.xlu0 %v1261_v59, %s4627_s30  ;;  %v1255_v4 = vpop.permute.xlu1 %1254 }
 0x51a   :  { %v1258_v52 = vsel %vm1256_vm4, %v1253_v6, %v1255_v4  ;;  %v1417_v6 = vld [vmem:[#allocation2 + $0x40] sm:$0xff] }
 0x51b   :  { %v1262_v56 = vmul.f32 %v4242_v31, %v1258_v52 }
 0x51d   :  { %1267 = vrot.lane.b32.xlu1 %v1262_v56, %s4627_s30 }
 0x58b   :  { %v1266_v12 = vpop.permute.xlu0 %1265 }
 0x58c   :  { %v1271_v13 = vadd.f32 %v1266_v12, %v1240_v27  ;;  %v1272_v17 = vadd.f32 %v1266_v12, %v1241_v61 }
 0x58e   :  { %4243 = vtanh.f32 %v1271_v13 }
 0x58f   :  { %4245 = vtanh.f32 %v1272_v17  ;;  %v1268_v22 = vpop.permute.xlu1 %1267 }
 0x590   :  { %v1273_v24 = vadd.f32 %v1268_v22, %v1242_v19  ;;  %v1274_v2 = vadd.f32 %v1268_v22, %v1243_v1  ;;  %v1420_v19 = vld [vmem:[#allocation2 + $0x58] sm:$0xff] }
 0x592   :  { %4247 = vtanh.f32 %v1273_v24 }
 0x593   :  { %4249 = vtanh.f32 %v1274_v2 }
 0x598   :  { %v4244_v25 = vpop.eup %4243 }
 0x599   :  { %v4246_v5 = vpop.eup %4245  ;;  %1283 = vrot.lane.b32.xlu0 %v4244_v25, %s4627_s30 }
 0x59a   :  { %1285 = vrot.lane.b32.xlu1 %v4246_v5, %s4627_s30 }
 0x59c   :  { %v4248_v33 = vpop.eup %4247 }
 0x59d   :  { %v4250_v34 = vpop.eup %4249  ;;  %1287 = vrot.lane.b32.xlu0 %v4248_v33, %s4627_s30 }
 0x59e   :  { %1289 = vrot.lane.b32.xlu1 %v4250_v34, %s4627_s30 }
 0x5a2   :  { %1302 = vrot.lane.b32.xlu1 %v1271_v13, %s4628_s5 }
 0x5a6   :  { %1306 = vrot.lane.b32.xlu1 %v1273_v24, %s4628_s5 }
 0x60b   :  { %v1284_v8 = vpop.permute.xlu0 %1283 }
 0x60c   :  { %v1286_v35 = vpop.permute.xlu1 %1285 }
 0x60d   :  { %v1291_v36 = vsel %vm1086_vm5, %v1284_v8, %v1286_v35 }
 0x60e   :  { %v1295_v45 = vmul.f32 %v5026_v50, %v1291_v36 }
 0x60f   :  { %v1288_v38 = vpop.permute.xlu0 %1287 }
 0x610   :  { %v1290_v39 = vpop.permute.xlu1 %1289 }
 0x611   :  { %v1292_v44 = vsel %vm1086_vm5, %v1288_v38, %v1290_v39 }
 0x612   :  { %v1296_v48 = vmul.f32 %v5030_v57, %v1292_v44 }
 0x614   :  { %v4162_v51 = vpack.i.bf16 %v1296_v48, %v1295_v45 }
 0x616   :  { %4163 = vrot.lane.b32.xlu0 %v4162_v51, %s4629_s6  ;;  %v1303_v51 = vpop.permute.xlu1 %1302 }
 0x61a   :  { %1304 = vrot.lane.b32.xlu0 %v1272_v17, %s4628_s5 }
 0x61e   :  { %1308 = vrot.lane.b32.xlu0 %v1274_v2, %s4628_s5 }
 0x688   :  { %v4164_v54 = vpop.permute.xlu0 %4163 }
 0x689   :  { %v4166_v55 = vunpack.i.h.bf16 %v4164_v54  ;;  %v4165_v60 = vunpack.i.l.bf16 %v4164_v54 }
 0x68b   :  { %v5065_v50 = vsel %vm1297_vm6, %v4166_v55, 0.0  ;;  %v5069_v57 = vsel %vm1297_vm6, %v4165_v60, 0.0 }
 0x68c   :  { %v1327_v59 = vpack.c.bf16 %v5065_v50, %v5069_v57 }
 0x68e   :  { %3637 = vmatmul.mubr.msk.bf16.vlgmr.msra.gmra.mrb[52].mxu0 %vm1086_vm5, %v1327_v59  ;;  %4019 = vmatmul.mubr.msk.bf16.vlgmr.msra.gmra.mrb[52].mxu1 %vm1086_vm5, %v1327_v59 }
 0x68f   :  { %1569 = vmatpush1.bf16.msra.mxu0 %v4838_v63  ;;  %4023 = vmatpush3.bf16.msra.mxu1 %v4835_v58 }
 0x690   :  { %1570 = vmatprep.subr.bf16.mxu0 %v4843_v3  ;;  %4024 = vmatprep.subr.bf16.mxu1 %v4624_v40 }
 0x691   :  { %1600 = vmatprep.mubr.bf16.mxu0 %v4623_v0  ;;  %4032 = vmatprep.mubr.msk.bf16.mxu1 %vm4625_vm2, %v4624_v40 }
 0x693   :  { %1571 = vmatpush1.bf16.msra.mxu0 %v4854_v9  ;;  %4025 = vmatpush3.bf16.msra.mxu1 %v4848_v7 }
 0x694   :  { %1572 = vmatprep.subr.bf16.mxu0 %v4860_v29  ;;  %4026 = vmatprep.subr.bf16.mxu1 %v4624_v40 }
 0x697   :  { %1573 = vmatpush1.bf16.msra.mxu0 %v4867_v11  ;;  %4027 = vmatpush3.bf16.msra.mxu1 %v4863_v30 }
 0x698   :  { %1574 = vmatprep.subr.bf16.mxu0 %v4872_v14  ;;  %4028 = vmatprep.subr.bf16.mxu1 %v4624_v40 }
 0x69b   :  { %1575 = vmatpush1.bf16.msra.mxu0 %v4884_v23  ;;  %4029 = vmatpush3.bf16.msra.mxu1 %v4881_v21 }
 0x69c   :  { %3649 = vmatprep.subr.msk.bf16.mxu0 %vm1090_vm1, %v4888_v37  ;;  %4030 = vmatprep.subr.bf16.mxu1 %v4624_v40 }
 0x69f   :  { %1577 = vmatpush1.bf16.msra.mxu0 %v4901_v46  ;;  %4031 = vmatpush3.bf16.msra.mxu1 %v4895_v43 }
 0x6a0   :  { %1805 = vmatprep.subr.bf16.mxu0 %v4823_v41  ;;  %4036 = vmatprep.subr.bf16.mxu1 %v4624_v40 }
 0x761   :  { %v1365_v58 = vpop.f32.mrb[52].mxu0  ;;  %v1408_v63 = vpop.f32.mrb[52].mxu1 }
 0x762   :  { %v1366_v3 = vadd.f32 %v1365_v58, %v4964_v62  ;;  %v1409_v7 = vadd.f32 %v1408_v63, %v5024_v49  ;;  %v1367_v9 = vpop.f32.mrb[53].mxu0  ;;  %v4020_v42 = vpop.f32.mrb[53].mxu1 }
 0x763   :  { %v1368_v4 = vadd.f32 %v1367_v9, %v5008_v47  ;;  %v1369_v31 = vpop.f32.mrb[54].mxu0  ;;  %v1411_v52 = vpop.f32.mrb[54].mxu1 }
 0x764   :  { %v1421_v56 = vadd.f32 %v1366_v3, %v4978_v10  ;;  %v1423_v27 = vadd.f32 %v1417_v6, %v1409_v7  ;;  %v1370_v41 = vadd.f32 %v1369_v31, %v4964_v62  ;;  %v1412_v61 = vadd.f32 %v1411_v52, %v5024_v49  ;;  %v1371_v12 = vpop.f32.mrb[55].mxu0  ;;  %v4021_v13 = vpop.f32.mrb[55].mxu1 }
 0x765   :  { %v1422_v17 = vadd.f32 %v1368_v4, %v4980_v26  ;;  %v1372_v1 = vadd.f32 %v1371_v12, %v5008_v47  ;;  %v1307_v42 = vpop.permute.xlu1 %1306 }
 0x766   :  { %v3641_v22 = vmul.f32 -1.442695, %v1423_v27  ;;  %v1424_v24 = vadd.f32 %v1370_v41, %v4983_v28  ;;  %v1426_v2 = vadd.f32 %v1420_v19, %v1412_v61  ;;  %v3639_v41 = vmul.f32 -1.442695, %v1421_v56 }
 0x767   :  { %v3640_v25 = vmul.f32 -1.442695, %v1422_v17  ;;  %v1425_v5 = vadd.f32 %v1372_v1, %v4986_v32  ;;  %v1305_v32 = vpop.permute.xlu0 %1304 }
 0x768   :  { %v3644_v10 = vmul.f32 -1.442695, %v1426_v2  ;;  %4251 = vpow2.f32 %v3641_v22  ;;  %v1311_v31 = vsel %vm1310_vm7, %v1303_v51, %v1305_v32  ;;  %v3642_v61 = vmul.f32 -1.442695, %v1424_v24 }
 0x769   :  { %v3643_v33 = vmul.f32 -1.442695, %v1425_v5  ;;  %4253 = vpow2.f32 %v3640_v25  ;;  %v5129_v27 = vsel %vm1297_vm6, %v1311_v31, 0.0 }
 0x76a   :  { %4255 = vpow2.f32 %v3644_v10 }
 0x76b   :  { %4257 = vpow2.f32 %v3643_v33  ;;  %v1309_v7 = vpop.permute.xlu0 %1308 }
 0x76c   :  { %v1312_v4 = vsel %vm1310_vm7, %v1307_v42, %v1309_v7 }
 0x76d   :  { %v5123_v52 = vsel %vm1297_vm6, %v1312_v4, 0.0 }
 0x772   :  { %v4252_v34 = vpop.eup %4251 }
 0x773   :  { %v4254_v8 = vpop.eup %4253  ;;  %v1447_v35 = vadd.f32 1.0, %v4252_v34 }
 0x774   :  { %v1446_v26 = vadd.f32 1.0, %v4254_v8  ;;  %v4256_v36 = vpop.eup %4255 }
 0x775   :  { %4259 = vrcp.f32 %v1447_v35  ;;  %v4258_v38 = vpop.eup %4257  ;;  %v1450_v39 = vadd.f32 1.0, %v4256_v36 }
 0x776   :  { %4261 = vrcp.f32 %v1446_v26  ;;  %v1449_v28 = vadd.f32 1.0, %v4258_v38 }
 0x777   :  { %4263 = vrcp.f32 %v1450_v39 }
 0x778   :  { %4265 = vrcp.f32 %v1449_v28 }
 0x779   :  { %4267 = vpow2.f32 %v3639_v41 }
 0x77a   :  { %4269 = vpow2.f32 %v3642_v61 }
 0x77f   :  { %v4260_v44 = vpop.eup %4259 }
 0x780   :  { %v5109_v45 = vpop.eup %4261  ;;  %v1464_v48 = vmul.f32 2.0, %v4260_v44 }
 0x781   :  { %v1463_v54 = vmul.f32 2.0, %v5109_v45  ;;  %v4264_v55 = vpop.eup %4263 }
 0x782   :  { %v3646_v60 = vadd.f32 -1.0, %v1464_v48  ;;  %v5112_v59 = vpop.eup %4265  ;;  %v1466_v63 = vmul.f32 2.0, %v4264_v55 }
 0x783   :  { %v3645_v58 = vadd.f32 -1.0, %v1463_v54  ;;  %v1465_v3 = vmul.f32 2.0, %v5112_v59  ;;  %v4268_v12 = vpop.eup %4267 }
 0x784   :  { %1489 = vrot.lane.b32.xlu0 %v3646_v60, %s4626_s29  ;;  %v3648_v9 = vadd.f32 -1.0, %v1466_v63  ;;  %v1445_v13 = vadd.f32 1.0, %v4268_v12  ;;  %v4270_v17 = vpop.eup %4269 }
 0x785   :  { %1487 = vrot.lane.b32.xlu1 %v3645_v58, %s4626_s29  ;;  %v3647_v6 = vadd.f32 -1.0, %v1465_v3  ;;  %v1448_v19 = vadd.f32 1.0, %v4270_v17 }
 0x786   :  { %4271 = vrcp.f32 %v1445_v13 }
 0x787   :  { %4273 = vrcp.f32 %v1448_v19 }
 0x788   :  { %1493 = vrot.lane.b32.xlu0 %v3648_v9, %s4626_s29 }
 0x789   :  { %1491 = vrot.lane.b32.xlu1 %v3647_v6, %s4626_s29 }
 0x78c   :  { %1475 = vrot.lane.b32.xlu0 %v5123_v52, %s4627_s30 }
 0x78d   :  { %1473 = vrot.lane.b32.xlu1 %v5129_v27, %s4627_s30 }
 0x790   :  { %v4272_v2 = vpop.eup %4271 }
 0x791   :  { %v4274_v56 = vpop.eup %4273 }
 0x7f6   :  { %v1490_v1 = vpop.permute.xlu0 %1489 }
 0x7f7   :  { %v1488_v22 = vpop.permute.xlu1 %1487 }
 0x7f8   :  { %v1495_v25 = vsel %vm1256_vm4, %v1488_v22, %v1490_v1  ;;  %v5167_v1 = vld [vmem:[#allocation3 + $0x90] ss:$12 sps:$4 sm:$0xff]   ;;  %v5170_v22 = vld [vmem:[#allocation3 + $0x98] ss:$12 sps:$4 sm:$0xff]  }
 0x7f9   :  { %v1499_v5 = vmul.f32 %v4272_v2, %v1495_v25 }
 0x7fa   :  { %v1494_v10 = vpop.permute.xlu0 %1493 }
 0x7fb   :  { %v1492_v33 = vpop.permute.xlu1 %1491  ;;  %1503 = vrot.lane.b32.xlu1 %v1499_v5, %s4627_s30  ;;  %v1654_v5 = vld [vmem:[#allocation2 + $0x70] sm:$0xff] }
 0x7fc   :  { %v1496_v24 = vsel %vm1256_vm4, %v1492_v33, %v1494_v10 }
 0x7fd   :  { %v1500_v34 = vmul.f32 %v4274_v56, %v1496_v24 }
 0x7fe   :  { %v1476_v36 = vpop.permute.xlu0 %1475 }
 0x7ff   :  { %1505 = vrot.lane.b32.xlu0 %v1500_v34, %s4627_s30  ;;  %v1474_v8 = vpop.permute.xlu1 %1473  ;;  %v1481_v44 = vmul.f32 %v4274_v56, %v1476_v36  ;;  %v1482_v32 = vmul.f32 %v5112_v59, %v1476_v36 }
 0x800   :  { %v1479_v35 = vmul.f32 %v4272_v2, %v1474_v8  ;;  %v1480_v26 = vmul.f32 %v5109_v45, %v1474_v8  ;;  %v5183_v2 = vld [vmem:[#allocation3 + $0xb0] ss:$12 sps:$4 sm:$0xff]  }
 0x86d   :  { %v1504_v38 = vpop.permute.xlu1 %1503 }
 0x86e   :  { %v1509_v39 = vadd.f32 %v1504_v38, %v1479_v35  ;;  %v1510_v28 = vadd.f32 %v1504_v38, %v1480_v26 }
 0x870   :  { %4275 = vtanh.f32 %v1509_v39 }
 0x871   :  { %4277 = vtanh.f32 %v1510_v28  ;;  %v1506_v48 = vpop.permute.xlu0 %1505 }
 0x872   :  { %v1511_v51 = vadd.f32 %v1506_v48, %v1481_v44  ;;  %v1512_v54 = vadd.f32 %v1506_v48, %v1482_v32 }
 0x874   :  { %4279 = vtanh.f32 %v1511_v51 }
 0x875   :  { %4281 = vtanh.f32 %v1512_v54 }
 0x87a   :  { %v4276_v55 = vpop.eup %4275 }
 0x87b   :  { %v4278_v60 = vpop.eup %4277  ;;  %1521 = vrot.lane.b32.xlu1 %v4276_v55, %s4627_s30 }
 0x87c   :  { %1523 = vrot.lane.b32.xlu0 %v4278_v60, %s4627_s30 }
 0x87e   :  { %v4280_v58 = vpop.eup %4279 }
 0x87f   :  { %v4282_v63 = vpop.eup %4281  ;;  %1525 = vrot.lane.b32.xlu1 %v4280_v58, %s4627_s30 }
 0x880   :  { %1527 = vrot.lane.b32.xlu0 %v4282_v63, %s4627_s30 }
 0x884   :  { %1540 = vrot.lane.b32.xlu0 %v1509_v39, %s4628_s5  ;;  %v1657_v39 = vld [vmem:[#allocation2 + $0x88] sm:$0xff] }
 0x888   :  { %1544 = vrot.lane.b32.xlu0 %v1511_v51, %s4628_s5 }
 0x8ed   :  { %v1522_v3 = vpop.permute.xlu1 %1521 }
 0x8ee   :  { %v1524_v7 = vpop.permute.xlu0 %1523 }
 0x8ef   :  { %v1529_v9 = vsel %vm1086_vm5, %v1522_v3, %v1524_v7 }
 0x8f0   :  { %v1533_v31 = vmul.f32 %v5109_v45, %v1529_v9 }
 0x8f1   :  { %v1526_v42 = vpop.permute.xlu1 %1525 }
 0x8f2   :  { %v1528_v6 = vpop.permute.xlu0 %1527 }
 0x8f3   :  { %v1530_v4 = vsel %vm1086_vm5, %v1526_v42, %v1528_v6 }
 0x8f4   :  { %v1534_v41 = vmul.f32 %v5112_v59, %v1530_v4 }
 0x8f6   :  { %v4167_v61 = vpack.i.bf16 %v1534_v41, %v1533_v31  ;;  %v1541_v31 = vpop.permute.xlu0 %1540 }
 0x8f8   :  { %4168 = vrot.lane.b32.xlu1 %v4167_v61, %s4629_s6 }
 0x8fc   :  { %1542 = vrot.lane.b32.xlu1 %v1510_v28, %s4628_s5 }
 0x900   :  { %1546 = vrot.lane.b32.xlu1 %v1512_v54, %s4628_s5 }
 0x96a   :  { %v4169_v12 = vpop.permute.xlu1 %4168 }
 0x96b   :  { %v4171_v13 = vunpack.i.h.bf16 %v4169_v12  ;;  %v4170_v17 = vunpack.i.l.bf16 %v4169_v12 }
 0x96d   :  { %v5156_v19 = vsel %vm1535_vm8, %v4171_v13, %v5065_v50  ;;  %v5161_v45 = vsel %vm1535_vm8, %v4170_v17, %v5069_v57  ;;  %v5173_v50 = vld [vmem:[#allocation3 + $0xac] ss:$12 sps:$4 sm:$0xff]   ;;  %v5180_v57 = vld [vmem:[#allocation3 + $0xa8] ss:$12 sps:$4 sm:$0xff]  }
 0x96e   :  { %v1564_v59 = vpack.c.bf16 %v5156_v19, %v5161_v45 }
 0x970   :  { %3650 = vmatmul.mubr.msk.bf16.vlgmr.msra.gmra.mrb[56].mxu0 %vm1086_vm5, %v1564_v59  ;;  %4033 = vmatmul.mubr.msk.bf16.vlgmr.msra.gmra.mrb[56].mxu1 %vm1086_vm5, %v1564_v59 }
 0x971   :  { %1806 = vmatpush1.bf16.msra.mxu0 %v5167_v1  ;;  %4037 = vmatpush3.bf16.msra.mxu1 %v5170_v22 }
 0x972   :  { %1807 = vmatprep.subr.bf16.mxu0 %v5173_v50  ;;  %4038 = vmatprep.subr.bf16.mxu1 %v4624_v40 }
 0x973   :  { %1837 = vmatprep.mubr.bf16.mxu0 %v4623_v0  ;;  %4046 = vmatprep.mubr.msk.bf16.mxu1 %vm4625_vm2, %v4624_v40 }
 0x975   :  { %1808 = vmatpush1.bf16.msra.mxu0 %v5180_v57  ;;  %4039 = vmatpush3.bf16.msra.mxu1 %v5183_v2 }
 0x976   :  { %1809 = vmatprep.subr.bf16.mxu0 %v4860_v29  ;;  %4040 = vmatprep.subr.bf16.mxu1 %v4624_v40  ;;  %v5199_v29 = vld [vmem:[#allocation3 + $0x94] ss:$12 sps:$4 sm:$0xff]  }
 0x979   :  { %1810 = vmatpush1.bf16.msra.mxu0 %v4867_v11  ;;  %4041 = vmatpush3.bf16.msra.mxu1 %v4863_v30 }
 0x97a   :  { %1811 = vmatprep.subr.bf16.mxu0 %v4872_v14  ;;  %4042 = vmatprep.subr.bf16.mxu1 %v4624_v40 }
 0x97d   :  { %1812 = vmatpush1.bf16.msra.mxu0 %v4884_v23  ;;  %4043 = vmatpush3.bf16.msra.mxu1 %v4881_v21 }
 0x97e   :  { %3662 = vmatprep.subr.msk.bf16.mxu0 %vm1090_vm1, %v4888_v37  ;;  %4044 = vmatprep.subr.bf16.mxu1 %v4624_v40 }
 0x981   :  { %1814 = vmatpush1.bf16.msra.mxu0 %v4901_v46  ;;  %4045 = vmatpush3.bf16.msra.mxu1 %v4895_v43 }
 0x982   :  { %2042 = vmatprep.subr.bf16.mxu0 %v5199_v29  ;;  %4050 = vmatprep.subr.bf16.mxu1 %v4624_v40 }
 0xa43   :  { %v1602_v30 = vpop.f32.mrb[56].mxu0  ;;  %v1645_v11 = vpop.f32.mrb[56].mxu1 }
 0xa44   :  { %v1603_v14 = vadd.f32 %v1602_v30, %v4964_v62  ;;  %v1646_v21 = vadd.f32 %v1645_v11, %v5024_v49  ;;  %v1604_v23 = vpop.f32.mrb[57].mxu0  ;;  %v4034_v25 = vpop.f32.mrb[57].mxu1 }
 0xa45   :  { %v1605_v10 = vadd.f32 %v1604_v23, %v5008_v47  ;;  %v1606_v33 = vpop.f32.mrb[58].mxu0  ;;  %v1648_v56 = vpop.f32.mrb[58].mxu1 }
 0xa46   :  { %v1658_v24 = vadd.f32 %v1603_v14, %v4990_v15  ;;  %v1660_v34 = vadd.f32 %v1654_v5, %v1646_v21  ;;  %v1607_v8 = vadd.f32 %v1606_v33, %v4964_v62  ;;  %v1649_v35 = vadd.f32 %v1648_v56, %v5024_v49  ;;  %v1608_v26 = vpop.f32.mrb[59].mxu0  ;;  %v4035_v36 = vpop.f32.mrb[59].mxu1 }
 0xa47   :  { %v1659_v38 = vadd.f32 %v1605_v10, %v4992_v16  ;;  %v1609_v28 = vadd.f32 %v1608_v26, %v5008_v47  ;;  %v1545_v21 = vpop.permute.xlu0 %1544 }
 0xa48   :  { %v3654_v44 = vmul.f32 -1.442695, %v1660_v34  ;;  %v1661_v32 = vadd.f32 %v1607_v8, %v4994_v18  ;;  %v1663_v48 = vadd.f32 %v1657_v39, %v1649_v35  ;;  %v3652_v56 = vmul.f32 -1.442695, %v1658_v24 }
 0xa49   :  { %v3653_v51 = vmul.f32 -1.442695, %v1659_v38  ;;  %v1662_v54 = vadd.f32 %v1609_v28, %v4997_v20  ;;  %v1543_v20 = vpop.permute.xlu1 %1542 }
 0xa4a   :  { %v3657_v15 = vmul.f32 -1.442695, %v1663_v48  ;;  %4283 = vpow2.f32 %v3654_v44  ;;  %v1548_v5 = vsel %vm1310_vm7, %v1541_v31, %v1543_v20  ;;  %v3655_v34 = vmul.f32 -1.442695, %v1661_v32 }
 0xa4b   :  { %v3656_v55 = vmul.f32 -1.442695, %v1662_v54  ;;  %4285 = vpow2.f32 %v3653_v51  ;;  %v5235_v33 = vsel %vm1535_vm8, %v1548_v5, %v5129_v27 }
 0xa4c   :  { %4287 = vpow2.f32 %v3657_v15 }
 0xa4d   :  { %4289 = vpow2.f32 %v3656_v55  ;;  %v1547_v11 = vpop.permute.xlu1 %1546 }
 0xa4e   :  { %v1549_v25 = vsel %vm1310_vm7, %v1545_v21, %v1547_v11 }
 0xa4f   :  { %v5228_v10 = vsel %vm1535_vm8, %v1549_v25, %v5123_v52 }
 0xa54   :  { %v4284_v60 = vpop.eup %4283 }
 0xa55   :  { %v4286_v58 = vpop.eup %4285  ;;  %v1684_v63 = vadd.f32 1.0, %v4284_v60 }
 0xa56   :  { %v1683_v16 = vadd.f32 1.0, %v4286_v58  ;;  %v4288_v3 = vpop.eup %4287 }
 0xa57   :  { %4291 = vrcp.f32 %v1684_v63  ;;  %v4290_v7 = vpop.eup %4289  ;;  %v1687_v9 = vadd.f32 1.0, %v4288_v3 }
 0xa58   :  { %4293 = vrcp.f32 %v1683_v16  ;;  %v1686_v18 = vadd.f32 1.0, %v4290_v7 }
 0xa59   :  { %4295 = vrcp.f32 %v1687_v9 }
 0xa5a   :  { %4297 = vrcp.f32 %v1686_v18 }
 0xa5b   :  { %4299 = vpow2.f32 %v3652_v56 }
 0xa5c   :  { %4301 = vpow2.f32 %v3655_v34 }
 0xa61   :  { %v4292_v42 = vpop.eup %4291 }
 0xa62   :  { %v5213_v6 = vpop.eup %4293  ;;  %v1701_v4 = vmul.f32 2.0, %v4292_v42 }
 0xa63   :  { %v1700_v41 = vmul.f32 2.0, %v5213_v6  ;;  %v4296_v61 = vpop.eup %4295 }
 0xa64   :  { %v3659_v12 = vadd.f32 -1.0, %v1701_v4  ;;  %v5216_v13 = vpop.eup %4297  ;;  %v1703_v59 = vmul.f32 2.0, %v4296_v61 }
 0xa65   :  { %v3658_v17 = vadd.f32 -1.0, %v1700_v41  ;;  %v1702_v30 = vmul.f32 2.0, %v5216_v13  ;;  %v4300_v8 = vpop.eup %4299 }
 0xa66   :  { %1726 = vrot.lane.b32.xlu1 %v3659_v12, %s4626_s29  ;;  %v3661_v14 = vadd.f32 -1.0, %v1703_v59  ;;  %v1682_v35 = vadd.f32 1.0, %v4300_v8  ;;  %v4302_v26 = vpop.eup %4301  ;;  %v5283_v8 = vld [vmem:[#allocation3 + $0xc8] ss:$12 sps:$4 sm:$0xff]  }
 0xa67   :  { %1724 = vrot.lane.b32.xlu0 %v3658_v17, %s4626_s29  ;;  %v3660_v23 = vadd.f32 -1.0, %v1702_v30  ;;  %v1685_v52 = vadd.f32 1.0, %v4302_v26  ;;  %v5290_v26 = vld [vmem:[#allocation3 + $0xd8] ss:$12 sps:$4 sm:$0xff]  }
 0xa68   :  { %4303 = vrcp.f32 %v1682_v35  ;;  %v5286_v35 = vld [vmem:[#allocation3 + $0xdc] ss:$12 sps:$4 sm:$0xff]  }
 0xa69   :  { %4305 = vrcp.f32 %v1685_v52  ;;  %v5293_v52 = vld [vmem:[#allocation3 + $0xe0] ss:$12 sps:$4 sm:$0xff]  }
 0xa6a   :  { %1730 = vrot.lane.b32.xlu1 %v3661_v14, %s4626_s29 }
 0xa6b   :  { %1728 = vrot.lane.b32.xlu0 %v3660_v23, %s4626_s29 }
 0xa6e   :  { %1712 = vrot.lane.b32.xlu1 %v5228_v10, %s4627_s30 }
 0xa6f   :  { %1710 = vrot.lane.b32.xlu0 %v5235_v33, %s4627_s30 }
 0xa72   :  { %v4304_v39 = vpop.eup %4303 }
 0xa73   :  { %v4306_v24 = vpop.eup %4305 }
 0xad8   :  { %v1727_v36 = vpop.permute.xlu1 %1726 }
 0xad9   :  { %v1725_v38 = vpop.permute.xlu0 %1724 }
 0xada   :  { %v1732_v28 = vsel %vm1256_vm4, %v1725_v38, %v1727_v36 }
 0xadb   :  { %v1736_v27 = vmul.f32 %v4304_v39, %v1732_v28 }
 0xadc   :  { %v1731_v44 = vpop.permute.xlu1 %1730 }
 0xadd   :  { %v1729_v48 = vpop.permute.xlu0 %1728  ;;  %1740 = vrot.lane.b32.xlu0 %v1736_v27, %s4627_s30 }
 0xade   :  { %v1733_v32 = vsel %vm1256_vm4, %v1729_v48, %v1731_v44  ;;  %v1891_v48 = vld [vmem:[#allocation2 + $0xa0] sm:$0xff] }
 0xadf   :  { %v1737_v51 = vmul.f32 %v4306_v24, %v1733_v32 }
 0xae0   :  { %v1713_v60 = vpop.permute.xlu1 %1712 }
 0xae1   :  { %1742 = vrot.lane.b32.xlu1 %v1737_v51, %s4627_s30  ;;  %v1711_v54 = vpop.permute.xlu0 %1710  ;;  %v1718_v3 = vmul.f32 %v4306_v24, %v1713_v60  ;;  %v1719_v7 = vmul.f32 %v5216_v13, %v1713_v60  ;;  %v1890_v60 = vld [vmem:[#allocation2 + $0x98] sm:$0xff] }
 0xae2   :  { %v1716_v15 = vmul.f32 %v4304_v39, %v1711_v54  ;;  %v1717_v55 = vmul.f32 %v5213_v6, %v1711_v54  ;;  %v4583_v54 = vld [vmem:[#allocation2 + $0x90] sm:$0xff] }
 0xb4f   :  { %v1741_v58 = vpop.permute.xlu0 %1740 }
 0xb50   :  { %v1746_v63 = vadd.f32 %v1741_v58, %v1716_v15  ;;  %v1747_v16 = vadd.f32 %v1741_v58, %v1717_v55 }
 0xb52   :  { %4307 = vtanh.f32 %v1746_v63 }
 0xb53   :  { %4309 = vtanh.f32 %v1747_v16  ;;  %v1743_v9 = vpop.permute.xlu1 %1742 }
 0xb54   :  { %v1748_v18 = vadd.f32 %v1743_v9, %v1718_v3  ;;  %v1749_v42 = vadd.f32 %v1743_v9, %v1719_v7  ;;  %v1894_v7 = vld [vmem:[#allocation2 + $0xb8] sm:$0xff] }
 0xb56   :  { %4311 = vtanh.f32 %v1748_v18 }
 0xb57   :  { %4313 = vtanh.f32 %v1749_v42 }
 0xb5c   :  { %v4308_v20 = vpop.eup %4307 }
 0xb5d   :  { %v4310_v4 = vpop.eup %4309  ;;  %1758 = vrot.lane.b32.xlu0 %v4308_v20, %s4627_s30  ;;  %v1893_v20 = vld [vmem:[#allocation2 + $0xb0] sm:$0xff] }
 0xb5e   :  { %1760 = vrot.lane.b32.xlu1 %v4310_v4, %s4627_s30 }
 0xb60   :  { %v4312_v31 = vpop.eup %4311 }
 0xb61   :  { %v4314_v41 = vpop.eup %4313  ;;  %1762 = vrot.lane.b32.xlu0 %v4312_v31, %s4627_s30 }
 0xb62   :  { %1764 = vrot.lane.b32.xlu1 %v4314_v41, %s4627_s30 }
 0xb66   :  { %1777 = vrot.lane.b32.xlu1 %v1746_v63, %s4628_s5 }
 0xb6a   :  { %1781 = vrot.lane.b32.xlu1 %v1748_v18, %s4628_s5 }
 0xbcf   :  { %v1759_v61 = vpop.permute.xlu0 %1758 }
 0xbd0   :  { %v1761_v12 = vpop.permute.xlu1 %1760 }
 0xbd1   :  { %v1766_v17 = vsel %vm1086_vm5, %v1759_v61, %v1761_v12 }
 0xbd2   :  { %v1770_v14 = vmul.f32 %v5213_v6, %v1766_v17 }
 0xbd3   :  { %v1763_v59 = vpop.permute.xlu0 %1762 }
 0xbd4   :  { %v1765_v30 = vpop.permute.xlu1 %1764 }
 0xbd5   :  { %v1767_v11 = vsel %vm1086_vm5, %v1763_v59, %v1765_v30 }
 0xbd6   :  { %v1771_v21 = vmul.f32 %v5216_v13, %v1767_v11 }
 0xbd8   :  { %v4172_v23 = vpack.i.bf16 %v1771_v21, %v1770_v14 }
 0xbda   :  { %4173 = vrot.lane.b32.xlu0 %v4172_v23, %s4629_s6 }
 0xbde   :  { %1779 = vrot.lane.b32.xlu0 %v1747_v16, %s4628_s5 }
 0xbe2   :  { %1783 = vrot.lane.b32.xlu0 %v1749_v42, %s4628_s5 }
 0xc4c   :  { %v4174_v25 = vpop.permute.xlu0 %4173 }
 0xc4d   :  { %v4176_v5 = vunpack.i.h.bf16 %v4174_v25  ;;  %v4175_v56 = vunpack.i.l.bf16 %v4174_v25 }
 0xc4f   :  { %v1800_v34 = vsel %vm1772_vm9, %v4176_v5, %v5156_v19  ;;  %v1799_v6 = vsel %vm1772_vm9, %v4175_v56, %v5161_v45  ;;  %v5276_v19 = vld [vmem:[#allocation3 + $0xc4] ss:$12 sps:$4 sm:$0xff]   ;;  %v5280_v45 = vld [vmem:[#allocation3 + $0xc0] ss:$12 sps:$4 sm:$0xff]  }
 0xc50   :  { %v1801_v13 = vpack.c.bf16 %v1800_v34, %v1799_v6  ;;  %v1780_v5 = vpop.permute.xlu0 %1779  ;;  %v1778_v6 = vpop.permute.xlu1 %1777 }
 0xc52   :  { %3663 = vmatmul.mubr.msk.bf16.vlgmr.msra.gmra.mrb[60].mxu0 %vm1086_vm5, %v1801_v13  ;;  %4047 = vmatmul.mubr.msk.bf16.vlgmr.msra.gmra.mrb[60].mxu1 %vm1086_vm5, %v1801_v13 }
 0xc53   :  { %2043 = vmatpush1.bf16.msra.mxu0 %v5167_v1  ;;  %4051 = vmatpush3.bf16.msra.mxu1 %v5170_v22 }
 0xc54   :  { %2044 = vmatprep.subr.bf16.mxu0 %v5173_v50  ;;  %4052 = vmatprep.subr.bf16.mxu1 %v4624_v40 }
 0xc55   :  { %2074 = vmatprep.mubr.bf16.mxu0 %v4623_v0  ;;  %4060 = vmatprep.mubr.msk.bf16.mxu1 %vm4625_vm2, %v4624_v40 }
 0xc57   :  { %2045 = vmatpush1.bf16.msra.mxu0 %v5180_v57  ;;  %4053 = vmatpush3.bf16.msra.mxu1 %v5183_v2 }
 0xc58   :  { %2046 = vmatprep.subr.bf16.mxu0 %v5276_v19  ;;  %4054 = vmatprep.subr.bf16.mxu1 %v4624_v40 }
 0xc5b   :  { %2047 = vmatpush1.bf16.msra.mxu0 %v5280_v45  ;;  %4055 = vmatpush3.bf16.msra.mxu1 %v5283_v8 }
 0xc5c   :  { %2048 = vmatprep.subr.bf16.mxu0 %v5286_v35  ;;  %4056 = vmatprep.subr.bf16.mxu1 %v4624_v40 }
 0xc5f   :  { %2049 = vmatpush1.bf16.msra.mxu0 %v5290_v26  ;;  %4057 = vmatpush3.bf16.msra.mxu1 %v5293_v52 }
 0xc60   :  { %3675 = vmatprep.subr.msk.bf16.mxu0 %vm1090_vm1, %v4888_v37  ;;  %4058 = vmatprep.subr.bf16.mxu1 %v4624_v40 }
 0xc63   :  { %2051 = vmatpush1.bf16.msra.mxu0 %v4901_v46  ;;  %4059 = vmatpush3.bf16.msra.mxu1 %v4895_v43 }
 0xc64   :  { %2265 = vmatprep.subr.bf16.mxu0 %v5199_v29  ;;  %4064 = vmatprep.subr.bf16.mxu1 %v4624_v40 }
 0xd25   :  { %v1839_v36 = vpop.f32.mrb[60].mxu0  ;;  %v1882_v38 = vpop.f32.mrb[60].mxu1 }
 0xd26   :  { %v1840_v39 = vadd.f32 %v1839_v36, %v4964_v62  ;;  %v1883_v28 = vadd.f32 %v1882_v38, %v5024_v49  ;;  %v1841_v27 = vpop.f32.mrb[61].mxu0  ;;  %v4048_v44 = vpop.f32.mrb[61].mxu1 }
 0xd27   :  { %v1842_v24 = vadd.f32 %v1841_v27, %v5008_v47  ;;  %v1843_v32 = vpop.f32.mrb[62].mxu0  ;;  %v1885_v51 = vpop.f32.mrb[62].mxu1 }
 0xd28   :  { %v1895_v15 = vadd.f32 %v4583_v54, %v1840_v39  ;;  %v1897_v55 = vadd.f32 %v1891_v48, %v1883_v28  ;;  %v1886_v58 = vadd.f32 %v1885_v51, %v5024_v49  ;;  %v1845_v63 = vpop.f32.mrb[63].mxu0  ;;  %v4049_v16 = vpop.f32.mrb[63].mxu1 }
 0xd29   :  { %v1896_v3 = vadd.f32 %v1890_v60, %v1842_v24  ;;  %v1846_v9 = vadd.f32 %v1845_v63, %v5008_v47  ;;  %v1784_v48 = vpop.permute.xlu0 %1783  ;;  %v1782_v51 = vpop.permute.xlu1 %1781  ;;  %v1785_v60 = vsel %vm1310_vm7, %v1778_v6, %v1780_v5  ;;  %v1844_v16 = vadd.f32 %v1843_v32, %v4964_v62 }
 0xd2a   :  { %v3667_v18 = vmul.f32 -1.442695, %v1897_v55  ;;  %v1900_v42 = vadd.f32 %v1894_v7, %v1886_v58  ;;  %v1786_v55 = vsel %vm1310_vm7, %v1782_v51, %v1784_v48  ;;  %v1789_v63 = vsel %vm1772_vm9, %v1785_v60, %v5235_v33 }
 0xd2b   :  { %v3666_v4 = vmul.f32 -1.442695, %v1896_v3  ;;  %v1899_v31 = vadd.f32 %v1893_v20, %v1846_v9  ;;  %v1790_v58 = vsel %vm1772_vm9, %v1786_v55, %v5228_v10  ;;  %v1892_v3 = vld [vmem:[#allocation2 + $0xa8] sm:$0xff]  ;;  %v3665_v7 = vmul.f32 -1.442695, %v1895_v15 }
 0xd2c   :  { %v3670_v41 = vmul.f32 -1.442695, %v1900_v42  ;;  %4315 = vpow2.f32 %v3667_v18  ;;  %v1898_v9 = vadd.f32 %v1892_v3, %v1844_v16 }
 0xd2d   :  { %v3669_v61 = vmul.f32 -1.442695, %v1899_v31  ;;  %4317 = vpow2.f32 %v3666_v4 }
 0xd2e   :  { %4319 = vpow2.f32 %v3670_v41  ;;  %v3668_v18 = vmul.f32 -1.442695, %v1898_v9 }
 0xd2f   :  { %4321 = vpow2.f32 %v3669_v61 }
 0xd36   :  { %v4316_v12 = vpop.eup %4315 }
 0xd37   :  { %v4318_v17 = vpop.eup %4317  ;;  %v1921_v59 = vadd.f32 1.0, %v4316_v12 }
 0xd38   :  { %v1920_v30 = vadd.f32 1.0, %v4318_v17  ;;  %v4320_v11 = vpop.eup %4319 }
 0xd39   :  { %4323 = vrcp.f32 %v1921_v59  ;;  %v4322_v14 = vpop.eup %4321  ;;  %v1924_v21 = vadd.f32 1.0, %v4320_v11 }
 0xd3a   :  { %4325 = vrcp.f32 %v1920_v30  ;;  %v1923_v23 = vadd.f32 1.0, %v4322_v14 }
 0xd3b   :  { %4327 = vrcp.f32 %v1924_v21 }
 0xd3c   :  { %4329 = vrcp.f32 %v1923_v23 }
 0xd3d   :  { %4331 = vpow2.f32 %v3665_v7 }
 0xd3e   :  { %4333 = vpow2.f32 %v3668_v18 }
 0xd43   :  { %v4324_v25 = vpop.eup %4323 }
 0xd44   :  { %v5308_v56 = vpop.eup %4325  ;;  %v1938_v34 = vmul.f32 2.0, %v4324_v25 }
 0xd45   :  { %v1937_v13 = vmul.f32 2.0, %v5308_v56  ;;  %v4328_v36 = vpop.eup %4327 }
 0xd46   :  { %v3672_v38 = vadd.f32 -1.0, %v1938_v34  ;;  %v5311_v39 = vpop.eup %4329  ;;  %v1940_v27 = vmul.f32 2.0, %v4328_v36 }
 0xd47   :  { %v3671_v28 = vadd.f32 -1.0, %v1937_v13  ;;  %v1939_v44 = vmul.f32 2.0, %v5311_v39  ;;  %v4332_v42 = vpop.eup %4331 }
 0xd48   :  { %1963 = vrot.lane.b32.xlu0 %v3672_v38, %s4626_s29  ;;  %v3674_v24 = vadd.f32 -1.0, %v1940_v27  ;;  %v1919_v20 = vadd.f32 1.0, %v4332_v42  ;;  %v4334_v4 = vpop.eup %4333 }
 0xd49   :  { %1961 = vrot.lane.b32.xlu1 %v3671_v28, %s4626_s29  ;;  %v3673_v54 = vadd.f32 -1.0, %v1939_v44  ;;  %v1922_v10 = vadd.f32 1.0, %v4334_v4 }
 0xd4a   :  { %4335 = vrcp.f32 %v1919_v20  ;;  %v2128_v20 = vld [vmem:[#allocation2 + $0xd0] sm:$0xff] }
 0xd4b   :  { %4337 = vrcp.f32 %v1922_v10 }
 0xd4c   :  { %1967 = vrot.lane.b32.xlu0 %v3674_v24, %s4626_s29 }
 0xd4d   :  { %1965 = vrot.lane.b32.xlu1 %v3673_v54, %s4626_s29 }
 0xd50   :  { %1949 = vrot.lane.b32.xlu0 %v1790_v58, %s4627_s30 }
 0xd51   :  { %1947 = vrot.lane.b32.xlu1 %v1789_v63, %s4627_s30 }
 0xd54   :  { %v4336_v53 = vpop.eup %4335 }
 0xd55   :  { %v4338_v15 = vpop.eup %4337 }
 0xdba   :  { %v1964_v31 = vpop.permute.xlu0 %1963 }
 0xdbb   :  { %v1962_v41 = vpop.permute.xlu1 %1961 }
 0xdbc   :  { %v1969_v33 = vsel %vm1256_vm4, %v1962_v41, %v1964_v31 }
 0xdbd   :  { %v1973_v61 = vmul.f32 %v4336_v53, %v1969_v33 }
 0xdbe   :  { %v1968_v12 = vpop.permute.xlu0 %1967 }
 0xdbf   :  { %v1966_v32 = vpop.permute.xlu1 %1965  ;;  %1977 = vrot.lane.b32.xlu1 %v1973_v61, %s4627_s30 }
 0xdc0   :  { %v1970_v17 = vsel %vm1256_vm4, %v1966_v32, %v1968_v12 }
 0xdc1   :  { %v1974_v59 = vmul.f32 %v4338_v15, %v1970_v17 }
 0xdc2   :  { %v1950_v21 = vpop.permute.xlu0 %1949 }
 0xdc3   :  { %1979 = vrot.lane.b32.xlu0 %v1974_v59, %s4627_s30  ;;  %v1948_v30 = vpop.permute.xlu1 %1947  ;;  %v1955_v34 = vmul.f32 %v4338_v15, %v1950_v21  ;;  %v1956_v6 = vmul.f32 %v5311_v39, %v1950_v21  ;;  %v2131_v15 = vld [vmem:[#allocation2 + $0xe8] sm:$0xff] }
 0xdc4   :  { %v1953_v11 = vmul.f32 %v4336_v53, %v1948_v30  ;;  %v1954_v14 = vmul.f32 %v5308_v56, %v1948_v30  ;;  %v2127_v53 = vld [vmem:[#allocation2 + $0xc8] sm:$0xff] }
 0xe31   :  { %v1978_v23 = vpop.permute.xlu1 %1977 }
 0xe32   :  { %v5334_v25 = vadd.f32 %v1978_v23, %v1953_v11  ;;  %v5336_v5 = vadd.f32 %v1978_v23, %v1954_v14  ;;  %v2130_v11 = vld [vmem:[#allocation2 + $0xe0] sm:$0xff] }
 0xe34   :  { %4339 = vtanh.f32 %v5334_v25 }
 0xe35   :  { %4341 = vtanh.f32 %v5336_v5  ;;  %v1980_v13 = vpop.permute.xlu0 %1979 }
 0xe36   :  { %v5341_v36 = vadd.f32 %v1980_v13, %v1955_v34  ;;  %v5343_v38 = vadd.f32 %v1980_v13, %v1956_v6 }
 0xe38   :  { %4343 = vtanh.f32 %v5341_v36 }
 0xe39   :  { %4345 = vtanh.f32 %v5343_v38 }
 0xe3e   :  { %v4340_v28 = vpop.eup %4339 }
 0xe3f   :  { %v4342_v27 = vpop.eup %4341  ;;  %1995 = vrot.lane.b32.xlu1 %v4340_v28, %s4627_s30 }
 0xe40   :  { %1997 = vrot.lane.b32.xlu0 %v4342_v27, %s4627_s30 }
 0xe42   :  { %v4344_v44 = vpop.eup %4343 }
 0xe43   :  { %v4346_v48 = vpop.eup %4345  ;;  %1999 = vrot.lane.b32.xlu1 %v4344_v44, %s4627_s30 }
 0xe44   :  { %2001 = vrot.lane.b32.xlu0 %v4346_v48, %s4627_s30 }
 0xeb1   :  { %v1996_v24 = vpop.permute.xlu1 %1995 }
 0xeb2   :  { %v1998_v51 = vpop.permute.xlu0 %1997 }
 0xeb3   :  { %v2003_v54 = vsel %vm1086_vm5, %v1996_v24, %v1998_v51 }
 0xeb4   :  { %v5354_v63 = vmul.f32 %v5308_v56, %v2003_v54 }
 0xeb5   :  { %v2000_v55 = vpop.permute.xlu1 %1999 }
 0xeb6   :  { %v2002_v60 = vpop.permute.xlu0 %2001 }
 0xeb7   :  { %v2004_v58 = vsel %vm1086_vm5, %v2000_v55, %v2002_v60 }
 0xeb8   :  { %v5357_v16 = vmul.f32 %v5311_v39, %v2004_v58 }
 0xeba   :  { %v2035_v3 = vpack.c.bf16 %v5357_v16, %v5354_v63 }
 0xebc   :  { %2037 = vrot.lane.b32.xlu1 %v2035_v3, %s4629_s6 }
 0xf2e   :  { %v2038_v7 = vpop.permute.xlu1 %2037 }
 0xf2f   :  { %3676 = vmatmul.mubr.msk.bf16.vlgmr.msra.gmra.mrb[64].mxu0 %vm1086_vm5, %v2038_v7  ;;  %4061 = vmatmul.mubr.msk.bf16.vlgmr.msra.gmra.mrb[64].mxu1 %vm1086_vm5, %v2038_v7 }
 0xf30   :  { %2266 = vmatpush1.bf16.msra.mxu0 %v5167_v1  ;;  %4065 = vmatpush3.bf16.msra.mxu1 %v5170_v22 }
 0xf31   :  { %2267 = vmatprep.subr.bf16.mxu0 %v5173_v50  ;;  %4066 = vmatprep.subr.bf16.mxu1 %v4624_v40 }
 0xf32   :  { %2297 = vmatprep.mubr.bf16.mxu0 %v4623_v0  ;;  %4074 = vmatprep.mubr.msk.bf16.mxu1 %vm4625_vm2, %v4624_v40 }
 0xf34   :  { %2268 = vmatpush1.bf16.msra.mxu0 %v5180_v57  ;;  %4067 = vmatpush3.bf16.msra.mxu1 %v5183_v2 }
 0xf35   :  { %2269 = vmatprep.subr.bf16.mxu0 %v5276_v19  ;;  %4068 = vmatprep.subr.bf16.mxu1 %v4624_v40 }
 0xf38   :  { %2270 = vmatpush1.bf16.msra.mxu0 %v5280_v45  ;;  %4069 = vmatpush3.bf16.msra.mxu1 %v5283_v8 }
 0xf39   :  { %2271 = vmatprep.subr.bf16.mxu0 %v5286_v35  ;;  %4070 = vmatprep.subr.bf16.mxu1 %v4624_v40 }
 0xf3c   :  { %2272 = vmatpush1.bf16.msra.mxu0 %v5290_v26  ;;  %4071 = vmatpush3.bf16.msra.mxu1 %v5293_v52 }
 0xf3d   :  { %3688 = vmatprep.subr.msk.bf16.mxu0 %vm1090_vm1, %v4888_v37  ;;  %4072 = vmatprep.subr.bf16.mxu1 %v4624_v40 }
 0xf40   :  { %2274 = vmatpush1.bf16.msra.mxu0 %v4901_v46  ;;  %4073 = vmatpush3.bf16.msra.mxu1 %v4895_v43 }
 0xf41   :  { %2488 = vmatprep.subr.bf16.mxu0 %v5199_v29  ;;  %4078 = vmatprep.subr.bf16.mxu1 %v4624_v40 }
0x1002   :  { %v2076_v56 = vpop.f32.mrb[64].mxu0  ;;  %v2119_v39 = vpop.f32.mrb[64].mxu1 }
0x1003   :  { %v2120_v9 = vadd.f32 %v2119_v39, %v5024_v49  ;;  %v2078_v18 = vpop.f32.mrb[65].mxu0  ;;  %v4062_v42 = vpop.f32.mrb[65].mxu1 }
0x1004   :  { %v2079_v4 = vadd.f32 %v2078_v18, %v5008_v47  ;;  %v2080_v10 = vpop.f32.mrb[66].mxu0  ;;  %v2122_v31 = vpop.f32.mrb[66].mxu1 }
0x1005   :  { %v2134_v41 = vadd.f32 %v2128_v20, %v2120_v9  ;;  %v2123_v33 = vadd.f32 %v2122_v31, %v5024_v49  ;;  %v2082_v61 = vpop.f32.mrb[67].mxu0  ;;  %v4063_v12 = vpop.f32.mrb[67].mxu1  ;;  %v2077_v31 = vadd.f32 %v2076_v56, %v4964_v62 }
0x1006   :  { %v2133_v32 = vadd.f32 %v2127_v53, %v2079_v4  ;;  %v2083_v17 = vadd.f32 %v2082_v61, %v5008_v47  ;;  %v2129_v61 = vld [vmem:[#allocation2 + $0xd8] sm:$0xff] }
0x1007   :  { %v3680_v59 = vmul.f32 -1.442695, %v2134_v41  ;;  %v2137_v30 = vadd.f32 %v2131_v15, %v2123_v33  ;;  %v2126_v41 = vld [vmem:[#allocation2 + $0xc0] sm:$0xff]  ;;  %v2081_v33 = vadd.f32 %v2080_v10, %v4964_v62 }
0x1008   :  { %v3679_v14 = vmul.f32 -1.442695, %v2133_v32  ;;  %v2136_v21 = vadd.f32 %v2130_v11, %v2083_v17  ;;  %v2132_v53 = vadd.f32 %v2126_v41, %v2077_v31 }
0x1009   :  { %v3683_v23 = vmul.f32 -1.442695, %v2137_v30  ;;  %4347 = vpow2.f32 %v3680_v59  ;;  %v2135_v32 = vadd.f32 %v2129_v61, %v2081_v33 }
0x100a   :  { %v3682_v34 = vmul.f32 -1.442695, %v2136_v21  ;;  %4349 = vpow2.f32 %v3679_v14  ;;  %v3678_v12 = vmul.f32 -1.442695, %v2132_v53 }
0x100b   :  { %4351 = vpow2.f32 %v3683_v23  ;;  %v3681_v15 = vmul.f32 -1.442695, %v2135_v32 }
0x100c   :  { %4353 = vpow2.f32 %v3682_v34 }
0x1013   :  { %v4348_v6 = vpop.eup %4347 }
0x1014   :  { %v4350_v13 = vpop.eup %4349  ;;  %v2158_v28 = vadd.f32 1.0, %v4348_v6 }
0x1015   :  { %v2157_v27 = vadd.f32 1.0, %v4350_v13  ;;  %v4352_v44 = vpop.eup %4351 }
0x1016   :  { %4355 = vrcp.f32 %v2158_v28  ;;  %v4354_v48 = vpop.eup %4353  ;;  %v2161_v24 = vadd.f32 1.0, %v4352_v44 }
0x1017   :  { %4357 = vrcp.f32 %v2157_v27  ;;  %v2160_v51 = vadd.f32 1.0, %v4354_v48 }
0x1018   :  { %4359 = vrcp.f32 %v2161_v24 }
0x1019   :  { %4361 = vrcp.f32 %v2160_v51 }
0x101a   :  { %4363 = vpow2.f32 %v3678_v12 }
0x101b   :  { %4365 = vpow2.f32 %v3681_v15 }
0x1020   :  { %v4356_v54 = vpop.eup %4355 }
0x1021   :  { %v5392_v55 = vpop.eup %4357  ;;  %v2175_v60 = vmul.f32 2.0, %v4356_v54 }
0x1022   :  { %v2174_v58 = vmul.f32 2.0, %v5392_v55  ;;  %v4360_v3 = vpop.eup %4359  ;;  %v2183_v48 = vmul.f32 %v5392_v55, %v5336_v5 }
0x1023   :  { %v3685_v7 = vadd.f32 -1.0, %v2175_v60  ;;  %v5395_v39 = vpop.eup %4361  ;;  %v2177_v18 = vmul.f32 2.0, %v4360_v3 }
0x1024   :  { %v3684_v9 = vadd.f32 -1.0, %v2174_v58  ;;  %v2176_v42 = vmul.f32 2.0, %v5395_v39  ;;  %v4364_v17 = vpop.eup %4363  ;;  %v2185_v58 = vmul.f32 %v5395_v39, %v5343_v38 }
0x1025   :  { %2192 = vrot.lane.b32.xlu1 %v3685_v7, %s4626_s29  ;;  %v3687_v20 = vadd.f32 -1.0, %v2177_v18  ;;  %v2156_v59 = vadd.f32 1.0, %v4364_v17  ;;  %v4366_v30 = vpop.eup %4365 }
0x1026   :  { %2190 = vrot.lane.b32.xlu0 %v3684_v9, %s4626_s29  ;;  %v3686_v4 = vadd.f32 -1.0, %v2176_v42  ;;  %v2159_v11 = vadd.f32 1.0, %v4366_v30 }
0x1027   :  { %4367 = vrcp.f32 %v2156_v59  ;;  %v2350_v59 = vld [vmem:[#allocation2 + $0xf8] sm:$0xff] }
0x1028   :  { %4369 = vrcp.f32 %v2159_v11 }
0x1029   :  { %2196 = vrot.lane.b32.xlu1 %v3687_v20, %s4626_s29 }
0x102a   :  { %2194 = vrot.lane.b32.xlu0 %v3686_v4, %s4626_s29 }
0x1031   :  { %v4368_v23 = vpop.eup %4367 }
0x1032   :  { %v4370_v13 = vpop.eup %4369  ;;  %v2182_v44 = vmul.f32 %v4368_v23, %v5334_v25 }
0x1033   :  { %v2184_v60 = vmul.f32 %v4370_v13, %v5341_v36 }
0x1097   :  { %v2193_v14 = vpop.permute.xlu1 %2192 }
0x1098   :  { %v2191_v21 = vpop.permute.xlu0 %2190 }
0x1099   :  { %v2198_v56 = vsel %vm1256_vm4, %v2191_v21, %v2193_v14  ;;  %v2354_v21 = vld [vmem:[#allocation2 + $0x118] sm:$0xff] }
0x109a   :  { %v2202_v34 = vmul.f32 %v4368_v23, %v2198_v56 }
0x109b   :  { %v2197_v6 = vpop.permute.xlu1 %2196 }
0x109c   :  { %v2195_v10 = vpop.permute.xlu0 %2194  ;;  %2206 = vrot.lane.b32.xlu0 %v2202_v34, %s4627_s30 }
0x109d   :  { %v2199_v28 = vsel %vm1256_vm4, %v2195_v10, %v2197_v6  ;;  %v2353_v6 = vld [vmem:[#allocation2 + $0x110] sm:$0xff] }
0x109e   :  { %v2203_v27 = vmul.f32 %v4370_v13, %v2199_v28 }
0x10a0   :  { %2208 = vrot.lane.b32.xlu1 %v2203_v27, %s4627_s30 }
0x110e   :  { %v2207_v24 = vpop.permute.xlu0 %2206 }
0x110f   :  { %v5411_v51 = vadd.f32 %v2207_v24, %v2182_v44  ;;  %v5413_v54 = vadd.f32 %v2207_v24, %v2183_v48 }
0x1111   :  { %4371 = vtanh.f32 %v5411_v51 }
0x1112   :  { %4373 = vtanh.f32 %v5413_v54  ;;  %v2209_v3 = vpop.permute.xlu1 %2208 }
0x1113   :  { %v5420_v7 = vadd.f32 %v2209_v3, %v2184_v60  ;;  %v5422_v25 = vadd.f32 %v2209_v3, %v2185_v58 }
0x1115   :  { %4375 = vtanh.f32 %v5420_v7 }
0x1116   :  { %4377 = vtanh.f32 %v5422_v25 }
0x111b   :  { %v4372_v5 = vpop.eup %4371 }
0x111c   :  { %v4374_v9 = vpop.eup %4373  ;;  %2224 = vrot.lane.b32.xlu0 %v4372_v5, %s4627_s30 }
0x111d   :  { %2226 = vrot.lane.b32.xlu1 %v4374_v9, %s4627_s30 }
0x111f   :  { %v4376_v36 = vpop.eup %4375 }
0x1120   :  { %v4378_v18 = vpop.eup %4377  ;;  %2228 = vrot.lane.b32.xlu0 %v4376_v36, %s4627_s30 }
0x1121   :  { %2230 = vrot.lane.b32.xlu1 %v4378_v18, %s4627_s30 }
0x118e   :  { %v2225_v38 = vpop.permute.xlu0 %2224 }
0x118f   :  { %v2227_v42 = vpop.permute.xlu1 %2226 }
0x1190   :  { %v2232_v20 = vsel %vm1086_vm5, %v2225_v38, %v2227_v42 }
0x1191   :  { %v5433_v53 = vmul.f32 %v5392_v55, %v2232_v20  ;;  %v2351_v55 = vld [vmem:[#allocation2 + $0x100] sm:$0xff] }
0x1192   :  { %v2229_v4 = vpop.permute.xlu0 %2228 }
0x1193   :  { %v2231_v31 = vpop.permute.xlu1 %2230 }
0x1194   :  { %v2233_v41 = vsel %vm1086_vm5, %v2229_v4, %v2231_v31 }
0x1195   :  { %v5436_v33 = vmul.f32 %v5395_v39, %v2233_v41 }
0x1197   :  { %v2258_v61 = vpack.c.bf16 %v5436_v33, %v5433_v53 }
0x1199   :  { %2260 = vrot.lane.b32.xlu0 %v2258_v61, %s4629_s6 }
0x120b   :  { %v2261_v12 = vpop.permute.xlu0 %2260 }
0x120c   :  { %3689 = vmatmul.mubr.msk.bf16.vlgmr.msra.gmra.mrb[68].mxu0 %vm1086_vm5, %v2261_v12  ;;  %4075 = vmatmul.mubr.msk.bf16.vlgmr.msra.gmra.mrb[68].mxu1 %vm1086_vm5, %v2261_v12 }
0x120d   :  { %2489 = vmatpush1.bf16.msra.mxu0 %v5167_v1  ;;  %4079 = vmatpush3.bf16.msra.mxu1 %v5170_v22 }
0x120e   :  { %2490 = vmatprep.subr.bf16.mxu0 %v5173_v50  ;;  %4080 = vmatprep.subr.bf16.mxu1 %v4624_v40 }
0x120f   :  { %2520 = vmatprep.mubr.bf16.mxu0 %v4623_v0  ;;  %4088 = vmatprep.mubr.msk.bf16.mxu1 %vm4625_vm2, %v4624_v40 }
0x1211   :  { %2491 = vmatpush1.bf16.msra.mxu0 %v5180_v57  ;;  %4081 = vmatpush3.bf16.msra.mxu1 %v5183_v2 }
0x1212   :  { %2492 = vmatprep.subr.bf16.mxu0 %v5276_v19  ;;  %4082 = vmatprep.subr.bf16.mxu1 %v4624_v40 }
0x1215   :  { %2493 = vmatpush1.bf16.msra.mxu0 %v5280_v45  ;;  %4083 = vmatpush3.bf16.msra.mxu1 %v5283_v8 }
0x1216   :  { %2494 = vmatprep.subr.bf16.mxu0 %v5286_v35  ;;  %4084 = vmatprep.subr.bf16.mxu1 %v4624_v40 }
0x1219   :  { %2495 = vmatpush1.bf16.msra.mxu0 %v5290_v26  ;;  %4085 = vmatpush3.bf16.msra.mxu1 %v5293_v52 }
0x121a   :  { %3701 = vmatprep.subr.msk.bf16.mxu0 %vm1090_vm1, %v4888_v37  ;;  %4086 = vmatprep.subr.bf16.mxu1 %v4624_v40 }
0x121d   :  { %2497 = vmatpush1.bf16.msra.mxu0 %v4901_v46  ;;  %4087 = vmatpush3.bf16.msra.mxu1 %v4895_v43 }
0x121e   :  { %2711 = vmatprep.subr.bf16.mxu0 %v5199_v29  ;;  %4092 = vmatprep.subr.bf16.mxu1 %v4624_v40 }
0x12df   :  { %v2299_v1 = vpop.f32.mrb[68].mxu0  ;;  %v2342_v22 = vpop.f32.mrb[68].mxu1 }
0x12e0   :  { %v2343_v50 = vadd.f32 %v2342_v22, %v5024_v49  ;;  %v2301_v57 = vpop.f32.mrb[69].mxu0  ;;  %v4076_v2 = vpop.f32.mrb[69].mxu1 }
0x12e1   :  { %v2302_v39 = vadd.f32 %v2301_v57, %v5008_v47  ;;  %v2303_v32 = vpop.f32.mrb[70].mxu0  ;;  %v2345_v15 = vpop.f32.mrb[70].mxu1  ;;  %v2300_v57 = vadd.f32 %v2299_v1, %v4964_v62  ;;  %v2349_v2 = vld [vmem:[#allocation2 + $0xf0] sm:$0xff] }
0x12e2   :  { %v2357_v17 = vadd.f32 %v2351_v55, %v2343_v50  ;;  %v2346_v30 = vadd.f32 %v2345_v15, %v5024_v49  ;;  %v2305_v11 = vpop.f32.mrb[71].mxu0  ;;  %v4077_v14 = vpop.f32.mrb[71].mxu1  ;;  %v2352_v15 = vld [vmem:[#allocation2 + $0x108] sm:$0xff] }
0x12e3   :  { %v2356_v29 = vadd.f32 %v2350_v59, %v2302_v39  ;;  %v2306_v23 = vadd.f32 %v2305_v11, %v5008_v47  ;;  %v2355_v55 = vadd.f32 %v2349_v2, %v2300_v57  ;;  %v2304_v39 = vadd.f32 %v2303_v32, %v4964_v62 }
0x12e4   :  { %v3693_v56 = vmul.f32 -1.442695, %v2357_v17  ;;  %v2360_v34 = vadd.f32 %v2354_v21, %v2346_v30 }
0x12e5   :  { %v3692_v10 = vmul.f32 -1.442695, %v2356_v29  ;;  %v2359_v13 = vadd.f32 %v2353_v6, %v2306_v23  ;;  %v3691_v17 = vmul.f32 -1.442695, %v2355_v55  ;;  %v2358_v59 = vadd.f32 %v2352_v15, %v2304_v39  ;;  %v5522_v55 = vld [vmem:[#allocation3 + $0x90] ss:$12 sps:$4 sm:$0xff]  }
0x12e6   :  { %v3696_v28 = vmul.f32 -1.442695, %v2360_v34  ;;  %4379 = vpow2.f32 %v3693_v56  ;;  %v5525_v39 = vld [vmem:[#allocation3 + $0x98] ss:$12 sps:$4 sm:$0xff]   ;;  %v5538_v15 = vld [vmem:[#allocation3 + $0xb0] ss:$12 sps:$4 sm:$0xff]  }
0x12e7   :  { %v3695_v27 = vmul.f32 -1.442695, %v2359_v13  ;;  %4381 = vpow2.f32 %v3692_v10  ;;  %v3694_v30 = vmul.f32 -1.442695, %v2358_v59 }
0x12e8   :  { %4383 = vpow2.f32 %v3696_v28 }
0x12e9   :  { %4385 = vpow2.f32 %v3695_v27 }
0x12f0   :  { %v4380_v44 = vpop.eup %4379 }
0x12f1   :  { %v4382_v48 = vpop.eup %4381  ;;  %v2381_v24 = vadd.f32 1.0, %v4380_v44 }
0x12f2   :  { %v2380_v60 = vadd.f32 1.0, %v4382_v48  ;;  %v4384_v58 = vpop.eup %4383 }
0x12f3   :  { %4387 = vrcp.f32 %v2381_v24  ;;  %v4386_v3 = vpop.eup %4385  ;;  %v2384_v5 = vadd.f32 1.0, %v4384_v58 }
0x12f4   :  { %4389 = vrcp.f32 %v2380_v60  ;;  %v2383_v9 = vadd.f32 1.0, %v4386_v3 }
0x12f5   :  { %4391 = vrcp.f32 %v2384_v5 }
0x12f6   :  { %4393 = vrcp.f32 %v2383_v9 }
0x12f7   :  { %4395 = vpow2.f32 %v3691_v17  ;;  %v2574_v17 = vld [vmem:[#allocation2 + $0x130] sm:$0xff] }
0x12f8   :  { %4397 = vpow2.f32 %v3694_v30 }
0x12fd   :  { %v4388_v36 = vpop.eup %4387 }
0x12fe   :  { %v5471_v18 = vpop.eup %4389  ;;  %v2398_v38 = vmul.f32 2.0, %v4388_v36 }
0x12ff   :  { %v2397_v42 = vmul.f32 2.0, %v5471_v18  ;;  %v4392_v20 = vpop.eup %4391  ;;  %v2406_v48 = vmul.f32 %v5471_v18, %v5413_v54 }
0x1300   :  { %v3698_v4 = vadd.f32 -1.0, %v2398_v38  ;;  %v5474_v31 = vpop.eup %4393  ;;  %v2400_v61 = vmul.f32 2.0, %v4392_v20 }
0x1301   :  { %v3697_v41 = vadd.f32 -1.0, %v2397_v42  ;;  %v2399_v12 = vmul.f32 2.0, %v5474_v31  ;;  %v4396_v11 = vpop.eup %4395  ;;  %v2408_v5 = vmul.f32 %v5474_v31, %v5422_v25 }
0x1302   :  { %2415 = vrot.lane.b32.xlu0 %v3698_v4, %s4626_s29  ;;  %v3700_v22 = vadd.f32 -1.0, %v2400_v61  ;;  %v2379_v14 = vadd.f32 1.0, %v4396_v11  ;;  %v4398_v29 = vpop.eup %4397 }
0x1303   :  { %2413 = vrot.lane.b32.xlu1 %v3697_v41, %s4626_s29  ;;  %v3699_v50 = vadd.f32 -1.0, %v2399_v12  ;;  %v2382_v21 = vadd.f32 1.0, %v4398_v29  ;;  %v2573_v29 = vld [vmem:[#allocation2 + $0x128] sm:$0xff] }
0x1304   :  { %4399 = vrcp.f32 %v2379_v14 }
0x1305   :  { %4401 = vrcp.f32 %v2382_v21 }
0x1306   :  { %2419 = vrot.lane.b32.xlu0 %v3700_v22, %s4626_s29 }
0x1307   :  { %2417 = vrot.lane.b32.xlu1 %v3699_v50, %s4626_s29 }
0x130e   :  { %v4400_v34 = vpop.eup %4399 }
0x130f   :  { %v4402_v13 = vpop.eup %4401  ;;  %v2405_v44 = vmul.f32 %v4400_v34, %v5411_v51 }
0x1310   :  { %v2407_v3 = vmul.f32 %v4402_v13, %v5420_v7 }
0x1374   :  { %v2416_v23 = vpop.permute.xlu0 %2415 }
0x1375   :  { %v2414_v56 = vpop.permute.xlu1 %2413 }
0x1376   :  { %v2421_v1 = vsel %vm1256_vm4, %v2414_v56, %v2416_v23 }
0x1377   :  { %v2425_v6 = vmul.f32 %v4400_v34, %v2421_v1  ;;  %v2577_v1 = vld [vmem:[#allocation2 + $0x148] sm:$0xff] }
0x1378   :  { %v2420_v10 = vpop.permute.xlu0 %2419 }
0x1379   :  { %v2418_v32 = vpop.permute.xlu1 %2417  ;;  %2429 = vrot.lane.b32.xlu1 %v2425_v6, %s4627_s30 }
0x137a   :  { %v2422_v28 = vsel %vm1256_vm4, %v2418_v32, %v2420_v10 }
0x137b   :  { %v2426_v27 = vmul.f32 %v4402_v13, %v2422_v28  ;;  %v2576_v13 = vld [vmem:[#allocation2 + $0x140] sm:$0xff] }
0x137d   :  { %2431 = vrot.lane.b32.xlu0 %v2426_v27, %s4627_s30 }
0x13eb   :  { %v2430_v24 = vpop.permute.xlu1 %2429 }
0x13ec   :  { %v5490_v60 = vadd.f32 %v2430_v24, %v2405_v44  ;;  %v5492_v58 = vadd.f32 %v2430_v24, %v2406_v48 }
0x13ee   :  { %4403 = vtanh.f32 %v5490_v60 }
0x13ef   :  { %4405 = vtanh.f32 %v5492_v58  ;;  %v2432_v9 = vpop.permute.xlu0 %2431 }
0x13f0   :  { %v5499_v36 = vadd.f32 %v2432_v9, %v2407_v3  ;;  %v5501_v51 = vadd.f32 %v2432_v9, %v2408_v5 }
0x13f2   :  { %4407 = vtanh.f32 %v5499_v36 }
0x13f3   :  { %4409 = vtanh.f32 %v5501_v51 }
0x13f8   :  { %v4404_v54 = vpop.eup %4403 }
0x13f9   :  { %v4406_v38 = vpop.eup %4405  ;;  %2447 = vrot.lane.b32.xlu1 %v4404_v54, %s4627_s30 }
0x13fa   :  { %2449 = vrot.lane.b32.xlu0 %v4406_v38, %s4627_s30 }
0x13fc   :  { %v4408_v7 = vpop.eup %4407 }
0x13fd   :  { %v4410_v42 = vpop.eup %4409  ;;  %2451 = vrot.lane.b32.xlu1 %v4408_v7, %s4627_s30 }
0x13fe   :  { %2453 = vrot.lane.b32.xlu0 %v4410_v42, %s4627_s30 }
0x146b   :  { %v2448_v25 = vpop.permute.xlu1 %2447 }
0x146c   :  { %v2450_v20 = vpop.permute.xlu0 %2449 }
0x146d   :  { %v2455_v4 = vsel %vm1086_vm5, %v2448_v25, %v2450_v20 }
0x146e   :  { %v5512_v22 = vmul.f32 %v5471_v18, %v2455_v4  ;;  %v5528_v18 = vld [vmem:[#allocation3 + $0xac] ss:$12 sps:$4 sm:$0xff]  }
0x146f   :  { %v2452_v41 = vpop.permute.xlu1 %2451 }
0x1470   :  { %v2454_v61 = vpop.permute.xlu0 %2453 }
0x1471   :  { %v2456_v12 = vsel %vm1086_vm5, %v2452_v41, %v2454_v61 }
0x1472   :  { %v5515_v50 = vmul.f32 %v5474_v31, %v2456_v12  ;;  %v5535_v31 = vld [vmem:[#allocation3 + $0xa8] ss:$12 sps:$4 sm:$0xff]  }
0x1474   :  { %v2481_v57 = vpack.c.bf16 %v5515_v50, %v5512_v22 }
0x1476   :  { %2483 = vrot.lane.b32.xlu1 %v2481_v57, %s4629_s6 }
0x14e8   :  { %v2484_v2 = vpop.permute.xlu1 %2483 }
0x14e9   :  { %3702 = vmatmul.mubr.msk.bf16.vlgmr.msra.gmra.mrb[72].mxu0 %vm1086_vm5, %v2484_v2  ;;  %4089 = vmatmul.mubr.msk.bf16.vlgmr.msra.gmra.mrb[72].mxu1 %vm1086_vm5, %v2484_v2 }
0x14ea   :  { %2712 = vmatpush1.bf16.msra.mxu0 %v5522_v55  ;;  %4093 = vmatpush3.bf16.msra.mxu1 %v5525_v39 }
0x14eb   :  { %2713 = vmatprep.subr.bf16.mxu0 %v5528_v18  ;;  %4094 = vmatprep.subr.bf16.mxu1 %v4624_v40 }
0x14ec   :  { %2743 = vmatprep.mubr.bf16.mxu0 %v4623_v0  ;;  %4102 = vmatprep.mubr.msk.bf16.mxu1 %vm4625_vm2, %v4624_v40 }
0x14ee   :  { %2714 = vmatpush1.bf16.msra.mxu0 %v5535_v31  ;;  %4095 = vmatpush3.bf16.msra.mxu1 %v5538_v15 }
0x14ef   :  { %2715 = vmatprep.subr.bf16.mxu0 %v5276_v19  ;;  %4096 = vmatprep.subr.bf16.mxu1 %v4624_v40  ;;  %v5554_v19 = vld [vmem:[#allocation3 + $0x94] ss:$12 sps:$4 sm:$0xff]  }
0x14f2   :  { %2716 = vmatpush1.bf16.msra.mxu0 %v5280_v45  ;;  %4097 = vmatpush3.bf16.msra.mxu1 %v5283_v8 }
0x14f3   :  { %2717 = vmatprep.subr.bf16.mxu0 %v5286_v35  ;;  %4098 = vmatprep.subr.bf16.mxu1 %v4624_v40 }
0x14f6   :  { %2718 = vmatpush1.bf16.msra.mxu0 %v5290_v26  ;;  %4099 = vmatpush3.bf16.msra.mxu1 %v5293_v52 }
0x14f7   :  { %3714 = vmatprep.subr.msk.bf16.mxu0 %vm1090_vm1, %v4888_v37  ;;  %4100 = vmatprep.subr.bf16.mxu1 %v4624_v40 }
0x14fa   :  { %2720 = vmatpush1.bf16.msra.mxu0 %v4901_v46  ;;  %4101 = vmatpush3.bf16.msra.mxu1 %v4895_v43 }
0x14fb   :  { %2934 = vmatprep.subr.bf16.mxu0 %v5554_v19  ;;  %4106 = vmatprep.subr.bf16.mxu1 %v4624_v40 }
0x15bc   :  { %v2522_v45 = vpop.f32.mrb[72].mxu0  ;;  %v2565_v8 = vpop.f32.mrb[72].mxu1 }
0x15bd   :  { %v2566_v35 = vadd.f32 %v2565_v8, %v5024_v49  ;;  %v2524_v26 = vpop.f32.mrb[73].mxu0  ;;  %v4090_v52 = vpop.f32.mrb[73].mxu1 }
0x15be   :  { %v2525_v59 = vadd.f32 %v2524_v26, %v5008_v47  ;;  %v2526_v30 = vpop.f32.mrb[74].mxu0  ;;  %v2568_v11 = vpop.f32.mrb[74].mxu1 }
0x15bf   :  { %v2580_v14 = vadd.f32 %v2574_v17, %v2566_v35  ;;  %v2569_v21 = vadd.f32 %v2568_v11, %v5024_v49  ;;  %v2528_v23 = vpop.f32.mrb[75].mxu0  ;;  %v4091_v56 = vpop.f32.mrb[75].mxu1  ;;  %v2523_v17 = vadd.f32 %v2522_v45, %v4964_v62 }
0x15c0   :  { %v2579_v34 = vadd.f32 %v2573_v29, %v2525_v59  ;;  %v2529_v6 = vadd.f32 %v2528_v23, %v5008_v47  ;;  %v2572_v59 = vld [vmem:[#allocation2 + $0x120] sm:$0xff]  ;;  %v2575_v29 = vld [vmem:[#allocation2 + $0x138] sm:$0xff] }
0x15c1   :  { %v3706_v10 = vmul.f32 -1.442695, %v2580_v14  ;;  %v2583_v32 = vadd.f32 %v2577_v1, %v2569_v21  ;;  %v2578_v11 = vadd.f32 %v2572_v59, %v2523_v17  ;;  %v2527_v14 = vadd.f32 %v2526_v30, %v4964_v62 }
0x15c2   :  { %v3705_v28 = vmul.f32 -1.442695, %v2579_v34  ;;  %v2582_v27 = vadd.f32 %v2576_v13, %v2529_v6 }
0x15c3   :  { %v3709_v44 = vmul.f32 -1.442695, %v2583_v32  ;;  %4411 = vpow2.f32 %v3706_v10  ;;  %v3704_v21 = vmul.f32 -1.442695, %v2578_v11  ;;  %v2581_v23 = vadd.f32 %v2575_v29, %v2527_v14  ;;  %v5629_v29 = vld [vmem:[#allocation3 + $0xc8] ss:$12 sps:$4 sm:$0xff]  }
0x15c4   :  { %v3708_v48 = vmul.f32 -1.442695, %v2582_v27  ;;  %4413 = vpow2.f32 %v3705_v28 }
0x15c5   :  { %4415 = vpow2.f32 %v3709_v44  ;;  %v3707_v56 = vmul.f32 -1.442695, %v2581_v23  ;;  %v5636_v23 = vld [vmem:[#allocation3 + $0xd8] ss:$12 sps:$4 sm:$0xff]  }
0x15c6   :  { %4417 = vpow2.f32 %v3708_v48 }
0x15cd   :  { %v4412_v24 = vpop.eup %4411 }
0x15ce   :  { %v4414_v3 = vpop.eup %4413  ;;  %v2604_v5 = vadd.f32 1.0, %v4412_v24 }
0x15cf   :  { %v2603_v9 = vadd.f32 1.0, %v4414_v3  ;;  %v4416_v54 = vpop.eup %4415 }
0x15d0   :  { %4419 = vrcp.f32 %v2604_v5  ;;  %v4418_v38 = vpop.eup %4417  ;;  %v2607_v7 = vadd.f32 1.0, %v4416_v54 }
0x15d1   :  { %4421 = vrcp.f32 %v2603_v9  ;;  %v2606_v42 = vadd.f32 1.0, %v4418_v38 }
0x15d2   :  { %4423 = vrcp.f32 %v2607_v7 }
0x15d3   :  { %4425 = vrcp.f32 %v2606_v42 }
0x15d4   :  { %4427 = vpow2.f32 %v3704_v21  ;;  %v5632_v21 = vld [vmem:[#allocation3 + $0xdc] ss:$12 sps:$4 sm:$0xff]  }
0x15d5   :  { %4429 = vpow2.f32 %v3707_v56  ;;  %v5639_v56 = vld [vmem:[#allocation3 + $0xe0] ss:$12 sps:$4 sm:$0xff]  }
0x15da   :  { %v4420_v25 = vpop.eup %4419 }
0x15db   :  { %v5562_v20 = vpop.eup %4421  ;;  %v2621_v4 = vmul.f32 2.0, %v4420_v25 }
0x15dc   :  { %v2620_v41 = vmul.f32 2.0, %v5562_v20  ;;  %v4424_v61 = vpop.eup %4423  ;;  %v2629_v9 = vmul.f32 %v5562_v20, %v5492_v58 }
0x15dd   :  { %v3711_v12 = vadd.f32 -1.0, %v2621_v4  ;;  %v5565_v57 = vpop.eup %4425  ;;  %v2623_v8 = vmul.f32 2.0, %v4424_v61 }
0x15de   :  { %v3710_v2 = vadd.f32 -1.0, %v2620_v41  ;;  %v2622_v35 = vmul.f32 2.0, %v5565_v57  ;;  %v4428_v34 = vpop.eup %4427  ;;  %v2631_v25 = vmul.f32 %v5565_v57, %v5501_v51 }
0x15df   :  { %2638 = vrot.lane.b32.xlu1 %v3711_v12, %s4626_s29  ;;  %v3713_v26 = vadd.f32 -1.0, %v2623_v8  ;;  %v2602_v1 = vadd.f32 1.0, %v4428_v34  ;;  %v4430_v6 = vpop.eup %4429 }
0x15e0   :  { %2636 = vrot.lane.b32.xlu0 %v3710_v2, %s4626_s29  ;;  %v3712_v52 = vadd.f32 -1.0, %v2622_v35  ;;  %v2605_v10 = vadd.f32 1.0, %v4430_v6 }
0x15e1   :  { %4431 = vrcp.f32 %v2602_v1 }
0x15e2   :  { %4433 = vrcp.f32 %v2605_v10 }
0x15e3   :  { %2642 = vrot.lane.b32.xlu1 %v3713_v26, %s4626_s29 }
0x15e4   :  { %2640 = vrot.lane.b32.xlu0 %v3712_v52, %s4626_s29 }
0x15eb   :  { %v4432_v28 = vpop.eup %4431 }
0x15ec   :  { %v4434_v48 = vpop.eup %4433  ;;  %v2628_v5 = vmul.f32 %v4432_v28, %v5490_v60 }
0x15ed   :  { %v2630_v42 = vmul.f32 %v4434_v48, %v5499_v36 }
0x1651   :  { %v2639_v32 = vpop.permute.xlu1 %2638 }
0x1652   :  { %v2637_v13 = vpop.permute.xlu0 %2636 }
0x1653   :  { %v2644_v45 = vsel %vm1256_vm4, %v2637_v13, %v2639_v32  ;;  %v2797_v13 = vld [vmem:[#allocation2 + $0x160] sm:$0xff] }
0x1654   :  { %v2648_v27 = vmul.f32 %v4432_v28, %v2644_v45 }
0x1655   :  { %v2643_v44 = vpop.permute.xlu1 %2642 }
0x1656   :  { %v2641_v30 = vpop.permute.xlu0 %2640  ;;  %2652 = vrot.lane.b32.xlu0 %v2648_v27, %s4627_s30 }
0x1657   :  { %v2645_v24 = vsel %vm1256_vm4, %v2641_v30, %v2643_v44  ;;  %v2796_v30 = vld [vmem:[#allocation2 + $0x158] sm:$0xff] }
0x1658   :  { %v2649_v3 = vmul.f32 %v4434_v48, %v2645_v24 }
0x165a   :  { %2654 = vrot.lane.b32.xlu1 %v2649_v3, %s4627_s30 }
0x16c8   :  { %v2653_v54 = vpop.permute.xlu0 %2652 }
0x16c9   :  { %v5581_v38 = vadd.f32 %v2653_v54, %v2628_v5  ;;  %v5583_v7 = vadd.f32 %v2653_v54, %v2629_v9  ;;  %v2800_v9 = vld [vmem:[#allocation2 + $0x178] sm:$0xff] }
0x16cb   :  { %4435 = vtanh.f32 %v5581_v38 }
0x16cc   :  { %4437 = vtanh.f32 %v5583_v7  ;;  %v2655_v4 = vpop.permute.xlu1 %2654 }
0x16cd   :  { %v5590_v41 = vadd.f32 %v2655_v4, %v2630_v42  ;;  %v5592_v60 = vadd.f32 %v2655_v4, %v2631_v25  ;;  %v2799_v4 = vld [vmem:[#allocation2 + $0x170] sm:$0xff] }
0x16cf   :  { %4439 = vtanh.f32 %v5590_v41 }
0x16d0   :  { %4441 = vtanh.f32 %v5592_v60 }
0x16d5   :  { %v4436_v58 = vpop.eup %4435 }
0x16d6   :  { %v4438_v61 = vpop.eup %4437  ;;  %2670 = vrot.lane.b32.xlu0 %v4436_v58, %s4627_s30 }
0x16d7   :  { %2672 = vrot.lane.b32.xlu1 %v4438_v61, %s4627_s30 }
0x16d9   :  { %v4440_v36 = vpop.eup %4439 }
0x16da   :  { %v4442_v12 = vpop.eup %4441  ;;  %2674 = vrot.lane.b32.xlu0 %v4440_v36, %s4627_s30 }
0x16db   :  { %2676 = vrot.lane.b32.xlu1 %v4442_v12, %s4627_s30 }
0x1748   :  { %v2671_v51 = vpop.permute.xlu0 %2670 }
0x1749   :  { %v2673_v2 = vpop.permute.xlu1 %2672 }
0x174a   :  { %v2678_v8 = vsel %vm1086_vm5, %v2671_v51, %v2673_v2 }
0x174b   :  { %v5603_v17 = vmul.f32 %v5562_v20, %v2678_v8  ;;  %v5622_v20 = vld [vmem:[#allocation3 + $0xc4] ss:$12 sps:$4 sm:$0xff]  }
0x174c   :  { %v2675_v35 = vpop.permute.xlu0 %2674 }
0x174d   :  { %v2677_v26 = vpop.permute.xlu1 %2676 }
0x174e   :  { %v2679_v52 = vsel %vm1086_vm5, %v2675_v35, %v2677_v26 }
0x174f   :  { %v5606_v59 = vmul.f32 %v5565_v57, %v2679_v52  ;;  %v5626_v57 = vld [vmem:[#allocation3 + $0xc0] ss:$12 sps:$4 sm:$0xff]  }
0x1751   :  { %v2704_v11 = vpack.c.bf16 %v5606_v59, %v5603_v17 }
0x1753   :  { %2706 = vrot.lane.b32.xlu0 %v2704_v11, %s4629_s6 }
0x17c5   :  { %v2707_v14 = vpop.permute.xlu0 %2706 }
0x17c6   :  { %3715 = vmatmul.mubr.msk.bf16.vlgmr.msra.gmra.mrb[76].mxu0 %vm1086_vm5, %v2707_v14  ;;  %4103 = vmatmul.mubr.msk.bf16.vlgmr.msra.gmra.mrb[76].mxu1 %vm1086_vm5, %v2707_v14 }
0x17c7   :  { %2935 = vmatpush1.bf16.msra.mxu0 %v5522_v55  ;;  %4107 = vmatpush3.bf16.msra.mxu1 %v5525_v39 }
0x17c8   :  { %2936 = vmatprep.subr.bf16.mxu0 %v5528_v18  ;;  %4108 = vmatprep.subr.bf16.mxu1 %v4624_v40 }
0x17c9   :  { %2966 = vmatprep.mubr.bf16.mxu0 %v4623_v0  ;;  %4116 = vmatprep.mubr.msk.bf16.mxu1 %vm4625_vm2, %v4624_v40 }
0x17cb   :  { %2937 = vmatpush1.bf16.msra.mxu0 %v5535_v31  ;;  %4109 = vmatpush3.bf16.msra.mxu1 %v5538_v15 }
0x17cc   :  { %2938 = vmatprep.subr.bf16.mxu0 %v5622_v20  ;;  %4110 = vmatprep.subr.bf16.mxu1 %v4624_v40 }
0x17cf   :  { %2939 = vmatpush1.bf16.msra.mxu0 %v5626_v57  ;;  %4111 = vmatpush3.bf16.msra.mxu1 %v5629_v29 }
0x17d0   :  { %2940 = vmatprep.subr.bf16.mxu0 %v5632_v21  ;;  %4112 = vmatprep.subr.bf16.mxu1 %v4624_v40 }
0x17d3   :  { %2941 = vmatpush1.bf16.msra.mxu0 %v5636_v23  ;;  %4113 = vmatpush3.bf16.msra.mxu1 %v5639_v56 }
0x17d4   :  { %3727 = vmatprep.subr.msk.bf16.mxu0 %vm1090_vm1, %v4888_v37  ;;  %4114 = vmatprep.subr.bf16.mxu1 %v4624_v40 }
0x17d7   :  { %2943 = vmatpush1.bf16.msra.mxu0 %v4901_v46  ;;  %4115 = vmatpush3.bf16.msra.mxu1 %v4895_v43 }
0x17d8   :  { %3145 = vmatprep.subr.bf16.mxu0 %v5554_v19  ;;  %4120 = vmatprep.subr.bf16.mxu1 %v4624_v40 }
0x1899   :  { %v2745_v34 = vpop.f32.mrb[76].mxu0  ;;  %v2788_v1 = vpop.f32.mrb[76].mxu1 }
0x189a   :  { %v2789_v6 = vadd.f32 %v2788_v1, %v5024_v49  ;;  %v2747_v10 = vpop.f32.mrb[77].mxu0  ;;  %v4104_v32 = vpop.f32.mrb[77].mxu1 }
0x189b   :  { %v2748_v28 = vadd.f32 %v2747_v10, %v5008_v47  ;;  %v2749_v45 = vpop.f32.mrb[78].mxu0  ;;  %v2791_v27 = vpop.f32.mrb[78].mxu1 }
0x189c   :  { %v2803_v44 = vadd.f32 %v2797_v13, %v2789_v6  ;;  %v2792_v48 = vadd.f32 %v2791_v27, %v5024_v49  ;;  %v2751_v24 = vpop.f32.mrb[79].mxu0  ;;  %v4105_v3 = vpop.f32.mrb[79].mxu1 }
0x189d   :  { %v2802_v5 = vadd.f32 %v2796_v30, %v2748_v28  ;;  %v2752_v54 = vadd.f32 %v2751_v24, %v5008_v47 }
0x189e   :  { %v3719_v42 = vmul.f32 -1.442695, %v2803_v44  ;;  %v2806_v25 = vadd.f32 %v2800_v9, %v2792_v48  ;;  %v2795_v9 = vld [vmem:[#allocation2 + $0x150] sm:$0xff] }
0x189f   :  { %v3718_v58 = vmul.f32 -1.442695, %v2802_v5  ;;  %v2805_v61 = vadd.f32 %v2799_v4, %v2752_v54  ;;  %v2746_v5 = vadd.f32 %v2745_v34, %v4964_v62 }
0x18a0   :  { %v3722_v36 = vmul.f32 -1.442695, %v2806_v25  ;;  %4443 = vpow2.f32 %v3719_v42  ;;  %v2750_v42 = vadd.f32 %v2749_v45, %v4964_v62  ;;  %v2798_v25 = vld [vmem:[#allocation2 + $0x168] sm:$0xff] }
0x18a1   :  { %v3721_v12 = vmul.f32 -1.442695, %v2805_v61  ;;  %4445 = vpow2.f32 %v3718_v58  ;;  %v2801_v54 = vadd.f32 %v2795_v9, %v2746_v5 }
0x18a2   :  { %4447 = vpow2.f32 %v3722_v36  ;;  %v2804_v58 = vadd.f32 %v2798_v25, %v2750_v42 }
0x18a3   :  { %4449 = vpow2.f32 %v3721_v12  ;;  %v3717_v4 = vmul.f32 -1.442695, %v2801_v54 }
0x18a4   :  { %v3720_v61 = vmul.f32 -1.442695, %v2804_v58 }
0x18aa   :  { %v4444_v51 = vpop.eup %4443 }
0x18ab   :  { %v4446_v2 = vpop.eup %4445  ;;  %v2827_v8 = vadd.f32 1.0, %v4444_v51 }
0x18ac   :  { %v2826_v35 = vadd.f32 1.0, %v4446_v2  ;;  %v4448_v26 = vpop.eup %4447 }
0x18ad   :  { %4451 = vrcp.f32 %v2827_v8  ;;  %v4450_v52 = vpop.eup %4449  ;;  %v2830_v11 = vadd.f32 1.0, %v4448_v26 }
0x18ae   :  { %4453 = vrcp.f32 %v2826_v35  ;;  %v2829_v14 = vadd.f32 1.0, %v4450_v52 }
0x18af   :  { %4455 = vrcp.f32 %v2830_v11 }
0x18b0   :  { %4457 = vrcp.f32 %v2829_v14 }
0x18b1   :  { %4459 = vpow2.f32 %v3717_v4 }
0x18b2   :  { %4461 = vpow2.f32 %v3720_v61 }
0x18b7   :  { %v4452_v1 = vpop.eup %4451 }
0x18b8   :  { %v5653_v6 = vpop.eup %4453  ;;  %v2844_v10 = vmul.f32 2.0, %v4452_v1 }
0x18b9   :  { %v2843_v32 = vmul.f32 2.0, %v5653_v6  ;;  %v4456_v13 = vpop.eup %4455 }
0x18ba   :  { %v3724_v28 = vadd.f32 -1.0, %v2844_v10  ;;  %v5656_v27 = vpop.eup %4457  ;;  %v2846_v30 = vmul.f32 2.0, %v4456_v13  ;;  %v2852_v13 = vmul.f32 %v5653_v6, %v5583_v7 }
0x18bb   :  { %v3723_v44 = vadd.f32 -1.0, %v2843_v32  ;;  %v2845_v48 = vmul.f32 2.0, %v5656_v27  ;;  %v4460_v36 = vpop.eup %4459 }
0x18bc   :  { %2861 = vrot.lane.b32.xlu0 %v3724_v28, %s4626_s29  ;;  %v3726_v24 = vadd.f32 -1.0, %v2846_v30  ;;  %v2825_v12 = vadd.f32 1.0, %v4460_v36  ;;  %v4462_v51 = vpop.eup %4461 }
0x18bd   :  { %2859 = vrot.lane.b32.xlu1 %v3723_v44, %s4626_s29  ;;  %v3725_v3 = vadd.f32 -1.0, %v2845_v48  ;;  %v2828_v2 = vadd.f32 1.0, %v4462_v51 }
0x18be   :  { %4463 = vrcp.f32 %v2825_v12 }
0x18bf   :  { %4465 = vrcp.f32 %v2828_v2 }
0x18c0   :  { %2865 = vrot.lane.b32.xlu0 %v3726_v24, %s4626_s29  ;;  %v2854_v24 = vmul.f32 %v5656_v27, %v5592_v60 }
0x18c1   :  { %2863 = vrot.lane.b32.xlu1 %v3725_v3, %s4626_s29 }
0x18c8   :  { %v4464_v26 = vpop.eup %4463 }
0x18c9   :  { %v4466_v14 = vpop.eup %4465  ;;  %v2851_v32 = vmul.f32 %v4464_v26, %v5581_v38 }
0x18ca   :  { %v2853_v48 = vmul.f32 %v4466_v14, %v5590_v41 }
0x192e   :  { %v2862_v8 = vpop.permute.xlu0 %2861 }
0x192f   :  { %v2860_v35 = vpop.permute.xlu1 %2859 }
0x1930   :  { %v2867_v34 = vsel %vm1256_vm4, %v2860_v35, %v2862_v8 }
0x1931   :  { %v2871_v52 = vmul.f32 %v4464_v26, %v2867_v34 }
0x1932   :  { %v2866_v11 = vpop.permute.xlu0 %2865 }
0x1933   :  { %2875 = vrot.lane.b32.xlu1 %v2871_v52, %s4627_s30  ;;  %v2864_v45 = vpop.permute.xlu1 %2863 }
0x1934   :  { %v2868_v1 = vsel %vm1256_vm4, %v2864_v45, %v2866_v11 }
0x1935   :  { %v2872_v10 = vmul.f32 %v4466_v14, %v2868_v1 }
0x1937   :  { %2877 = vrot.lane.b32.xlu0 %v2872_v10, %s4627_s30 }
0x19a5   :  { %v2876_v28 = vpop.permute.xlu1 %2875 }
0x19a6   :  { %v5672_v44 = vadd.f32 %v2876_v28, %v2851_v32  ;;  %v5674_v30 = vadd.f32 %v2876_v28, %v2852_v13 }
0x19a8   :  { %4467 = vtanh.f32 %v5672_v44 }
0x19a9   :  { %4469 = vtanh.f32 %v5674_v30  ;;  %v2878_v3 = vpop.permute.xlu0 %2877 }
0x19aa   :  { %v5681_v5 = vadd.f32 %v2878_v3, %v2853_v48  ;;  %v5683_v38 = vadd.f32 %v2878_v3, %v2854_v24 }
0x19ac   :  { %4471 = vtanh.f32 %v5681_v5 }
0x19ad   :  { %4473 = vtanh.f32 %v5683_v38 }
0x19b2   :  { %v4468_v7 = vpop.eup %4467 }
0x19b3   :  { %v4470_v9 = vpop.eup %4469  ;;  %2893 = vrot.lane.b32.xlu1 %v4468_v7, %s4627_s30 }
0x19b4   :  { %2895 = vrot.lane.b32.xlu0 %v4470_v9, %s4627_s30 }
0x19b6   :  { %v4472_v41 = vpop.eup %4471 }
0x19b7   :  { %v4474_v54 = vpop.eup %4473  ;;  %2897 = vrot.lane.b32.xlu1 %v4472_v41, %s4627_s30 }
0x19b8   :  { %2899 = vrot.lane.b32.xlu0 %v4474_v54, %s4627_s30 }
0x1a25   :  { %v2894_v60 = vpop.permute.xlu1 %2893 }
0x1a26   :  { %v2896_v42 = vpop.permute.xlu0 %2895 }
0x1a27   :  { %v2901_v25 = vsel %vm1086_vm5, %v2894_v60, %v2896_v42 }
0x1a28   :  { %v5694_v36 = vmul.f32 %v5653_v6, %v2901_v25 }
0x1a29   :  { %v2898_v4 = vpop.permute.xlu1 %2897 }
0x1a2a   :  { %v2900_v58 = vpop.permute.xlu0 %2899 }
0x1a2b   :  { %v2902_v61 = vsel %vm1086_vm5, %v2898_v4, %v2900_v58 }
0x1a2c   :  { %v5697_v12 = vmul.f32 %v5656_v27, %v2902_v61 }
0x1a2e   :  { %v2927_v51 = vpack.c.bf16 %v5697_v12, %v5694_v36 }
0x1a30   :  { %2929 = vrot.lane.b32.xlu1 %v2927_v51, %s4629_s6 }
0x1aa2   :  { %v2930_v2 = vpop.permute.xlu1 %2929 }
0x1aa3   :  { %3728 = vmatmul.mubr.msk.bf16.vlgmr.msra.gmra.mrb[80].mxu0 %vm1086_vm5, %v2930_v2  ;;  %4117 = vmatmul.mubr.msk.bf16.vlgmr.msra.gmra.mrb[80].mxu1 %vm1086_vm5, %v2930_v2 }
0x1aa4   :  { %3146 = vmatpush1.bf16.msra.mxu0 %v5522_v55  ;;  %4121 = vmatpush3.bf16.msra.mxu1 %v5525_v39 }
0x1aa5   :  { %3147 = vmatprep.subr.bf16.mxu0 %v5528_v18  ;;  %4122 = vmatprep.subr.bf16.mxu1 %v4624_v40 }
0x1aa6   :  { %3177 = vmatprep.mubr.bf16.mxu0 %v4623_v0  ;;  %4130 = vmatprep.mubr.msk.bf16.mxu1 %vm4625_vm2, %v4624_v40 }
0x1aa8   :  { %3148 = vmatpush1.bf16.msra.mxu0 %v5535_v31  ;;  %4123 = vmatpush3.bf16.msra.mxu1 %v5538_v15 }
0x1aa9   :  { %3149 = vmatprep.subr.bf16.mxu0 %v5622_v20  ;;  %4124 = vmatprep.subr.bf16.mxu1 %v4624_v40 }
0x1aac   :  { %3150 = vmatpush1.bf16.msra.mxu0 %v5626_v57  ;;  %4125 = vmatpush3.bf16.msra.mxu1 %v5629_v29 }
0x1aad   :  { %3151 = vmatprep.subr.bf16.mxu0 %v5632_v21  ;;  %4126 = vmatprep.subr.bf16.mxu1 %v4624_v40 }
0x1ab0   :  { %3152 = vmatpush1.bf16.msra.mxu0 %v5636_v23  ;;  %4127 = vmatpush3.bf16.msra.mxu1 %v5639_v56 }
0x1ab1   :  { %3740 = vmatprep.subr.msk.bf16.mxu0 %vm1090_vm1, %v4888_v37  ;;  %4128 = vmatprep.subr.bf16.mxu1 %v4624_v40 }
0x1ab4   :  { %3154 = vmatpush1.bf16.msra.mxu0 %v4901_v46  ;;  %4129 = vmatpush3.bf16.msra.mxu1 %v4895_v43 }
0x1ab5   :  { %3356 = vmatprep.subr.bf16.mxu0 %v5554_v19  ;;  %4134 = vmatprep.subr.bf16.mxu1 %v4624_v40 }
0x1b76   :  { %v2968_v6 = vpop.f32.mrb[80].mxu0  ;;  %v3011_v27 = vpop.f32.mrb[80].mxu1 }
0x1b77   :  { %v3012_v8 = vadd.f32 %v3011_v27, %v5024_v49  ;;  %v2970_v35 = vpop.f32.mrb[81].mxu0  ;;  %v4118_v26 = vpop.f32.mrb[81].mxu1 }
0x1b78   :  { %v2971_v34 = vadd.f32 %v2970_v35, %v5008_v47  ;;  %v2972_v52 = vpop.f32.mrb[82].mxu0  ;;  %v3014_v11 = vpop.f32.mrb[82].mxu1 }
0x1b79   :  { %v3732_v45 = vmul.f32 -1.442695, %v3012_v8  ;;  %v3015_v14 = vadd.f32 %v3014_v11, %v5024_v49  ;;  %v2974_v1 = vpop.f32.mrb[83].mxu0  ;;  %v4119_v10 = vpop.f32.mrb[83].mxu1  ;;  %v2969_v11 = vadd.f32 %v2968_v6, %v4964_v62 }
0x1b7a   :  { %v3731_v32 = vmul.f32 -1.442695, %v2971_v34  ;;  %v2975_v19 = vadd.f32 %v2974_v1, %v5008_v47 }
0x1b7b   :  { %v3735_v13 = vmul.f32 -1.442695, %v3015_v14  ;;  %4475 = vpow2.f32 %v3732_v45  ;;  %v3730_v45 = vmul.f32 -1.442695, %v2969_v11  ;;  %v2973_v14 = vadd.f32 %v2972_v52, %v4964_v62 }
0x1b7c   :  { %v3734_v28 = vmul.f32 -1.442695, %v2975_v19  ;;  %4477 = vpow2.f32 %v3731_v32 }
0x1b7d   :  { %4479 = vpow2.f32 %v3735_v13  ;;  %v3733_v1 = vmul.f32 -1.442695, %v2973_v14 }
0x1b7e   :  { %4481 = vpow2.f32 %v3734_v28 }
0x1b85   :  { %v4476_v48 = vpop.eup %4475 }
0x1b86   :  { %v4478_v24 = vpop.eup %4477  ;;  %v3038_v3 = vadd.f32 1.0, %v4476_v48 }
0x1b87   :  { %v3037_v7 = vadd.f32 1.0, %v4478_v24  ;;  %v4480_v9 = vpop.eup %4479 }
0x1b88   :  { %4483 = vrcp.f32 %v3038_v3  ;;  %v4482_v41 = vpop.eup %4481  ;;  %v3041_v54 = vadd.f32 1.0, %v4480_v9 }
0x1b89   :  { %4485 = vrcp.f32 %v3037_v7  ;;  %v3040_v60 = vadd.f32 1.0, %v4482_v41 }
0x1b8a   :  { %4487 = vrcp.f32 %v3041_v54 }
0x1b8b   :  { %4489 = vrcp.f32 %v3040_v60 }
0x1b8c   :  { %4491 = vpow2.f32 %v3730_v45 }
0x1b8d   :  { %4493 = vpow2.f32 %v3733_v1 }
0x1b92   :  { %v4484_v42 = vpop.eup %4483 }
0x1b93   :  { %v5732_v25 = vpop.eup %4485  ;;  %v3055_v4 = vmul.f32 2.0, %v4484_v42 }
0x1b94   :  { %v3054_v58 = vmul.f32 2.0, %v5732_v25  ;;  %v4488_v61 = vpop.eup %4487  ;;  %v3063_v60 = vmul.f32 %v5732_v25, %v5674_v30 }
0x1b95   :  { %v3737_v51 = vadd.f32 -1.0, %v3055_v4  ;;  %v5735_v2 = vpop.eup %4489  ;;  %v3057_v27 = vmul.f32 2.0, %v4488_v61 }
0x1b96   :  { %v3736_v8 = vadd.f32 -1.0, %v3054_v58  ;;  %v3056_v35 = vmul.f32 2.0, %v5735_v2  ;;  %v4492_v10 = vpop.eup %4491 }
0x1b97   :  { %3072 = vrot.lane.b32.xlu1 %v3737_v51, %s4626_s29  ;;  %v3739_v26 = vadd.f32 -1.0, %v3057_v27  ;;  %v3036_v32 = vadd.f32 1.0, %v4492_v10  ;;  %v4494_v19 = vpop.eup %4493  ;;  %v3065_v27 = vmul.f32 %v5735_v2, %v5683_v38 }
0x1b98   :  { %3070 = vrot.lane.b32.xlu0 %v3736_v8, %s4626_s29  ;;  %v3738_v34 = vadd.f32 -1.0, %v3056_v35  ;;  %v3039_v13 = vadd.f32 1.0, %v4494_v19 }
0x1b99   :  { %4495 = vrcp.f32 %v3036_v32 }
0x1b9a   :  { %4497 = vrcp.f32 %v3039_v13 }
0x1b9b   :  { %3076 = vrot.lane.b32.xlu1 %v3739_v26, %s4626_s29 }
0x1b9c   :  { %3074 = vrot.lane.b32.xlu0 %v3738_v34, %s4626_s29 }
0x1ba3   :  { %v4496_v24 = vpop.eup %4495 }
0x1ba4   :  { %v4498_v52 = vpop.eup %4497  ;;  %v3062_v42 = vmul.f32 %v4496_v24, %v5672_v44 }
0x1ba5   :  { %v3064_v51 = vmul.f32 %v4498_v52, %v5681_v5 }
0x1c09   :  { %v3073_v28 = vpop.permute.xlu1 %3072 }
0x1c0a   :  { %v3071_v48 = vpop.permute.xlu0 %3070 }
0x1c0b   :  { %v3078_v3 = vsel %vm1256_vm4, %v3071_v48, %v3073_v28 }
0x1c0c   :  { %v3082_v7 = vmul.f32 %v4496_v24, %v3078_v3 }
0x1c0d   :  { %v3077_v9 = vpop.permute.xlu1 %3076 }
0x1c0e   :  { %v3075_v6 = vpop.permute.xlu0 %3074  ;;  %3086 = vrot.lane.b32.xlu0 %v3082_v7, %s4627_s30 }
0x1c0f   :  { %v3079_v41 = vsel %vm1256_vm4, %v3075_v6, %v3077_v9 }
0x1c10   :  { %v3083_v54 = vmul.f32 %v4498_v52, %v3079_v41 }
0x1c12   :  { %3088 = vrot.lane.b32.xlu1 %v3083_v54, %s4627_s30 }
0x1c80   :  { %v3087_v4 = vpop.permute.xlu0 %3086 }
0x1c81   :  { %v5751_v58 = vadd.f32 %v3087_v4, %v3062_v42  ;;  %v5753_v61 = vadd.f32 %v3087_v4, %v3063_v60 }
0x1c83   :  { %4499 = vtanh.f32 %v5751_v58 }
0x1c84   :  { %4501 = vtanh.f32 %v5753_v61  ;;  %v3089_v8 = vpop.permute.xlu1 %3088 }
0x1c85   :  { %v5760_v35 = vadd.f32 %v3089_v8, %v3064_v51  ;;  %v5762_v30 = vadd.f32 %v3089_v8, %v3065_v27 }
0x1c87   :  { %4503 = vtanh.f32 %v5760_v35 }
0x1c88   :  { %4505 = vtanh.f32 %v5762_v30 }
0x1c8d   :  { %v4500_v44 = vpop.eup %4499 }
0x1c8e   :  { %v4502_v26 = vpop.eup %4501  ;;  %3104 = vrot.lane.b32.xlu0 %v4500_v44, %s4627_s30 }
0x1c8f   :  { %3106 = vrot.lane.b32.xlu1 %v4502_v26, %s4627_s30 }
0x1c91   :  { %v4504_v5 = vpop.eup %4503 }
0x1c92   :  { %v4506_v34 = vpop.eup %4505  ;;  %3108 = vrot.lane.b32.xlu0 %v4504_v5, %s4627_s30 }
0x1c93   :  { %3110 = vrot.lane.b32.xlu1 %v4506_v34, %s4627_s30 }
0x1d00   :  { %v3105_v38 = vpop.permute.xlu0 %3104 }
0x1d01   :  { %v3107_v11 = vpop.permute.xlu1 %3106 }
0x1d02   :  { %v3112_v45 = vsel %vm1086_vm5, %v3105_v38, %v3107_v11 }
0x1d03   :  { %v5773_v32 = vmul.f32 %v5732_v25, %v3112_v45 }
0x1d04   :  { %v3109_v14 = vpop.permute.xlu0 %3108 }
0x1d05   :  { %v3111_v1 = vpop.permute.xlu1 %3110 }
0x1d06   :  { %v3113_v10 = vsel %vm1086_vm5, %v3109_v14, %v3111_v1 }
0x1d07   :  { %v5776_v19 = vmul.f32 %v5735_v2, %v3113_v10 }
0x1d09   :  { %v3138_v13 = vpack.c.bf16 %v5776_v19, %v5773_v32 }
0x1d0b   :  { %3140 = vrot.lane.b32.xlu0 %v3138_v13, %s4629_s6 }
0x1d7d   :  { %v3141_v28 = vpop.permute.xlu0 %3140 }
0x1d7e   :  { %3741 = vmatmul.mubr.msk.bf16.vlgmr.msra.gmra.mrb[84].mxu0 %vm1086_vm5, %v3141_v28  ;;  %4131 = vmatmul.mubr.msk.bf16.vlgmr.msra.gmra.mrb[84].mxu1 %vm1086_vm5, %v3141_v28 }
0x1d7f   :  { %3357 = vmatpush1.bf16.msra.mxu0 %v5522_v55  ;;  %4135 = vmatpush3.bf16.msra.mxu1 %v5525_v39 }
0x1d80   :  { %3358 = vmatprep.subr.bf16.mxu0 %v5528_v18  ;;  %4136 = vmatprep.subr.bf16.mxu1 %v4624_v40 }
0x1d81   :  { %3388 = vmatprep.mubr.bf16.mxu0 %v4623_v0  ;;  %4144 = vmatprep.mubr.msk.bf16.mxu1 %vm4625_vm2, %v4624_v40 }
0x1d83   :  { %3359 = vmatpush1.bf16.msra.mxu0 %v5535_v31  ;;  %4137 = vmatpush3.bf16.msra.mxu1 %v5538_v15 }
0x1d84   :  { %3360 = vmatprep.subr.bf16.mxu0 %v5622_v20  ;;  %4138 = vmatprep.subr.bf16.mxu1 %v4624_v40 }
0x1d87   :  { %3361 = vmatpush1.bf16.msra.mxu0 %v5626_v57  ;;  %4139 = vmatpush3.bf16.msra.mxu1 %v5629_v29 }
0x1d88   :  { %3362 = vmatprep.subr.bf16.mxu0 %v5632_v21  ;;  %4140 = vmatprep.subr.bf16.mxu1 %v4624_v40 }
0x1d8b   :  { %3363 = vmatpush1.bf16.msra.mxu0 %v5636_v23  ;;  %4141 = vmatpush3.bf16.msra.mxu1 %v5639_v56 }
0x1d8c   :  { %3753 = vmatprep.subr.msk.bf16.mxu0 %vm1090_vm1, %v4888_v37  ;;  %4142 = vmatprep.subr.bf16.mxu1 %v4624_v40 }
0x1d8f   :  { %3365 = vmatpush1.bf16.msra.mxu0 %v4901_v46  ;;  %4143 = vmatpush3.bf16.msra.mxu1 %v4895_v43 }
0x1e51   :  { %v3179_v0 = vpop.f32.mrb[84].mxu0  ;;  %v3222_v55 = vpop.f32.mrb[84].mxu1 }
0x1e52   :  { %v3223_v39 = vadd.f32 %v3222_v55, %v5024_v49  ;;  %v3181_v18 = vpop.f32.mrb[85].mxu0  ;;  %v4132_v31 = vpop.f32.mrb[85].mxu1  ;;  %v3180_v34 = vadd.f32 %v3179_v0, %v4964_v62 }
0x1e53   :  { %v3182_v15 = vadd.f32 %v3181_v18, %v5008_v47  ;;  %v3183_v20 = vpop.f32.mrb[86].mxu0  ;;  %v3225_v57 = vpop.f32.mrb[86].mxu1 }
0x1e54   :  { %v3745_v29 = vmul.f32 -1.442695, %v3223_v39  ;;  %v3226_v21 = vadd.f32 %v3225_v57, %v5024_v49  ;;  %v3185_v37 = vpop.f32.mrb[87].mxu0  ;;  %v4133_v23 = vpop.f32.mrb[87].mxu1  ;;  %v3743_v38 = vmul.f32 -1.442695, %v3180_v34  ;;  %v3184_v11 = vadd.f32 %v3183_v20, %v4964_v62 }
0x1e55   :  { %v3744_v40 = vmul.f32 -1.442695, %v3182_v15  ;;  %v3186_v46 = vadd.f32 %v3185_v37, %v5008_v47 }
0x1e56   :  { %v3748_v56 = vmul.f32 -1.442695, %v3226_v21  ;;  %4507 = vpow2.f32 %v3745_v29  ;;  %v3746_v45 = vmul.f32 -1.442695, %v3184_v11 }
0x1e57   :  { %v3747_v43 = vmul.f32 -1.442695, %v3186_v46  ;;  %4509 = vpow2.f32 %v3744_v40 }
0x1e58   :  { %4511 = vpow2.f32 %v3748_v56 }
0x1e59   :  { %4513 = vpow2.f32 %v3747_v43 }
0x1e60   :  { %v4508_v25 = vpop.eup %4507 }
0x1e61   :  { %v4510_v2 = vpop.eup %4509  ;;  %v3249_v48 = vadd.f32 1.0, %v4508_v25 }
0x1e62   :  { %v3248_v24 = vadd.f32 1.0, %v4510_v2  ;;  %v4512_v3 = vpop.eup %4511 }
0x1e63   :  { %4515 = vrcp.f32 %v3249_v48  ;;  %v4514_v7 = vpop.eup %4513  ;;  %v3252_v9 = vadd.f32 1.0, %v4512_v3 }
0x1e64   :  { %4517 = vrcp.f32 %v3248_v24  ;;  %v3251_v6 = vadd.f32 1.0, %v4514_v7 }
0x1e65   :  { %4519 = vrcp.f32 %v3252_v9 }
0x1e66   :  { %4521 = vrcp.f32 %v3251_v6 }
0x1e67   :  { %4523 = vpow2.f32 %v3743_v38 }
0x1e68   :  { %4525 = vpow2.f32 %v3746_v45 }
0x1e6d   :  { %v4516_v52 = vpop.eup %4515 }
0x1e6e   :  { %v5809_v41 = vpop.eup %4517  ;;  %v3266_v54 = vmul.f32 2.0, %v4516_v52 }
0x1e6f   :  { %v3265_v60 = vmul.f32 2.0, %v5809_v41  ;;  %v4520_v42 = vpop.eup %4519  ;;  %v3274_v21 = vmul.f32 %v5809_v41, %v5753_v61 }
0x1e70   :  { %v3750_v4 = vadd.f32 -1.0, %v3266_v54  ;;  %v5812_v51 = vpop.eup %4521  ;;  %v3268_v27 = vmul.f32 2.0, %v4520_v42 }
0x1e71   :  { %v3749_v8 = vadd.f32 -1.0, %v3265_v60  ;;  %v3267_v44 = vmul.f32 2.0, %v5812_v51  ;;  %v4524_v14 = vpop.eup %4523  ;;  %v3276_v43 = vmul.f32 %v5812_v51, %v5762_v30 }
0x1e72   :  { %3283 = vrot.lane.b32.xlu0 %v3750_v4, %s4626_s29  ;;  %v3752_v26 = vadd.f32 -1.0, %v3268_v27  ;;  %v3247_v1 = vadd.f32 1.0, %v4524_v14  ;;  %v4526_v10 = vpop.eup %4525 }
0x1e73   :  { %3281 = vrot.lane.b32.xlu1 %v3749_v8, %s4626_s29  ;;  %v3751_v5 = vadd.f32 -1.0, %v3267_v44  ;;  %v3250_v13 = vadd.f32 1.0, %v4526_v10 }
0x1e74   :  { %4527 = vrcp.f32 %v3247_v1 }
0x1e75   :  { %4529 = vrcp.f32 %v3250_v13 }
0x1e76   :  { %3287 = vrot.lane.b32.xlu0 %v3752_v26, %s4626_s29 }
0x1e77   :  { %3285 = vrot.lane.b32.xlu1 %v3751_v5, %s4626_s29 }
0x1e7e   :  { %v4528_v39 = vpop.eup %4527 }
0x1e7f   :  { %v4530_v20 = vpop.eup %4529  ;;  %v3273_v37 = vmul.f32 %v4528_v39, %v5751_v58 }
0x1e80   :  { %v3275_v56 = vmul.f32 %v4530_v20, %v5760_v35 }
0x1ee4   :  { %v3284_v28 = vpop.permute.xlu0 %3283 }
0x1ee5   :  { %v3282_v55 = vpop.permute.xlu1 %3281 }
0x1ee6   :  { %v3289_v18 = vsel %vm1256_vm4, %v3282_v55, %v3284_v28 }
0x1ee7   :  { %v3293_v31 = vmul.f32 %v4528_v39, %v3289_v18 }
0x1ee8   :  { %v3288_v15 = vpop.permute.xlu0 %3287 }
0x1ee9   :  { %v3286_v0 = vpop.permute.xlu1 %3285  ;;  %3297 = vrot.lane.b32.xlu1 %v3293_v31, %s4627_s30 }
0x1eea   :  { %v3290_v57 = vsel %vm1256_vm4, %v3286_v0, %v3288_v15 }
0x1eeb   :  { %v3294_v29 = vmul.f32 %v4530_v20, %v3290_v57 }
0x1eed   :  { %3299 = vrot.lane.b32.xlu0 %v3294_v29, %s4627_s30 }
0x1f5b   :  { %v3298_v23 = vpop.permute.xlu1 %3297 }
0x1f5c   :  { %v5828_v40 = vadd.f32 %v3298_v23, %v3273_v37  ;;  %v5830_v46 = vadd.f32 %v3298_v23, %v3274_v21 }
0x1f5e   :  { %4531 = vtanh.f32 %v5828_v40 }
0x1f5f   :  { %4533 = vtanh.f32 %v5830_v46  ;;  %v3300_v25 = vpop.permute.xlu0 %3299 }
0x1f60   :  { %v5837_v2 = vadd.f32 %v3300_v25, %v3275_v56  ;;  %v5839_v61 = vadd.f32 %v3300_v25, %v3276_v43 }
0x1f62   :  { %4535 = vtanh.f32 %v5837_v2 }
0x1f63   :  { %4537 = vtanh.f32 %v5839_v61 }
0x1f68   :  { %v4532_v58 = vpop.eup %4531 }
0x1f69   :  { %v4534_v48 = vpop.eup %4533  ;;  %3315 = vrot.lane.b32.xlu1 %v4532_v58, %s4627_s30 }
0x1f6a   :  { %3317 = vrot.lane.b32.xlu0 %v4534_v48, %s4627_s30 }
0x1f6c   :  { %v4536_v35 = vpop.eup %4535 }
0x1f6d   :  { %v4538_v24 = vpop.eup %4537  ;;  %3319 = vrot.lane.b32.xlu1 %v4536_v35, %s4627_s30 }
0x1f6e   :  { %3321 = vrot.lane.b32.xlu0 %v4538_v24, %s4627_s30  ;;  %v994_v24 = vld [vmem:[%s6049_s3 + $0x4] ss:$0 sm:$0xff] }
0x1fdb   :  { %v3316_v30 = vpop.permute.xlu1 %3315 }
0x1fdc   :  { %v3318_v3 = vpop.permute.xlu0 %3317 }
0x1fdd   :  { %v3323_v7 = vsel %vm1086_vm5, %v3316_v30, %v3318_v3 }
0x1fde   :  { %v5850_v54 = vmul.f32 %v5809_v41, %v3323_v7 }
0x1fdf   :  { %v3320_v9 = vpop.permute.xlu1 %3319 }
0x1fe0   :  { %v3322_v6 = vpop.permute.xlu0 %3321 }
0x1fe1   :  { %v3324_v52 = vsel %vm1086_vm5, %v3320_v9, %v3322_v6 }
0x1fe2   :  { %v5853_v60 = vmul.f32 %v5812_v51, %v3324_v52 }
0x1fe4   :  { %v3349_v42 = vpack.c.bf16 %v5853_v60, %v5850_v54 }
0x1fe6   :  { %3351 = vrot.lane.b32.xlu1 %v3349_v42, %s4629_s6 }
0x2058   :  { %v3352_v4 = vpop.permute.xlu1 %3351 }
0x2059   :  { %3754 = vmatmul.mubr.msk.bf16.vlgmr.msra.gmra.mrb[88].mxu0 %vm1086_vm5, %v3352_v4  ;;  %4145 = vmatmul.mubr.msk.bf16.vlgmr.msra.gmra.mrb[88].mxu1 %vm1086_vm5, %v3352_v4 }
0x212c   :  { %v3390_v27 = vpop.f32.mrb[88].mxu0  ;;  %v3433_v8 = vpop.f32.mrb[88].mxu1 }
0x212d   :  { %v3434_v44 = vadd.f32 %v3433_v8, %v5024_v49  ;;  %v3392_v26 = vpop.f32.mrb[89].mxu0  ;;  %v4146_v41 = vpop.f32.mrb[89].mxu1  ;;  %v3391_v4 = vadd.f32 %v3390_v27, %v4964_v62 }
0x212e   :  { %v3393_v5 = vadd.f32 %v3392_v26, %v5008_v47  ;;  %v3394_v51 = vpop.f32.mrb[90].mxu0  ;;  %v3436_v34 = vpop.f32.mrb[90].mxu1 }
0x212f   :  { %v3758_v38 = vmul.f32 -1.442695, %v3434_v44  ;;  %v3437_v11 = vadd.f32 %v3436_v34, %v5024_v49  ;;  %v3396_v45 = vpop.f32.mrb[91].mxu0  ;;  %v4147_v14 = vpop.f32.mrb[91].mxu1  ;;  %v3395_v52 = vadd.f32 %v3394_v51, %v4964_v62  ;;  %v3756_v8 = vmul.f32 -1.442695, %v3391_v4 }
0x2130   :  { %v3757_v1 = vmul.f32 -1.442695, %v3393_v5  ;;  %v3397_v10 = vadd.f32 %v3396_v45, %v5008_v47 }
0x2131   :  { %v3761_v13 = vmul.f32 -1.442695, %v3437_v11  ;;  %4539 = vpow2.f32 %v3758_v38  ;;  %v3759_v42 = vmul.f32 -1.442695, %v3395_v52 }
0x2132   :  { %v3760_v28 = vmul.f32 -1.442695, %v3397_v10  ;;  %4541 = vpow2.f32 %v3757_v1 }
0x2133   :  { %4543 = vpow2.f32 %v3761_v13 }
0x2134   :  { %4545 = vpow2.f32 %v3760_v28 }
0x213b   :  { %v4540_v55 = vpop.eup %4539 }
0x213c   :  { %v4542_v39 = vpop.eup %4541  ;;  %v3460_v18 = vadd.f32 1.0, %v4540_v55  ;;  %v5902_v55 = vld [vmem:[%s6049_s3 + $0x5] ss:$0 sm:$0xff] }
0x213d   :  { %v3459_v31 = vadd.f32 1.0, %v4542_v39  ;;  %v4544_v15 = vpop.eup %4543 }
0x213e   :  { %4547 = vrcp.f32 %v3460_v18  ;;  %v4546_v0 = vpop.eup %4545  ;;  %v3463_v49 = vadd.f32 1.0, %v4544_v15 }
0x213f   :  { %4549 = vrcp.f32 %v3459_v31  ;;  %v3462_v20 = vadd.f32 1.0, %v4546_v0 }
0x2140   :  { %4551 = vrcp.f32 %v3463_v49 }
0x2141   :  { %4553 = vrcp.f32 %v3462_v20 }
0x2142   :  { %4555 = vpow2.f32 %v3759_v42 }
0x2143   :  { %4557 = vpow2.f32 %v3756_v8 }
0x2148   :  { %v4548_v57 = vpop.eup %4547 }
0x2149   :  { %v5864_v47 = vpop.eup %4549  ;;  %v3477_v29 = vmul.f32 2.0, %v4548_v57 }
0x214a   :  { %v3476_v21 = vmul.f32 2.0, %v5864_v47  ;;  %v4552_v37 = vpop.eup %4551 }
0x214b   :  { %v3763_v23 = vadd.f32 -1.0, %v3477_v29  ;;  %v5867_v56 = vpop.eup %4553  ;;  %v3479_v43 = vmul.f32 2.0, %v4552_v37  ;;  %v3485_v37 = vmul.f32 %v5864_v47, %v5830_v46 }
0x214c   :  { %v3762_v25 = vadd.f32 -1.0, %v3476_v21  ;;  %v3478_v58 = vmul.f32 2.0, %v5867_v56 }
0x214d   :  { %3494 = vrot.lane.b32.xlu1 %v3763_v23, %s4626_s29  ;;  %v3765_v48 = vadd.f32 -1.0, %v3479_v43 }
0x214e   :  { %3492 = vrot.lane.b32.xlu0 %v3762_v25, %s4626_s29  ;;  %v3764_v35 = vadd.f32 -1.0, %v3478_v58 }
0x2151   :  { %3498 = vrot.lane.b32.xlu1 %v3765_v48, %s4626_s29  ;;  %v3487_v48 = vmul.f32 %v5867_v56, %v5839_v61 }
0x2152   :  { %3496 = vrot.lane.b32.xlu0 %v3764_v35, %s4626_s29 }
0x2156   :  { %2010 = vrot.lane.b32.xlu0 %v994_v24, %s4630_s2 }
0x21bf   :  { %v3495_v44 = vpop.permute.xlu1 %3494 }
0x21c0   :  { %v3493_v30 = vpop.permute.xlu0 %3492 }
0x21c1   :  { %v3500_v14 = vsel %vm1256_vm4, %v3493_v30, %v3495_v44 }
0x21c3   :  { %v3499_v26 = vpop.permute.xlu1 %3498 }
0x21c4   :  { %v3497_v3 = vpop.permute.xlu0 %3496 }
0x21c5   :  { %v3501_v62 = vsel %vm1256_vm4, %v3497_v3, %v3499_v26 }
0x21c8   :  { %v5877_v7 = vpop.permute.xlu0 %2010 }
0x21c9   :  { %v2014_v9 = vmul.f32 %v5877_v7, %v5357_v16  ;;  %v2013_v6 = vmul.f32 %v5877_v7, %v5354_v63  ;;  %v4556_v16 = vpop.eup %4555  ;;  %v2239_v10 = vmul.f32 %v5436_v33, %v5877_v7  ;;  %v2238_v28 = vmul.f32 %v5433_v53, %v5877_v7 }
0x21ca   :  { %v3461_v38 = vadd.f32 1.0, %v4556_v16  ;;  %v4558_v51 = vpop.eup %4557  ;;  %v2461_v58 = vmul.f32 %v5512_v22, %v5877_v7  ;;  %v2462_v22 = vmul.f32 %v5515_v50, %v5877_v7  ;;  %v2684_v16 = vmul.f32 %v5603_v17, %v5877_v7 }
0x21cb   :  { %2019 = vrot.lane.b32.xlu0 %v2014_v9, %s4631_s9  ;;  %2017 = vrot.lane.b32.xlu1 %v2013_v6, %s4631_s9  ;;  %v3458_v11 = vadd.f32 1.0, %v4558_v51  ;;  %v3119_v17 = vmul.f32 %v5776_v19, %v5877_v7 }
0x21cc   :  { %4559 = vrcp.f32 %v3461_v38  ;;  %v3329_v38 = vmul.f32 %v5850_v54, %v5877_v7 }
0x21cd   :  { %4561 = vrcp.f32 %v3458_v11  ;;  %v3330_v11 = vmul.f32 %v5853_v60, %v5877_v7 }
0x21d6   :  { %v4560_v27 = vpop.eup %4559 }
0x21d7   :  { %v3505_v45 = vmul.f32 %v4560_v27, %v3501_v62  ;;  %v4562_v1 = vpop.eup %4561  ;;  %v3486_v43 = vmul.f32 %v4560_v27, %v5837_v2 }
0x21d8   :  { %v3504_v13 = vmul.f32 %v4562_v1, %v3500_v14  ;;  %v3484_v29 = vmul.f32 %v4562_v1, %v5828_v40 }
0x223d   :  { %v2020_v41 = vpop.permute.xlu0 %2019  ;;  %v2018_v5 = vpop.permute.xlu1 %2017 }
0x223e   :  { %v2027_v63 = vsel %vm2023_vm10, %v2020_v41, 0.0  ;;  %v2024_v34 = vsel %vm2023_vm10, %v2018_v5, 0.0  ;;  %v2907_v41 = vmul.f32 %v5694_v36, %v5877_v7  ;;  %v2908_v5 = vmul.f32 %v5697_v12, %v5877_v7 }
0x223f   :  { %2028 = vadd.xlane.f32.xlu0 %v2027_v63  ;;  %2025 = vadd.xlane.f32.xlu1 %v2024_v34  ;;  %v3118_v63 = vmul.f32 %v5773_v32, %v5877_v7  ;;  %v2685_v12 = vmul.f32 %v5606_v59, %v5877_v7 }
0x2250   :  { %3510 = vrot.lane.b32.xlu1 %v3505_v45, %s4627_s30 }
0x2254   :  { %2244 = vrot.lane.b32.xlu1 %v2239_v10, %s4631_s9 }
0x2255   :  { %3508 = vrot.lane.b32.xlu0 %v3504_v13, %s4627_s30 }
0x2259   :  { %2242 = vrot.lane.b32.xlu0 %v2238_v28, %s4631_s9 }
0x22cc   :  { %v2029_v39 = vpop.xlane.xlu0 %2028  ;;  %v2026_v18 = vpop.xlane.xlu1 %2025 }
0x22cd   :  { %v2031_v33 = vadd.f32 %v2029_v39, %v5902_v55  ;;  %v2030_v31 = vadd.f32 %v2026_v18, %v5902_v55 }
0x22cf   :  { %2034 = vst.msk [vmem:[%s6050_s4 + $0x8] sm:$0xff] %vm2032_vm11, %v2031_v33  ;;  %2033 = vst.msk [vmem:[%s6050_s4] sm:$0xff] %vm2032_vm11, %v2030_v31 }
0x22d0   :  { %v3511_v53 = vpop.permute.xlu1 %3510  ;;  %v3509_v15 = vpop.permute.xlu0 %3508 }
0x22d1   :  { %v3514_v21 = vadd.f32 %v3509_v15, %v3484_v29  ;;  %v3515_v23 = vadd.f32 %v3509_v15, %v3485_v37  ;;  %v3516_v25 = vadd.f32 %v3511_v53, %v3486_v43  ;;  %v3517_v35 = vadd.f32 %v3511_v53, %v3487_v48 }
0x22d3   :  { %4563 = vtanh.f32 %v3514_v21 }
0x22d4   :  { %v2245_v0 = vpop.permute.xlu1 %2244  ;;  %v2243_v49 = vpop.permute.xlu0 %2242  ;;  %4565 = vtanh.f32 %v3515_v23 }
0x22d5   :  { %v2251_v20 = vsel %vm2023_vm10, %v2245_v0, 0.0  ;;  %v2248_v57 = vsel %vm2023_vm10, %v2243_v49, 0.0  ;;  %4567 = vtanh.f32 %v3516_v25 }
0x22d6   :  { %2252 = vadd.xlane.f32.xlu0 %v2251_v20  ;;  %2249 = vadd.xlane.f32.xlu1 %v2248_v57  ;;  %4569 = vtanh.f32 %v3517_v35 }
0x22dd   :  { %v4564_v40 = vpop.eup %4563 }
0x22de   :  { %v4566_v46 = vpop.eup %4565 }
0x22df   :  { %v4568_v2 = vpop.eup %4567 }
0x22e0   :  { %v4570_v24 = vpop.eup %4569 }
0x22e7   :  { %2465 = vrot.lane.b32.xlu1 %v2461_v58, %s4631_s9 }
0x22ec   :  { %3526 = vrot.lane.b32.xlu0 %v4564_v40, %s4627_s30 }
0x22f0   :  { %3528 = vrot.lane.b32.xlu0 %v4566_v46, %s4627_s30 }
0x22f4   :  { %3530 = vrot.lane.b32.xlu0 %v4568_v2, %s4627_s30 }
0x22f8   :  { %3532 = vrot.lane.b32.xlu0 %v4570_v24, %s4627_s30 }
0x22fc   :  { %2467 = vrot.lane.b32.xlu0 %v2462_v22, %s4631_s9 }
0x2363   :  { %v2250_v61 = vpop.xlane.xlu1 %2249  ;;  %v2253_v30 = vpop.xlane.xlu0 %2252 }
0x2364   :  { %v2254_v3 = vadd.f32 %v2250_v61, %v5902_v55  ;;  %v2255_v9 = vadd.f32 %v2253_v30, %v5902_v55 }
0x2366   :  { %2256 = vst.msk [vmem:[%s6050_s4 + $0x10] sm:$0xff] %vm2032_vm11, %v2254_v3  ;;  %2257 = vst.msk [vmem:[%s6050_s4 + $0x18] sm:$0xff] %vm2032_vm11, %v2255_v9 }
0x2367   :  { %v2466_v6 = vpop.permute.xlu1 %2465  ;;  %v3527_v50 = vpop.permute.xlu0 %3526 }
0x2368   :  { %v2471_v52 = vsel %vm2023_vm10, %v2466_v6, 0.0 }
0x2369   :  { %2472 = vadd.xlane.f32.xlu1 %v2471_v52 }
0x236b   :  { %v3529_v42 = vpop.permute.xlu0 %3528 }
0x236c   :  { %v3534_v34 = vsel %vm1086_vm5, %v3527_v50, %v3529_v42 }
0x236d   :  { %v3538_v36 = vmul.f32 %v5864_v47, %v3534_v34 }
0x236f   :  { %v3531_v4 = vpop.permute.xlu0 %3530  ;;  %v3540_v32 = vmul.f32 %v3538_v36, %v5877_v7 }
0x2373   :  { %v3533_v8 = vpop.permute.xlu0 %3532 }
0x2374   :  { %v3535_v51 = vsel %vm1086_vm5, %v3531_v4, %v3533_v8 }
0x2375   :  { %v3539_v19 = vmul.f32 %v5867_v56, %v3535_v51 }
0x2377   :  { %v2468_v44 = vpop.permute.xlu0 %2467  ;;  %v3541_v54 = vmul.f32 %v3539_v19, %v5877_v7 }
0x2378   :  { %v2474_v26 = vsel %vm2023_vm10, %v2468_v44, 0.0 }
0x2379   :  { %2475 = vadd.xlane.f32.xlu0 %v2474_v26 }
0x237a   :  { %2688 = vrot.lane.b32.xlu1 %v2684_v16, %s4631_s9 }
0x237e   :  { %2911 = vrot.lane.b32.xlu1 %v2907_v41, %s4631_s9 }
0x2382   :  { %2913 = vrot.lane.b32.xlu1 %v2908_v5, %s4631_s9 }
0x2386   :  { %3122 = vrot.lane.b32.xlu1 %v3118_v63, %s4631_s9 }
0x238a   :  { %3124 = vrot.lane.b32.xlu1 %v3119_v17, %s4631_s9 }
0x238e   :  { %3333 = vrot.lane.b32.xlu1 %v3329_v38, %s4631_s9 }
0x238f   :  { %2690 = vrot.lane.b32.xlu0 %v2685_v12, %s4631_s9 }
0x2392   :  { %3544 = vrot.lane.b32.xlu1 %v3540_v32, %s4631_s9 }
0x2393   :  { %3335 = vrot.lane.b32.xlu0 %v3330_v11, %s4631_s9 }
0x2397   :  { %3546 = vrot.lane.b32.xlu0 %v3541_v54, %s4631_s9 }
0x23f6   :  { %v2473_v59 = vpop.xlane.xlu1 %2472 }
0x23f7   :  { %v2477_v47 = vadd.f32 %v2473_v59, %v5902_v55 }
0x23f9   :  { %2479 = vst.msk [vmem:[%s6050_s4 + $0x20] sm:$0xff] %vm2032_vm11, %v2477_v47 }
0x23fa   :  { %v2689_v56 = vpop.permute.xlu1 %2688 }
0x23fb   :  { %v2694_v62 = vsel %vm2023_vm10, %v2689_v56, 0.0 }
0x23fc   :  { %2695 = vadd.xlane.f32.xlu1 %v2694_v62 }
0x23fe   :  { %v2912_v60 = vpop.permute.xlu1 %2911 }
0x23ff   :  { %v2917_v33 = vsel %vm2023_vm10, %v2912_v60, 0.0 }
0x2402   :  { %v2914_v27 = vpop.permute.xlu1 %2913 }
0x2403   :  { %v2920_v45 = vsel %vm2023_vm10, %v2914_v27, 0.0 }
0x2404   :  { %2921 = vadd.xlane.f32.xlu1 %v2920_v45 }
0x2406   :  { %v3123_v7 = vpop.permute.xlu1 %3122  ;;  %v2476_v14 = vpop.xlane.xlu0 %2475 }
0x2407   :  { %v2478_v1 = vadd.f32 %v2476_v14, %v5902_v55  ;;  %v3128_v0 = vsel %vm2023_vm10, %v3123_v7, 0.0 }
0x2409   :  { %2480 = vst.msk [vmem:[%s6050_s4 + $0x28] sm:$0xff] %vm2032_vm11, %v2478_v1 }
0x240a   :  { %v3125_v10 = vpop.permute.xlu1 %3124  ;;  %v2691_v13 = vpop.permute.xlu0 %2690 }
0x240b   :  { %v3131_v28 = vsel %vm2023_vm10, %v3125_v10, 0.0  ;;  %v2697_v39 = vsel %vm2023_vm10, %v2691_v13, 0.0 }
0x240c   :  { %3132 = vadd.xlane.f32.xlu1 %v3131_v28  ;;  %2698 = vadd.xlane.f32.xlu0 %v2697_v39 }
0x240e   :  { %v3336_v18 = vpop.permute.xlu0 %3335  ;;  %v3334_v53 = vpop.permute.xlu1 %3333 }
0x240f   :  { %v3342_v31 = vsel %vm2023_vm10, %v3336_v18, 0.0  ;;  %v3339_v20 = vsel %vm2023_vm10, %v3334_v53, 0.0 }
0x2410   :  { %2918 = vadd.xlane.f32.xlu0 %v2917_v33  ;;  %3343 = vadd.xlane.f32.xlu1 %v3342_v31 }
0x2412   :  { %v3547_v15 = vpop.permute.xlu0 %3546  ;;  %v3545_v57 = vpop.permute.xlu1 %3544 }
0x2413   :  { %v3553_v49 = vsel %vm2023_vm10, %v3547_v15, 0.0  ;;  %v3550_v29 = vsel %vm2023_vm10, %v3545_v57, 0.0 }
0x2414   :  { %3129 = vadd.xlane.f32.xlu0 %v3128_v0  ;;  %3554 = vadd.xlane.f32.xlu1 %v3553_v49 }
0x2418   :  { %3340 = vadd.xlane.f32.xlu0 %v3339_v20 }
0x241c   :  { %3551 = vadd.xlane.f32.xlu0 %v3550_v29 }
0x2489   :  { %v2696_v21 = vpop.xlane.xlu1 %2695 }
0x248a   :  { %v2700_v37 = vadd.f32 %v2696_v21, %v5902_v55 }
0x248c   :  { %2702 = vst.msk [vmem:[%s6050_s4 + $0x30] sm:$0xff] %vm2032_vm11, %v2700_v37 }
0x2491   :  { %v2922_v23 = vpop.xlane.xlu1 %2921 }
0x2492   :  { %v2924_v43 = vadd.f32 %v2922_v23, %v5902_v55 }
0x2494   :  { %2926 = vst.msk [vmem:[%s6050_s4 + $0x48] sm:$0xff] %vm2032_vm11, %v2924_v43 }
0x2499   :  { %v3133_v25 = vpop.xlane.xlu1 %3132  ;;  %v2699_v58 = vpop.xlane.xlu0 %2698 }
0x249a   :  { %v3135_v48 = vadd.f32 %v3133_v25, %v5902_v55  ;;  %v2701_v35 = vadd.f32 %v2699_v58, %v5902_v55 }
0x249c   :  { %3137 = vst.msk [vmem:[%s6050_s4 + $0x58] sm:$0xff] %vm2032_vm11, %v3135_v48  ;;  %2703 = vst.msk [vmem:[%s6050_s4 + $0x38] sm:$0xff] %vm2032_vm11, %v2701_v35 }
0x249d   :  { %v3344_v40 = vpop.xlane.xlu1 %3343  ;;  %v2919_v46 = vpop.xlane.xlu0 %2918 }
0x249e   :  { %v3346_v2 = vadd.f32 %v3344_v40, %v5902_v55  ;;  %v2923_v24 = vadd.f32 %v2919_v46, %v5902_v55 }
0x24a0   :  { %3348 = vst.msk [vmem:[%s6050_s4 + $0x68] sm:$0xff] %vm2032_vm11, %v3346_v2  ;;  %2925 = vst.msk [vmem:[%s6050_s4 + $0x40] sm:$0xff] %vm2032_vm11, %v2923_v24 }
0x24a1   :  { %v3555_v22 = vpop.xlane.xlu1 %3554  ;;  %v3130_v61 = vpop.xlane.xlu0 %3129 }
0x24a2   :  { %v3557_v30 = vadd.f32 %v3555_v22, %v5902_v55  ;;  %v3134_v3 = vadd.f32 %v3130_v61, %v5902_v55 }
0x24a4   :  { %3559 = vst.msk [vmem:[%s6050_s4 + $0x78] sm:$0xff] %vm2032_vm11, %v3557_v30  ;;  %3136 = vst.msk [vmem:[%s6050_s4 + $0x50] sm:$0xff] %vm2032_vm11, %v3134_v3 }
0x24a5   :  { %v3341_v9 = vpop.xlane.xlu0 %3340 }
0x24a6   :  { %v3345_v6 = vadd.f32 %v3341_v9, %v5902_v55 }
0x24a8   :  { %3347 = vst.msk [vmem:[%s6050_s4 + $0x60] sm:$0xff] %vm2032_vm11, %v3345_v6 }
0x24a9   :  { %v3552_v50 = vpop.xlane.xlu0 %3551 }
0x24aa   :  { %v3556_v52 = vadd.f32 %v3552_v50, %v5902_v55 }
0x24ac   :  { %3558 = vst.msk [vmem:[%s6050_s4 + $0x70] sm:$0xff] %vm2032_vm11, %v3556_v52 }
0x24ad   :  { %3564 = vsyncpa [#allocation4], 1 }

</bundles_post_ra>
